<compile_context>
chip_gen: v7x
topology: tpu7x:2x2x1
jax: 0.10.0
libtpu: 0.0.40
codegen_flags: <defaults>
</compile_context>

<pallas_src>
import jax
import jax.numpy as jnp
from jax.experimental import pallas as pl
from jax.experimental.pallas import tpu as pltpu

WEIGHT_DTYPE = jnp.bfloat16   # MXU-native on v6e/v7x; halves weight VMEM.


def _vmem_spec():
    return pl.BlockSpec(memory_space=pltpu.MemorySpace.VMEM)


def _round_up(n, m):
    return -(-n // m) * m


# ---------------------------------------------------------------------------
# Single fused kernel for the whole MaskingModel forward pass.
# ---------------------------------------------------------------------------
def make_fused_kernel(num_blocks, num_layers, T, BP, H):
    """Inputs (refs, in order):
         x (T*BP, F), w_in (F,H), b_in (1,H),
         per block: per layer [wi_r, wi_z, wi_n, wh_r, wh_z, wh_n,
                               bi_r, bi_z, bi_n, bh_r, bh_z, bh_n],
                    then wg (H,H), bg (1,H),
         w_out (H, OUTP), b_out (1, OUTP).
       Output: o (T*BP, OUTP).  Scratch: y_scr (T*BP, H) f32.
    """
    n_in = 3 + num_blocks * (12 * num_layers + 2) + 2

    def kernel(*refs):
        in_refs = refs[:n_in]
        o_ref = refs[n_in]
        y_scr = refs[n_in + 1]

        it = iter(in_refs)
        x_ref, w_in_ref, b_in_ref = next(it), next(it), next(it)
        blocks = []
        for _ in range(num_blocks):
            layers = [tuple(next(it) for _ in range(12))
                      for _ in range(num_layers)]
            blocks.append((layers, next(it), next(it)))
        w_out_ref, b_out_ref = next(it), next(it)

        def mm(a, w):
            # bf16 (or f32) MXU matmul with f32 accumulation.
            return jnp.dot(a.astype(w.dtype), w,
                           preferred_element_type=jnp.float32)

        # ---- input Linear over the whole (T*BP, F) slab --------------------
        h = mm(x_ref[...], w_in_ref[...]) + b_in_ref[...]         # (T*BP, H)

        for layers, wg_ref, bg_ref in blocks:
            y = h                              # block input, kept for the mask
            for (wi_r, wi_z, wi_n, wh_r_ref, wh_z_ref, wh_n_ref,
                 bi_r, bi_z, bi_n, bh_r, bh_z, bh_n) in layers:
                # Hoisted per-gate input-to-hidden projections; each gate is
                # its own lane-aligned (T*BP, H) value.  b_hr/b_hz fold in
                # here; b_hn cannot (it sits inside the r * (...) term).
                gi_r = mm(y, wi_r[...]) + (bi_r[...] + bh_r[...])
                gi_z = mm(y, wi_z[...]) + (bi_z[...] + bh_z[...])
                gi_n = mm(y, wi_n[...]) + bi_n[...]

                # Recurrent weights / bias broadcast hoisted out of the time
                # loop (tiny and spill-free at H=32).
                # TODO(synk): at H >= 128 read wh_* from their refs inside the
                # loop (or cap the unroll) to avoid vreg spills.
                wh_r = wh_r_ref[...]
                wh_z = wh_z_ref[...]
                wh_n = wh_n_ref[...]
                bhn = jnp.broadcast_to(bh_n[...], (BP, H))

                # Static (Python) unroll of the short recurrence: every slice
                # start is a compile-time multiple of BP (8-aligned sublanes),
                # so all loads/stores below are unmasked.
                h_t = jnp.zeros((BP, H), jnp.float32)
                for t in range(T):
                    row = t * BP
                    gh_r = mm(h_t, wh_r)
                    gh_z = mm(h_t, wh_z)
                    gh_n = mm(h_t, wh_n) + bhn
                    # NOTE: each sigmoid operand is a single (8,H) vreg at
                    # these shapes, so stacking r/z would not reduce EUP work.
                    r = jax.nn.sigmoid(gi_r[row:row + BP, :] + gh_r)
                    z = jax.nn.sigmoid(gi_z[row:row + BP, :] + gh_z)
                    n = jnp.tanh(gi_n[row:row + BP, :] + r * gh_n)
                    h_t = (1.0 - z) * n + z * h_t
                    y_scr[pl.ds(row, BP), :] = h_t   # aligned static store
                y = y_scr[...]                       # (T*BP, H) layer output

            # MaskingGRU: block_out = sigmoid(gate(y)) * block_input
            g = jax.nn.sigmoid(mm(y, wg_ref[...]) + bg_ref[...])
            h = g * h

        # ---- output Linear: lane-dense (OUTP multiple of 128) slab store ---
        out = mm(h, w_out_ref[...]) + b_out_ref[...]
        o_ref[...] = out.astype(o_ref.dtype)

    return kernel


# ---------------------------------------------------------------------------
# Wrapper: pad batch/lanes outside the kernel, one pallas_call.
# ---------------------------------------------------------------------------
def masking_model_forward(params, x):
    # x: (T, B, input_size), time-major like nn.GRU (batch_first=False).
    T, B, F = x.shape
    H = params["b_in"].shape[0]
    num_blocks = len(params["blocks"])
    num_layers = len(params["blocks"][0]["layers"]) if num_blocks else 0

    BP = _round_up(max(B, 8), 8)     # sublane-aligned batch pad
    OUTP = _round_up(F, 128)         # lane-dense output pad

    x_pad = jnp.pad(x, ((0, 0), (0, BP - B), (0, 0)))
    x2 = x_pad.reshape(T * BP, F)    # row t*BP + b (time-major)

    def w(a):                        # weights: pre-transposed, cast for MXU
        return a.astype(WEIGHT_DTYPE)

    def b(a):                        # biases as (1, n) f32
        return a.reshape(1, -1).astype(jnp.float32)

    inputs = [x2, w(params["w_in_t"]), b(params["b_in"])]
    for blk in params["blocks"]:
        for lyr in blk["layers"]:
            inputs += [w(lyr["wi_r"]), w(lyr["wi_z"]), w(lyr["wi_n"]),
                       w(lyr["wh_r"]), w(lyr["wh_z"]), w(lyr["wh_n"]),
                       b(lyr["bi_r"]), b(lyr["bi_z"]), b(lyr["bi_n"]),
                       b(lyr["bh_r"]), b(lyr["bh_z"]), b(lyr["bh_n"])]
        inputs += [w(blk["gate"]["wg_t"]), b(blk["gate"]["bg"])]

    # Pad the output projection to a multiple of 128 lanes (sliced off below).
    w_out_p = jnp.pad(params["w_out_t"], ((0, 0), (0, OUTP - F)))
    b_out_p = jnp.pad(params["b_out"], ((0, OUTP - F),))
    inputs += [w(w_out_p), b(b_out_p)]

    kernel = make_fused_kernel(num_blocks, num_layers, T, BP, H)

    # Size the scoped-VMEM limit from the resident working set (+ headroom).
    resident = sum(int(a.size) * a.dtype.itemsize for a in inputs)
    resident += T * BP * OUTP * 4 + T * BP * H * 4
    vmem_limit = int(min(max(2 * resident + (8 << 20), 32 << 20), 100 << 20))

    out2 = pl.pallas_call(
        kernel,
        out_shape=jax.ShapeDtypeStruct((T * BP, OUTP), x.dtype),
        in_specs=[_vmem_spec()] * len(inputs),
        out_specs=_vmem_spec(),
        scratch_shapes=[pltpu.VMEM((T * BP, H), jnp.float32)],
        compiler_params=pltpu.CompilerParams(vmem_limit_bytes=vmem_limit),
        # TODO(synk): at realistic B add a batch grid (block (T, tb, .) over a
        # (T, B, F) layout) with dimension_semantics=("parallel",) to use both
        # v7x TensorCores and pipeline x/out DMA; at realistic H stream
        # per-layer GRU weights (memory_space=pl.ANY + double-buffered
        # make_async_copy) to stay under v7x's 64 MiB VMEM.
    )(*inputs)

    return out2.reshape(T, BP, OUTP)[:, :B, :F]


# ---------------------------------------------------------------------------
# Parameter construction (deterministic synthetic weights; stored transposed
# and split per GRU gate in PyTorch gate order [r | z | n]).
# ---------------------------------------------------------------------------
def init_params(key, input_size, num_blocks, hidden_size, num_layers_per_block):
    def nrm(k, shape, scale=0.1):
        return scale * jax.random.normal(k, shape, dtype=jnp.float32)

    n_keys = 4 + num_blocks * (12 * num_layers_per_block + 2)
    keys = iter(jax.random.split(key, n_keys))
    params = {
        "w_in_t": nrm(next(keys), (input_size, hidden_size)),   # Linear in
        "b_in": nrm(next(keys), (hidden_size,)),
        "w_out_t": nrm(next(keys), (hidden_size, input_size)),  # Linear out
        "b_out": nrm(next(keys), (input_size,)),
        "blocks": [],
    }
    for _ in range(num_blocks):
        layers = []
        for _ in range(num_layers_per_block):
            layers.append({
                "wi_r": nrm(next(keys), (hidden_size, hidden_size)),
                "wi_z": nrm(next(keys), (hidden_size, hidden_size)),
                "wi_n": nrm(next(keys), (hidden_size, hidden_size)),
                "wh_r": nrm(next(keys), (hidden_size, hidden_size)),
                "wh_z": nrm(next(keys), (hidden_size, hidden_size)),
                "wh_n": nrm(next(keys), (hidden_size, hidden_size)),
                "bi_r": nrm(next(keys), (hidden_size,)),
                "bi_z": nrm(next(keys), (hidden_size,)),
                "bi_n": nrm(next(keys), (hidden_size,)),
                "bh_r": nrm(next(keys), (hidden_size,)),
                "bh_z": nrm(next(keys), (hidden_size,)),
                "bh_n": nrm(next(keys), (hidden_size,)),
            })
        gate = {
            "wg_t": nrm(next(keys), (hidden_size, hidden_size)),
            "bg": nrm(next(keys), (hidden_size,)),
        }
        params["blocks"].append({"layers": layers, "gate": gate})
    return params


if __name__ == "__main__":
    input_size = 16
    hidden_size = 32
    num_blocks = 2
    num_layers_per_block = 1
    T, B = 8, 2

    key = jax.random.PRNGKey(0)
    k_params, k_x = jax.random.split(key)
    params = init_params(k_params, input_size, num_blocks,
                         hidden_size, num_layers_per_block)
    x = jax.random.normal(k_x, (T, B, input_size), dtype=jnp.float32)

    fwd = jax.jit(masking_model_forward)
    out = fwd(params, x)
    jax.block_until_ready(out)
    assert out.shape == (T, B, input_size)
    print("KERNEL_OK")
</pallas_src>

<mosaic_0001>
module attributes {stable_mosaic.version = 11 : i64} {
  func.func @kernel(%arg0: memref<64x16xf32, #tpu.memory_space<vmem>>, %arg1: memref<16x32xbf16, #tpu.memory_space<vmem>>, %arg2: memref<1x32xf32, #tpu.memory_space<vmem>>, %arg3: memref<32x32xbf16, #tpu.memory_space<vmem>>, %arg4: memref<32x32xbf16, #tpu.memory_space<vmem>>, %arg5: memref<32x32xbf16, #tpu.memory_space<vmem>>, %arg6: memref<32x32xbf16, #tpu.memory_space<vmem>>, %arg7: memref<32x32xbf16, #tpu.memory_space<vmem>>, %arg8: memref<32x32xbf16, #tpu.memory_space<vmem>>, %arg9: memref<1x32xf32, #tpu.memory_space<vmem>>, %arg10: memref<1x32xf32, #tpu.memory_space<vmem>>, %arg11: memref<1x32xf32, #tpu.memory_space<vmem>>, %arg12: memref<1x32xf32, #tpu.memory_space<vmem>>, %arg13: memref<1x32xf32, #tpu.memory_space<vmem>>, %arg14: memref<1x32xf32, #tpu.memory_space<vmem>>, %arg15: memref<32x32xbf16, #tpu.memory_space<vmem>>, %arg16: memref<1x32xf32, #tpu.memory_space<vmem>>, %arg17: memref<32x32xbf16, #tpu.memory_space<vmem>>, %arg18: memref<32x32xbf16, #tpu.memory_space<vmem>>, %arg19: memref<32x32xbf16, #tpu.memory_space<vmem>>, %arg20: memref<32x32xbf16, #tpu.memory_space<vmem>>, %arg21: memref<32x32xbf16, #tpu.memory_space<vmem>>, %arg22: memref<32x32xbf16, #tpu.memory_space<vmem>>, %arg23: memref<1x32xf32, #tpu.memory_space<vmem>>, %arg24: memref<1x32xf32, #tpu.memory_space<vmem>>, %arg25: memref<1x32xf32, #tpu.memory_space<vmem>>, %arg26: memref<1x32xf32, #tpu.memory_space<vmem>>, %arg27: memref<1x32xf32, #tpu.memory_space<vmem>>, %arg28: memref<1x32xf32, #tpu.memory_space<vmem>>, %arg29: memref<32x32xbf16, #tpu.memory_space<vmem>>, %arg30: memref<1x32xf32, #tpu.memory_space<vmem>>, %arg31: memref<32x128xbf16, #tpu.memory_space<vmem>>, %arg32: memref<1x128xf32, #tpu.memory_space<vmem>>, %arg33: memref<64x128xf32, #tpu.memory_space<vmem>>, %arg34: memref<64x32xf32, #tpu.memory_space<vmem>>) attributes {dimension_semantics = [], scalar_prefetch = 0 : i64, scratch_operands = 1 : i64, tpu.core_type = #tpu.core_type<tc>} {
    %c0 = arith.constant 0 : index
    %c0_0 = arith.constant 0 : index
    %0 = vector.load %arg0[%c0, %c0_0] : memref<64x16xf32, #tpu.memory_space<vmem>>, vector<64x16xf32>
    %c0_1 = arith.constant 0 : index
    %c0_2 = arith.constant 0 : index
    %1 = vector.load %arg1[%c0_1, %c0_2] : memref<16x32xbf16, #tpu.memory_space<vmem>>, vector<16x32xbf16>
    %2 = arith.truncf %0 : vector<64x16xf32> to vector<64x16xbf16>
    %cst = arith.constant dense<0.000000e+00> : vector<64x32xf32>
    %3 = tpu.matmul %2, %1, %cst {dimension_numbers = #tpu.dot_dimension_numbers<[1], [0], [0], [1], [0, 0, 1, 1], [], []>} : vector<64x16xbf16>, vector<16x32xbf16>, vector<64x32xf32> -> vector<64x32xf32>
    %c0_3 = arith.constant 0 : index
    %c0_4 = arith.constant 0 : index
    %4 = vector.load %arg2[%c0_3, %c0_4] : memref<1x32xf32, #tpu.memory_space<vmem>>, vector<1x32xf32>
    %5 = vector.broadcast %4 : vector<1x32xf32> to vector<64x32xf32>
    %6 = arith.addf %3, %5 : vector<64x32xf32>
    %c0_5 = arith.constant 0 : index
    %c0_6 = arith.constant 0 : index
    %7 = vector.load %arg3[%c0_5, %c0_6] : memref<32x32xbf16, #tpu.memory_space<vmem>>, vector<32x32xbf16>
    %8 = arith.truncf %6 : vector<64x32xf32> to vector<64x32xbf16>
    %cst_7 = arith.constant dense<0.000000e+00> : vector<64x32xf32>
    %9 = tpu.matmul %8, %7, %cst_7 {dimension_numbers = #tpu.dot_dimension_numbers<[1], [0], [0], [1], [0, 0, 1, 1], [], []>} : vector<64x32xbf16>, vector<32x32xbf16>, vector<64x32xf32> -> vector<64x32xf32>
    %c0_8 = arith.constant 0 : index
    %c0_9 = arith.constant 0 : index
    %10 = vector.load %arg9[%c0_8, %c0_9] : memref<1x32xf32, #tpu.memory_space<vmem>>, vector<1x32xf32>
    %c0_10 = arith.constant 0 : index
    %c0_11 = arith.constant 0 : index
    %11 = vector.load %arg12[%c0_10, %c0_11] : memref<1x32xf32, #tpu.memory_space<vmem>>, vector<1x32xf32>
    %12 = arith.addf %10, %11 : vector<1x32xf32>
    %13 = vector.broadcast %12 : vector<1x32xf32> to vector<64x32xf32>
    %14 = arith.addf %9, %13 : vector<64x32xf32>
    %c0_12 = arith.constant 0 : index
    %c0_13 = arith.constant 0 : index
    %15 = vector.load %arg4[%c0_12, %c0_13] : memref<32x32xbf16, #tpu.memory_space<vmem>>, vector<32x32xbf16>
    %16 = arith.truncf %6 : vector<64x32xf32> to vector<64x32xbf16>
    %cst_14 = arith.constant dense<0.000000e+00> : vector<64x32xf32>
    %17 = tpu.matmul %16, %15, %cst_14 {dimension_numbers = #tpu.dot_dimension_numbers<[1], [0], [0], [1], [0, 0, 1, 1], [], []>} : vector<64x32xbf16>, vector<32x32xbf16>, vector<64x32xf32> -> vector<64x32xf32>
    %c0_15 = arith.constant 0 : index
    %c0_16 = arith.constant 0 : index
    %18 = vector.load %arg10[%c0_15, %c0_16] : memref<1x32xf32, #tpu.memory_space<vmem>>, vector<1x32xf32>
    %c0_17 = arith.constant 0 : index
    %c0_18 = arith.constant 0 : index
    %19 = vector.load %arg13[%c0_17, %c0_18] : memref<1x32xf32, #tpu.memory_space<vmem>>, vector<1x32xf32>
    %20 = arith.addf %18, %19 : vector<1x32xf32>
    %21 = vector.broadcast %20 : vector<1x32xf32> to vector<64x32xf32>
    %22 = arith.addf %17, %21 : vector<64x32xf32>
    %c0_19 = arith.constant 0 : index
    %c0_20 = arith.constant 0 : index
    %23 = vector.load %arg5[%c0_19, %c0_20] : memref<32x32xbf16, #tpu.memory_space<vmem>>, vector<32x32xbf16>
    %24 = arith.truncf %6 : vector<64x32xf32> to vector<64x32xbf16>
    %cst_21 = arith.constant dense<0.000000e+00> : vector<64x32xf32>
    %25 = tpu.matmul %24, %23, %cst_21 {dimension_numbers = #tpu.dot_dimension_numbers<[1], [0], [0], [1], [0, 0, 1, 1], [], []>} : vector<64x32xbf16>, vector<32x32xbf16>, vector<64x32xf32> -> vector<64x32xf32>
    %c0_22 = arith.constant 0 : index
    %c0_23 = arith.constant 0 : index
    %26 = vector.load %arg11[%c0_22, %c0_23] : memref<1x32xf32, #tpu.memory_space<vmem>>, vector<1x32xf32>
    %27 = vector.broadcast %26 : vector<1x32xf32> to vector<64x32xf32>
    %28 = arith.addf %25, %27 : vector<64x32xf32>
    %c0_24 = arith.constant 0 : index
    %c0_25 = arith.constant 0 : index
    %29 = vector.load %arg6[%c0_24, %c0_25] : memref<32x32xbf16, #tpu.memory_space<vmem>>, vector<32x32xbf16>
    %c0_26 = arith.constant 0 : index
    %c0_27 = arith.constant 0 : index
    %30 = vector.load %arg7[%c0_26, %c0_27] : memref<32x32xbf16, #tpu.memory_space<vmem>>, vector<32x32xbf16>
    %c0_28 = arith.constant 0 : index
    %c0_29 = arith.constant 0 : index
    %31 = vector.load %arg8[%c0_28, %c0_29] : memref<32x32xbf16, #tpu.memory_space<vmem>>, vector<32x32xbf16>
    %c0_30 = arith.constant 0 : index
    %c0_31 = arith.constant 0 : index
    %32 = vector.load %arg14[%c0_30, %c0_31] : memref<1x32xf32, #tpu.memory_space<vmem>>, vector<1x32xf32>
    %33 = vector.shape_cast %32 : vector<1x32xf32> to vector<1x32xf32>
    %34 = vector.broadcast %33 : vector<1x32xf32> to vector<8x32xf32>
    %cst_32 = arith.constant 0.000000e+00 : f32
    %35 = vector.broadcast %cst_32 : f32 to vector<8x32xf32>
    %36 = arith.truncf %35 : vector<8x32xf32> to vector<8x32xbf16>
    %cst_33 = arith.constant dense<0.000000e+00> : vector<8x32xf32>
    %37 = tpu.matmul %36, %29, %cst_33 {dimension_numbers = #tpu.dot_dimension_numbers<[1], [0], [0], [1], [0, 0, 1, 1], [], []>} : vector<8x32xbf16>, vector<32x32xbf16>, vector<8x32xf32> -> vector<8x32xf32>
    %38 = arith.truncf %35 : vector<8x32xf32> to vector<8x32xbf16>
    %cst_34 = arith.constant dense<0.000000e+00> : vector<8x32xf32>
    %39 = tpu.matmul %38, %30, %cst_34 {dimension_numbers = #tpu.dot_dimension_numbers<[1], [0], [0], [1], [0, 0, 1, 1], [], []>} : vector<8x32xbf16>, vector<32x32xbf16>, vector<8x32xf32> -> vector<8x32xf32>
    %40 = arith.truncf %35 : vector<8x32xf32> to vector<8x32xbf16>
    %cst_35 = arith.constant dense<0.000000e+00> : vector<8x32xf32>
    %41 = tpu.matmul %40, %31, %cst_35 {dimension_numbers = #tpu.dot_dimension_numbers<[1], [0], [0], [1], [0, 0, 1, 1], [], []>} : vector<8x32xbf16>, vector<32x32xbf16>, vector<8x32xf32> -> vector<8x32xf32>
    %42 = arith.addf %41, %34 : vector<8x32xf32>
    %43 = vector.extract_strided_slice %14 {offsets = [0, 0], sizes = [8, 32], strides = [1, 1]} : vector<64x32xf32> to vector<8x32xf32>
    %44 = arith.addf %43, %37 : vector<8x32xf32>
    %45 = arith.negf %44 : vector<8x32xf32>
    %46 = math.exp %45 : vector<8x32xf32>
    %cst_36 = arith.constant 1.000000e+00 : f32
    %47 = vector.broadcast %cst_36 : f32 to vector<8x32xf32>
    %48 = arith.addf %47, %46 : vector<8x32xf32>
    %49 = arith.divf %47, %48 : vector<8x32xf32>
    %50 = vector.extract_strided_slice %22 {offsets = [0, 0], sizes = [8, 32], strides = [1, 1]} : vector<64x32xf32> to vector<8x32xf32>
    %51 = arith.addf %50, %39 : vector<8x32xf32>
    %52 = arith.negf %51 : vector<8x32xf32>
    %53 = math.exp %52 : vector<8x32xf32>
    %cst_37 = arith.constant 1.000000e+00 : f32
    %54 = vector.broadcast %cst_37 : f32 to vector<8x32xf32>
    %55 = arith.addf %54, %53 : vector<8x32xf32>
    %56 = arith.divf %54, %55 : vector<8x32xf32>
    %57 = vector.extract_strided_slice %28 {offsets = [0, 0], sizes = [8, 32], strides = [1, 1]} : vector<64x32xf32> to vector<8x32xf32>
    %58 = arith.mulf %49, %42 : vector<8x32xf32>
    %59 = arith.addf %57, %58 : vector<8x32xf32>
    %60 = math.tanh %59 : vector<8x32xf32>
    %cst_38 = arith.constant 1.000000e+00 : f32
    %61 = vector.broadcast %cst_38 : f32 to vector<8x32xf32>
    %62 = arith.subf %61, %56 : vector<8x32xf32>
    %63 = arith.mulf %62, %60 : vector<8x32xf32>
    %64 = arith.mulf %56, %35 : vector<8x32xf32>
    %65 = arith.addf %63, %64 : vector<8x32xf32>
    %c0_39 = arith.constant 0 : index
    %c0_40 = arith.constant 0 : index
    %66 = vector.load %arg34[%c0_39, %c0_40] : memref<64x32xf32, #tpu.memory_space<vmem>>, vector<8x32xf32>
    tpu.vector_store %arg34[%c0_39, %c0_40], %65 {strides = array<i32>} : memref<64x32xf32, #tpu.memory_space<vmem>>, vector<8x32xf32>,
    %67 = arith.truncf %65 : vector<8x32xf32> to vector<8x32xbf16>
    %cst_41 = arith.constant dense<0.000000e+00> : vector<8x32xf32>
    %68 = tpu.matmul %67, %29, %cst_41 {dimension_numbers = #tpu.dot_dimension_numbers<[1], [0], [0], [1], [0, 0, 1, 1], [], []>} : vector<8x32xbf16>, vector<32x32xbf16>, vector<8x32xf32> -> vector<8x32xf32>
    %69 = arith.truncf %65 : vector<8x32xf32> to vector<8x32xbf16>
    %cst_42 = arith.constant dense<0.000000e+00> : vector<8x32xf32>
    %70 = tpu.matmul %69, %30, %cst_42 {dimension_numbers = #tpu.dot_dimension_numbers<[1], [0], [0], [1], [0, 0, 1, 1], [], []>} : vector<8x32xbf16>, vector<32x32xbf16>, vector<8x32xf32> -> vector<8x32xf32>
    %71 = arith.truncf %65 : vector<8x32xf32> to vector<8x32xbf16>
    %cst_43 = arith.constant dense<0.000000e+00> : vector<8x32xf32>
    %72 = tpu.matmul %71, %31, %cst_43 {dimension_numbers = #tpu.dot_dimension_numbers<[1], [0], [0], [1], [0, 0, 1, 1], [], []>} : vector<8x32xbf16>, vector<32x32xbf16>, vector<8x32xf32> -> vector<8x32xf32>
    %73 = arith.addf %72, %34 : vector<8x32xf32>
    %74 = vector.extract_strided_slice %14 {offsets = [8, 0], sizes = [8, 32], strides = [1, 1]} : vector<64x32xf32> to vector<8x32xf32>
    %75 = arith.addf %74, %68 : vector<8x32xf32>
    %76 = arith.negf %75 : vector<8x32xf32>
    %77 = math.exp %76 : vector<8x32xf32>
    %cst_44 = arith.constant 1.000000e+00 : f32
    %78 = vector.broadcast %cst_44 : f32 to vector<8x32xf32>
    %79 = arith.addf %78, %77 : vector<8x32xf32>
    %80 = arith.divf %78, %79 : vector<8x32xf32>
    %81 = vector.extract_strided_slice %22 {offsets = [8, 0], sizes = [8, 32], strides = [1, 1]} : vector<64x32xf32> to vector<8x32xf32>
    %82 = arith.addf %81, %70 : vector<8x32xf32>
    %83 = arith.negf %82 : vector<8x32xf32>
    %84 = math.exp %83 : vector<8x32xf32>
    %cst_45 = arith.constant 1.000000e+00 : f32
    %85 = vector.broadcast %cst_45 : f32 to vector<8x32xf32>
    %86 = arith.addf %85, %84 : vector<8x32xf32>
    %87 = arith.divf %85, %86 : vector<8x32xf32>
    %88 = vector.extract_strided_slice %28 {offsets = [8, 0], sizes = [8, 32], strides = [1, 1]} : vector<64x32xf32> to vector<8x32xf32>
    %89 = arith.mulf %80, %73 : vector<8x32xf32>
    %90 = arith.addf %88, %89 : vector<8x32xf32>
    %91 = math.tanh %90 : vector<8x32xf32>
    %cst_46 = arith.constant 1.000000e+00 : f32
    %92 = vector.broadcast %cst_46 : f32 to vector<8x32xf32>
    %93 = arith.subf %92, %87 : vector<8x32xf32>
    %94 = arith.mulf %93, %91 : vector<8x32xf32>
    %95 = arith.mulf %87, %65 : vector<8x32xf32>
    %96 = arith.addf %94, %95 : vector<8x32xf32>
    %c8 = arith.constant 8 : index
    %c0_47 = arith.constant 0 : index
    %97 = vector.load %arg34[%c8, %c0_47] : memref<64x32xf32, #tpu.memory_space<vmem>>, vector<8x32xf32>
    tpu.vector_store %arg34[%c8, %c0_47], %96 {strides = array<i32>} : memref<64x32xf32, #tpu.memory_space<vmem>>, vector<8x32xf32>,
    %98 = arith.truncf %96 : vector<8x32xf32> to vector<8x32xbf16>
    %cst_48 = arith.constant dense<0.000000e+00> : vector<8x32xf32>
    %99 = tpu.matmul %98, %29, %cst_48 {dimension_numbers = #tpu.dot_dimension_numbers<[1], [0], [0], [1], [0, 0, 1, 1], [], []>} : vector<8x32xbf16>, vector<32x32xbf16>, vector<8x32xf32> -> vector<8x32xf32>
    %100 = arith.truncf %96 : vector<8x32xf32> to vector<8x32xbf16>
    %cst_49 = arith.constant dense<0.000000e+00> : vector<8x32xf32>
    %101 = tpu.matmul %100, %30, %cst_49 {dimension_numbers = #tpu.dot_dimension_numbers<[1], [0], [0], [1], [0, 0, 1, 1], [], []>} : vector<8x32xbf16>, vector<32x32xbf16>, vector<8x32xf32> -> vector<8x32xf32>
    %102 = arith.truncf %96 : vector<8x32xf32> to vector<8x32xbf16>
    %cst_50 = arith.constant dense<0.000000e+00> : vector<8x32xf32>
    %103 = tpu.matmul %102, %31, %cst_50 {dimension_numbers = #tpu.dot_dimension_numbers<[1], [0], [0], [1], [0, 0, 1, 1], [], []>} : vector<8x32xbf16>, vector<32x32xbf16>, vector<8x32xf32> -> vector<8x32xf32>
    %104 = arith.addf %103, %34 : vector<8x32xf32>
    %105 = vector.extract_strided_slice %14 {offsets = [16, 0], sizes = [8, 32], strides = [1, 1]} : vector<64x32xf32> to vector<8x32xf32>
    %106 = arith.addf %105, %99 : vector<8x32xf32>
    %107 = arith.negf %106 : vector<8x32xf32>
    %108 = math.exp %107 : vector<8x32xf32>
    %cst_51 = arith.constant 1.000000e+00 : f32
    %109 = vector.broadcast %cst_51 : f32 to vector<8x32xf32>
    %110 = arith.addf %109, %108 : vector<8x32xf32>
    %111 = arith.divf %109, %110 : vector<8x32xf32>
    %112 = vector.extract_strided_slice %22 {offsets = [16, 0], sizes = [8, 32], strides = [1, 1]} : vector<64x32xf32> to vector<8x32xf32>
    %113 = arith.addf %112, %101 : vector<8x32xf32>
    %114 = arith.negf %113 : vector<8x32xf32>
    %115 = math.exp %114 : vector<8x32xf32>
    %cst_52 = arith.constant 1.000000e+00 : f32
    %116 = vector.broadcast %cst_52 : f32 to vector<8x32xf32>
    %117 = arith.addf %116, %115 : vector<8x32xf32>
    %118 = arith.divf %116, %117 : vector<8x32xf32>
    %119 = vector.extract_strided_slice %28 {offsets = [16, 0], sizes = [8, 32], strides = [1, 1]} : vector<64x32xf32> to vector<8x32xf32>
    %120 = arith.mulf %111, %104 : vector<8x32xf32>
    %121 = arith.addf %119, %120 : vector<8x32xf32>
    %122 = math.tanh %121 : vector<8x32xf32>
    %cst_53 = arith.constant 1.000000e+00 : f32
    %123 = vector.broadcast %cst_53 : f32 to vector<8x32xf32>
    %124 = arith.subf %123, %118 : vector<8x32xf32>
    %125 = arith.mulf %124, %122 : vector<8x32xf32>
    %126 = arith.mulf %118, %96 : vector<8x32xf32>
    %127 = arith.addf %125, %126 : vector<8x32xf32>
    %c16 = arith.constant 16 : index
    %c0_54 = arith.constant 0 : index
    %128 = vector.load %arg34[%c16, %c0_54] : memref<64x32xf32, #tpu.memory_space<vmem>>, vector<8x32xf32>
    tpu.vector_store %arg34[%c16, %c0_54], %127 {strides = array<i32>} : memref<64x32xf32, #tpu.memory_space<vmem>>, vector<8x32xf32>,
    %129 = arith.truncf %127 : vector<8x32xf32> to vector<8x32xbf16>
    %cst_55 = arith.constant dense<0.000000e+00> : vector<8x32xf32>
    %130 = tpu.matmul %129, %29, %cst_55 {dimension_numbers = #tpu.dot_dimension_numbers<[1], [0], [0], [1], [0, 0, 1, 1], [], []>} : vector<8x32xbf16>, vector<32x32xbf16>, vector<8x32xf32> -> vector<8x32xf32>
    %131 = arith.truncf %127 : vector<8x32xf32> to vector<8x32xbf16>
    %cst_56 = arith.constant dense<0.000000e+00> : vector<8x32xf32>
    %132 = tpu.matmul %131, %30, %cst_56 {dimension_numbers = #tpu.dot_dimension_numbers<[1], [0], [0], [1], [0, 0, 1, 1], [], []>} : vector<8x32xbf16>, vector<32x32xbf16>, vector<8x32xf32> -> vector<8x32xf32>
    %133 = arith.truncf %127 : vector<8x32xf32> to vector<8x32xbf16>
    %cst_57 = arith.constant dense<0.000000e+00> : vector<8x32xf32>
    %134 = tpu.matmul %133, %31, %cst_57 {dimension_numbers = #tpu.dot_dimension_numbers<[1], [0], [0], [1], [0, 0, 1, 1], [], []>} : vector<8x32xbf16>, vector<32x32xbf16>, vector<8x32xf32> -> vector<8x32xf32>
    %135 = arith.addf %134, %34 : vector<8x32xf32>
    %136 = vector.extract_strided_slice %14 {offsets = [24, 0], sizes = [8, 32], strides = [1, 1]} : vector<64x32xf32> to vector<8x32xf32>
    %137 = arith.addf %136, %130 : vector<8x32xf32>
    %138 = arith.negf %137 : vector<8x32xf32>
    %139 = math.exp %138 : vector<8x32xf32>
    %cst_58 = arith.constant 1.000000e+00 : f32
    %140 = vector.broadcast %cst_58 : f32 to vector<8x32xf32>
    %141 = arith.addf %140, %139 : vector<8x32xf32>
    %142 = arith.divf %140, %141 : vector<8x32xf32>
    %143 = vector.extract_strided_slice %22 {offsets = [24, 0], sizes = [8, 32], strides = [1, 1]} : vector<64x32xf32> to vector<8x32xf32>
    %144 = arith.addf %143, %132 : vector<8x32xf32>
    %145 = arith.negf %144 : vector<8x32xf32>
    %146 = math.exp %145 : vector<8x32xf32>
    %cst_59 = arith.constant 1.000000e+00 : f32
    %147 = vector.broadcast %cst_59 : f32 to vector<8x32xf32>
    %148 = arith.addf %147, %146 : vector<8x32xf32>
    %149 = arith.divf %147, %148 : vector<8x32xf32>
    %150 = vector.extract_strided_slice %28 {offsets = [24, 0], sizes = [8, 32], strides = [1, 1]} : vector<64x32xf32> to vector<8x32xf32>
    %151 = arith.mulf %142, %135 : vector<8x32xf32>
    %152 = arith.addf %150, %151 : vector<8x32xf32>
    %153 = math.tanh %152 : vector<8x32xf32>
    %cst_60 = arith.constant 1.000000e+00 : f32
    %154 = vector.broadcast %cst_60 : f32 to vector<8x32xf32>
    %155 = arith.subf %154, %149 : vector<8x32xf32>
    %156 = arith.mulf %155, %153 : vector<8x32xf32>
    %157 = arith.mulf %149, %127 : vector<8x32xf32>
    %158 = arith.addf %156, %157 : vector<8x32xf32>
    %c24 = arith.constant 24 : index
    %c0_61 = arith.constant 0 : index
    %159 = vector.load %arg34[%c24, %c0_61] : memref<64x32xf32, #tpu.memory_space<vmem>>, vector<8x32xf32>
    tpu.vector_store %arg34[%c24, %c0_61], %158 {strides = array<i32>} : memref<64x32xf32, #tpu.memory_space<vmem>>, vector<8x32xf32>,
    %160 = arith.truncf %158 : vector<8x32xf32> to vector<8x32xbf16>
    %cst_62 = arith.constant dense<0.000000e+00> : vector<8x32xf32>
    %161 = tpu.matmul %160, %29, %cst_62 {dimension_numbers = #tpu.dot_dimension_numbers<[1], [0], [0], [1], [0, 0, 1, 1], [], []>} : vector<8x32xbf16>, vector<32x32xbf16>, vector<8x32xf32> -> vector<8x32xf32>
    %162 = arith.truncf %158 : vector<8x32xf32> to vector<8x32xbf16>
    %cst_63 = arith.constant dense<0.000000e+00> : vector<8x32xf32>
    %163 = tpu.matmul %162, %30, %cst_63 {dimension_numbers = #tpu.dot_dimension_numbers<[1], [0], [0], [1], [0, 0, 1, 1], [], []>} : vector<8x32xbf16>, vector<32x32xbf16>, vector<8x32xf32> -> vector<8x32xf32>
    %164 = arith.truncf %158 : vector<8x32xf32> to vector<8x32xbf16>
    %cst_64 = arith.constant dense<0.000000e+00> : vector<8x32xf32>
    %165 = tpu.matmul %164, %31, %cst_64 {dimension_numbers = #tpu.dot_dimension_numbers<[1], [0], [0], [1], [0, 0, 1, 1], [], []>} : vector<8x32xbf16>, vector<32x32xbf16>, vector<8x32xf32> -> vector<8x32xf32>
    %166 = arith.addf %165, %34 : vector<8x32xf32>
    %167 = vector.extract_strided_slice %14 {offsets = [32, 0], sizes = [8, 32], strides = [1, 1]} : vector<64x32xf32> to vector<8x32xf32>
    %168 = arith.addf %167, %161 : vector<8x32xf32>
    %169 = arith.negf %168 : vector<8x32xf32>
    %170 = math.exp %169 : vector<8x32xf32>
    %cst_65 = arith.constant 1.000000e+00 : f32
    %171 = vector.broadcast %cst_65 : f32 to vector<8x32xf32>
    %172 = arith.addf %171, %170 : vector<8x32xf32>
    %173 = arith.divf %171, %172 : vector<8x32xf32>
    %174 = vector.extract_strided_slice %22 {offsets = [32, 0], sizes = [8, 32], strides = [1, 1]} : vector<64x32xf32> to vector<8x32xf32>
    %175 = arith.addf %174, %163 : vector<8x32xf32>
    %176 = arith.negf %175 : vector<8x32xf32>
    %177 = math.exp %176 : vector<8x32xf32>
    %cst_66 = arith.constant 1.000000e+00 : f32
    %178 = vector.broadcast %cst_66 : f32 to vector<8x32xf32>
    %179 = arith.addf %178, %177 : vector<8x32xf32>
    %180 = arith.divf %178, %179 : vector<8x32xf32>
    %181 = vector.extract_strided_slice %28 {offsets = [32, 0], sizes = [8, 32], strides = [1, 1]} : vector<64x32xf32> to vector<8x32xf32>
    %182 = arith.mulf %173, %166 : vector<8x32xf32>
    %183 = arith.addf %181, %182 : vector<8x32xf32>
    %184 = math.tanh %183 : vector<8x32xf32>
    %cst_67 = arith.constant 1.000000e+00 : f32
    %185 = vector.broadcast %cst_67 : f32 to vector<8x32xf32>
    %186 = arith.subf %185, %180 : vector<8x32xf32>
    %187 = arith.mulf %186, %184 : vector<8x32xf32>
    %188 = arith.mulf %180, %158 : vector<8x32xf32>
    %189 = arith.addf %187, %188 : vector<8x32xf32>
    %c32 = arith.constant 32 : index
    %c0_68 = arith.constant 0 : index
    %190 = vector.load %arg34[%c32, %c0_68] : memref<64x32xf32, #tpu.memory_space<vmem>>, vector<8x32xf32>
    tpu.vector_store %arg34[%c32, %c0_68], %189 {strides = array<i32>} : memref<64x32xf32, #tpu.memory_space<vmem>>, vector<8x32xf32>,
    %191 = arith.truncf %189 : vector<8x32xf32> to vector<8x32xbf16>
    %cst_69 = arith.constant dense<0.000000e+00> : vector<8x32xf32>
    %192 = tpu.matmul %191, %29, %cst_69 {dimension_numbers = #tpu.dot_dimension_numbers<[1], [0], [0], [1], [0, 0, 1, 1], [], []>} : vector<8x32xbf16>, vector<32x32xbf16>, vector<8x32xf32> -> vector<8x32xf32>
    %193 = arith.truncf %189 : vector<8x32xf32> to vector<8x32xbf16>
    %cst_70 = arith.constant dense<0.000000e+00> : vector<8x32xf32>
    %194 = tpu.matmul %193, %30, %cst_70 {dimension_numbers = #tpu.dot_dimension_numbers<[1], [0], [0], [1], [0, 0, 1, 1], [], []>} : vector<8x32xbf16>, vector<32x32xbf16>, vector<8x32xf32> -> vector<8x32xf32>
    %195 = arith.truncf %189 : vector<8x32xf32> to vector<8x32xbf16>
    %cst_71 = arith.constant dense<0.000000e+00> : vector<8x32xf32>
    %196 = tpu.matmul %195, %31, %cst_71 {dimension_numbers = #tpu.dot_dimension_numbers<[1], [0], [0], [1], [0, 0, 1, 1], [], []>} : vector<8x32xbf16>, vector<32x32xbf16>, vector<8x32xf32> -> vector<8x32xf32>
    %197 = arith.addf %196, %34 : vector<8x32xf32>
    %198 = vector.extract_strided_slice %14 {offsets = [40, 0], sizes = [8, 32], strides = [1, 1]} : vector<64x32xf32> to vector<8x32xf32>
    %199 = arith.addf %198, %192 : vector<8x32xf32>
    %200 = arith.negf %199 : vector<8x32xf32>
    %201 = math.exp %200 : vector<8x32xf32>
    %cst_72 = arith.constant 1.000000e+00 : f32
    %202 = vector.broadcast %cst_72 : f32 to vector<8x32xf32>
    %203 = arith.addf %202, %201 : vector<8x32xf32>
    %204 = arith.divf %202, %203 : vector<8x32xf32>
    %205 = vector.extract_strided_slice %22 {offsets = [40, 0], sizes = [8, 32], strides = [1, 1]} : vector<64x32xf32> to vector<8x32xf32>
    %206 = arith.addf %205, %194 : vector<8x32xf32>
    %207 = arith.negf %206 : vector<8x32xf32>
    %208 = math.exp %207 : vector<8x32xf32>
    %cst_73 = arith.constant 1.000000e+00 : f32
    %209 = vector.broadcast %cst_73 : f32 to vector<8x32xf32>
    %210 = arith.addf %209, %208 : vector<8x32xf32>
    %211 = arith.divf %209, %210 : vector<8x32xf32>
    %212 = vector.extract_strided_slice %28 {offsets = [40, 0], sizes = [8, 32], strides = [1, 1]} : vector<64x32xf32> to vector<8x32xf32>
    %213 = arith.mulf %204, %197 : vector<8x32xf32>
    %214 = arith.addf %212, %213 : vector<8x32xf32>
    %215 = math.tanh %214 : vector<8x32xf32>
    %cst_74 = arith.constant 1.000000e+00 : f32
    %216 = vector.broadcast %cst_74 : f32 to vector<8x32xf32>
    %217 = arith.subf %216, %211 : vector<8x32xf32>
    %218 = arith.mulf %217, %215 : vector<8x32xf32>
    %219 = arith.mulf %211, %189 : vector<8x32xf32>
    %220 = arith.addf %218, %219 : vector<8x32xf32>
    %c40 = arith.constant 40 : index
    %c0_75 = arith.constant 0 : index
    %221 = vector.load %arg34[%c40, %c0_75] : memref<64x32xf32, #tpu.memory_space<vmem>>, vector<8x32xf32>
    tpu.vector_store %arg34[%c40, %c0_75], %220 {strides = array<i32>} : memref<64x32xf32, #tpu.memory_space<vmem>>, vector<8x32xf32>,
    %222 = arith.truncf %220 : vector<8x32xf32> to vector<8x32xbf16>
    %cst_76 = arith.constant dense<0.000000e+00> : vector<8x32xf32>
    %223 = tpu.matmul %222, %29, %cst_76 {dimension_numbers = #tpu.dot_dimension_numbers<[1], [0], [0], [1], [0, 0, 1, 1], [], []>} : vector<8x32xbf16>, vector<32x32xbf16>, vector<8x32xf32> -> vector<8x32xf32>
    %224 = arith.truncf %220 : vector<8x32xf32> to vector<8x32xbf16>
    %cst_77 = arith.constant dense<0.000000e+00> : vector<8x32xf32>
    %225 = tpu.matmul %224, %30, %cst_77 {dimension_numbers = #tpu.dot_dimension_numbers<[1], [0], [0], [1], [0, 0, 1, 1], [], []>} : vector<8x32xbf16>, vector<32x32xbf16>, vector<8x32xf32> -> vector<8x32xf32>
    %226 = arith.truncf %220 : vector<8x32xf32> to vector<8x32xbf16>
    %cst_78 = arith.constant dense<0.000000e+00> : vector<8x32xf32>
    %227 = tpu.matmul %226, %31, %cst_78 {dimension_numbers = #tpu.dot_dimension_numbers<[1], [0], [0], [1], [0, 0, 1, 1], [], []>} : vector<8x32xbf16>, vector<32x32xbf16>, vector<8x32xf32> -> vector<8x32xf32>
    %228 = arith.addf %227, %34 : vector<8x32xf32>
    %229 = vector.extract_strided_slice %14 {offsets = [48, 0], sizes = [8, 32], strides = [1, 1]} : vector<64x32xf32> to vector<8x32xf32>
    %230 = arith.addf %229, %223 : vector<8x32xf32>
    %231 = arith.negf %230 : vector<8x32xf32>
    %232 = math.exp %231 : vector<8x32xf32>
    %cst_79 = arith.constant 1.000000e+00 : f32
    %233 = vector.broadcast %cst_79 : f32 to vector<8x32xf32>
    %234 = arith.addf %233, %232 : vector<8x32xf32>
    %235 = arith.divf %233, %234 : vector<8x32xf32>
    %236 = vector.extract_strided_slice %22 {offsets = [48, 0], sizes = [8, 32], strides = [1, 1]} : vector<64x32xf32> to vector<8x32xf32>
    %237 = arith.addf %236, %225 : vector<8x32xf32>
    %238 = arith.negf %237 : vector<8x32xf32>
    %239 = math.exp %238 : vector<8x32xf32>
    %cst_80 = arith.constant 1.000000e+00 : f32
    %240 = vector.broadcast %cst_80 : f32 to vector<8x32xf32>
    %241 = arith.addf %240, %239 : vector<8x32xf32>
    %242 = arith.divf %240, %241 : vector<8x32xf32>
    %243 = vector.extract_strided_slice %28 {offsets = [48, 0], sizes = [8, 32], strides = [1, 1]} : vector<64x32xf32> to vector<8x32xf32>
    %244 = arith.mulf %235, %228 : vector<8x32xf32>
    %245 = arith.addf %243, %244 : vector<8x32xf32>
    %246 = math.tanh %245 : vector<8x32xf32>
    %cst_81 = arith.constant 1.000000e+00 : f32
    %247 = vector.broadcast %cst_81 : f32 to vector<8x32xf32>
    %248 = arith.subf %247, %242 : vector<8x32xf32>
    %249 = arith.mulf %248, %246 : vector<8x32xf32>
    %250 = arith.mulf %242, %220 : vector<8x32xf32>
    %251 = arith.addf %249, %250 : vector<8x32xf32>
    %c48 = arith.constant 48 : index
    %c0_82 = arith.constant 0 : index
    %252 = vector.load %arg34[%c48, %c0_82] : memref<64x32xf32, #tpu.memory_space<vmem>>, vector<8x32xf32>
    tpu.vector_store %arg34[%c48, %c0_82], %251 {strides = array<i32>} : memref<64x32xf32, #tpu.memory_space<vmem>>, vector<8x32xf32>,
    %253 = arith.truncf %251 : vector<8x32xf32> to vector<8x32xbf16>
    %cst_83 = arith.constant dense<0.000000e+00> : vector<8x32xf32>
    %254 = tpu.matmul %253, %29, %cst_83 {dimension_numbers = #tpu.dot_dimension_numbers<[1], [0], [0], [1], [0, 0, 1, 1], [], []>} : vector<8x32xbf16>, vector<32x32xbf16>, vector<8x32xf32> -> vector<8x32xf32>
    %255 = arith.truncf %251 : vector<8x32xf32> to vector<8x32xbf16>
    %cst_84 = arith.constant dense<0.000000e+00> : vector<8x32xf32>
    %256 = tpu.matmul %255, %30, %cst_84 {dimension_numbers = #tpu.dot_dimension_numbers<[1], [0], [0], [1], [0, 0, 1, 1], [], []>} : vector<8x32xbf16>, vector<32x32xbf16>, vector<8x32xf32> -> vector<8x32xf32>
    %257 = arith.truncf %251 : vector<8x32xf32> to vector<8x32xbf16>
    %cst_85 = arith.constant dense<0.000000e+00> : vector<8x32xf32>
    %258 = tpu.matmul %257, %31, %cst_85 {dimension_numbers = #tpu.dot_dimension_numbers<[1], [0], [0], [1], [0, 0, 1, 1], [], []>} : vector<8x32xbf16>, vector<32x32xbf16>, vector<8x32xf32> -> vector<8x32xf32>
    %259 = arith.addf %258, %34 : vector<8x32xf32>
    %260 = vector.extract_strided_slice %14 {offsets = [56, 0], sizes = [8, 32], strides = [1, 1]} : vector<64x32xf32> to vector<8x32xf32>
    %261 = arith.addf %260, %254 : vector<8x32xf32>
    %262 = arith.negf %261 : vector<8x32xf32>
    %263 = math.exp %262 : vector<8x32xf32>
    %cst_86 = arith.constant 1.000000e+00 : f32
    %264 = vector.broadcast %cst_86 : f32 to vector<8x32xf32>
    %265 = arith.addf %264, %263 : vector<8x32xf32>
    %266 = arith.divf %264, %265 : vector<8x32xf32>
    %267 = vector.extract_strided_slice %22 {offsets = [56, 0], sizes = [8, 32], strides = [1, 1]} : vector<64x32xf32> to vector<8x32xf32>
    %268 = arith.addf %267, %256 : vector<8x32xf32>
    %269 = arith.negf %268 : vector<8x32xf32>
    %270 = math.exp %269 : vector<8x32xf32>
    %cst_87 = arith.constant 1.000000e+00 : f32
    %271 = vector.broadcast %cst_87 : f32 to vector<8x32xf32>
    %272 = arith.addf %271, %270 : vector<8x32xf32>
    %273 = arith.divf %271, %272 : vector<8x32xf32>
    %274 = vector.extract_strided_slice %28 {offsets = [56, 0], sizes = [8, 32], strides = [1, 1]} : vector<64x32xf32> to vector<8x32xf32>
    %275 = arith.mulf %266, %259 : vector<8x32xf32>
    %276 = arith.addf %274, %275 : vector<8x32xf32>
    %277 = math.tanh %276 : vector<8x32xf32>
    %cst_88 = arith.constant 1.000000e+00 : f32
    %278 = vector.broadcast %cst_88 : f32 to vector<8x32xf32>
    %279 = arith.subf %278, %273 : vector<8x32xf32>
    %280 = arith.mulf %279, %277 : vector<8x32xf32>
    %281 = arith.mulf %273, %251 : vector<8x32xf32>
    %282 = arith.addf %280, %281 : vector<8x32xf32>
    %c56 = arith.constant 56 : index
    %c0_89 = arith.constant 0 : index
    %283 = vector.load %arg34[%c56, %c0_89] : memref<64x32xf32, #tpu.memory_space<vmem>>, vector<8x32xf32>
    tpu.vector_store %arg34[%c56, %c0_89], %282 {strides = array<i32>} : memref<64x32xf32, #tpu.memory_space<vmem>>, vector<8x32xf32>,
    %c0_90 = arith.constant 0 : index
    %c0_91 = arith.constant 0 : index
    %284 = vector.load %arg34[%c0_90, %c0_91] : memref<64x32xf32, #tpu.memory_space<vmem>>, vector<64x32xf32>
    %c0_92 = arith.constant 0 : index
    %c0_93 = arith.constant 0 : index
    %285 = vector.load %arg15[%c0_92, %c0_93] : memref<32x32xbf16, #tpu.memory_space<vmem>>, vector<32x32xbf16>
    %286 = arith.truncf %284 : vector<64x32xf32> to vector<64x32xbf16>
    %cst_94 = arith.constant dense<0.000000e+00> : vector<64x32xf32>
    %287 = tpu.matmul %286, %285, %cst_94 {dimension_numbers = #tpu.dot_dimension_numbers<[1], [0], [0], [1], [0, 0, 1, 1], [], []>} : vector<64x32xbf16>, vector<32x32xbf16>, vector<64x32xf32> -> vector<64x32xf32>
    %c0_95 = arith.constant 0 : index
    %c0_96 = arith.constant 0 : index
    %288 = vector.load %arg16[%c0_95, %c0_96] : memref<1x32xf32, #tpu.memory_space<vmem>>, vector<1x32xf32>
    %289 = vector.broadcast %288 : vector<1x32xf32> to vector<64x32xf32>
    %290 = arith.addf %287, %289 : vector<64x32xf32>
    %291 = arith.negf %290 : vector<64x32xf32>
    %292 = math.exp %291 : vector<64x32xf32>
    %cst_97 = arith.constant 1.000000e+00 : f32
    %293 = vector.broadcast %cst_97 : f32 to vector<64x32xf32>
    %294 = arith.addf %293, %292 : vector<64x32xf32>
    %295 = arith.divf %293, %294 : vector<64x32xf32>
    %296 = arith.mulf %295, %6 : vector<64x32xf32>
    %c0_98 = arith.constant 0 : index
    %c0_99 = arith.constant 0 : index
    %297 = vector.load %arg17[%c0_98, %c0_99] : memref<32x32xbf16, #tpu.memory_space<vmem>>, vector<32x32xbf16>
    %298 = arith.truncf %296 : vector<64x32xf32> to vector<64x32xbf16>
    %cst_100 = arith.constant dense<0.000000e+00> : vector<64x32xf32>
    %299 = tpu.matmul %298, %297, %cst_100 {dimension_numbers = #tpu.dot_dimension_numbers<[1], [0], [0], [1], [0, 0, 1, 1], [], []>} : vector<64x32xbf16>, vector<32x32xbf16>, vector<64x32xf32> -> vector<64x32xf32>
    %c0_101 = arith.constant 0 : index
    %c0_102 = arith.constant 0 : index
    %300 = vector.load %arg23[%c0_101, %c0_102] : memref<1x32xf32, #tpu.memory_space<vmem>>, vector<1x32xf32>
    %c0_103 = arith.constant 0 : index
    %c0_104 = arith.constant 0 : index
    %301 = vector.load %arg26[%c0_103, %c0_104] : memref<1x32xf32, #tpu.memory_space<vmem>>, vector<1x32xf32>
    %302 = arith.addf %300, %301 : vector<1x32xf32>
    %303 = vector.broadcast %302 : vector<1x32xf32> to vector<64x32xf32>
    %304 = arith.addf %299, %303 : vector<64x32xf32>
    %c0_105 = arith.constant 0 : index
    %c0_106 = arith.constant 0 : index
    %305 = vector.load %arg18[%c0_105, %c0_106] : memref<32x32xbf16, #tpu.memory_space<vmem>>, vector<32x32xbf16>
    %306 = arith.truncf %296 : vector<64x32xf32> to vector<64x32xbf16>
    %cst_107 = arith.constant dense<0.000000e+00> : vector<64x32xf32>
    %307 = tpu.matmul %306, %305, %cst_107 {dimension_numbers = #tpu.dot_dimension_numbers<[1], [0], [0], [1], [0, 0, 1, 1], [], []>} : vector<64x32xbf16>, vector<32x32xbf16>, vector<64x32xf32> -> vector<64x32xf32>
    %c0_108 = arith.constant 0 : index
    %c0_109 = arith.constant 0 : index
    %308 = vector.load %arg24[%c0_108, %c0_109] : memref<1x32xf32, #tpu.memory_space<vmem>>, vector<1x32xf32>
    %c0_110 = arith.constant 0 : index
    %c0_111 = arith.constant 0 : index
    %309 = vector.load %arg27[%c0_110, %c0_111] : memref<1x32xf32, #tpu.memory_space<vmem>>, vector<1x32xf32>
    %310 = arith.addf %308, %309 : vector<1x32xf32>
    %311 = vector.broadcast %310 : vector<1x32xf32> to vector<64x32xf32>
    %312 = arith.addf %307, %311 : vector<64x32xf32>
    %c0_112 = arith.constant 0 : index
    %c0_113 = arith.constant 0 : index
    %313 = vector.load %arg19[%c0_112, %c0_113] : memref<32x32xbf16, #tpu.memory_space<vmem>>, vector<32x32xbf16>
    %314 = arith.truncf %296 : vector<64x32xf32> to vector<64x32xbf16>
    %cst_114 = arith.constant dense<0.000000e+00> : vector<64x32xf32>
    %315 = tpu.matmul %314, %313, %cst_114 {dimension_numbers = #tpu.dot_dimension_numbers<[1], [0], [0], [1], [0, 0, 1, 1], [], []>} : vector<64x32xbf16>, vector<32x32xbf16>, vector<64x32xf32> -> vector<64x32xf32>
    %c0_115 = arith.constant 0 : index
    %c0_116 = arith.constant 0 : index
    %316 = vector.load %arg25[%c0_115, %c0_116] : memref<1x32xf32, #tpu.memory_space<vmem>>, vector<1x32xf32>
    %317 = vector.broadcast %316 : vector<1x32xf32> to vector<64x32xf32>
    %318 = arith.addf %315, %317 : vector<64x32xf32>
    %c0_117 = arith.constant 0 : index
    %c0_118 = arith.constant 0 : index
    %319 = vector.load %arg20[%c0_117, %c0_118] : memref<32x32xbf16, #tpu.memory_space<vmem>>, vector<32x32xbf16>
    %c0_119 = arith.constant 0 : index
    %c0_120 = arith.constant 0 : index
    %320 = vector.load %arg21[%c0_119, %c0_120] : memref<32x32xbf16, #tpu.memory_space<vmem>>, vector<32x32xbf16>
    %c0_121 = arith.constant 0 : index
    %c0_122 = arith.constant 0 : index
    %321 = vector.load %arg22[%c0_121, %c0_122] : memref<32x32xbf16, #tpu.memory_space<vmem>>, vector<32x32xbf16>
    %c0_123 = arith.constant 0 : index
    %c0_124 = arith.constant 0 : index
    %322 = vector.load %arg28[%c0_123, %c0_124] : memref<1x32xf32, #tpu.memory_space<vmem>>, vector<1x32xf32>
    %323 = vector.shape_cast %322 : vector<1x32xf32> to vector<1x32xf32>
    %324 = vector.broadcast %323 : vector<1x32xf32> to vector<8x32xf32>
    %cst_125 = arith.constant 0.000000e+00 : f32
    %325 = vector.broadcast %cst_125 : f32 to vector<8x32xf32>
    %326 = arith.truncf %325 : vector<8x32xf32> to vector<8x32xbf16>
    %cst_126 = arith.constant dense<0.000000e+00> : vector<8x32xf32>
    %327 = tpu.matmul %326, %319, %cst_126 {dimension_numbers = #tpu.dot_dimension_numbers<[1], [0], [0], [1], [0, 0, 1, 1], [], []>} : vector<8x32xbf16>, vector<32x32xbf16>, vector<8x32xf32> -> vector<8x32xf32>
    %328 = arith.truncf %325 : vector<8x32xf32> to vector<8x32xbf16>
    %cst_127 = arith.constant dense<0.000000e+00> : vector<8x32xf32>
    %329 = tpu.matmul %328, %320, %cst_127 {dimension_numbers = #tpu.dot_dimension_numbers<[1], [0], [0], [1], [0, 0, 1, 1], [], []>} : vector<8x32xbf16>, vector<32x32xbf16>, vector<8x32xf32> -> vector<8x32xf32>
    %330 = arith.truncf %325 : vector<8x32xf32> to vector<8x32xbf16>
    %cst_128 = arith.constant dense<0.000000e+00> : vector<8x32xf32>
    %331 = tpu.matmul %330, %321, %cst_128 {dimension_numbers = #tpu.dot_dimension_numbers<[1], [0], [0], [1], [0, 0, 1, 1], [], []>} : vector<8x32xbf16>, vector<32x32xbf16>, vector<8x32xf32> -> vector<8x32xf32>
    %332 = arith.addf %331, %324 : vector<8x32xf32>
    %333 = vector.extract_strided_slice %304 {offsets = [0, 0], sizes = [8, 32], strides = [1, 1]} : vector<64x32xf32> to vector<8x32xf32>
    %334 = arith.addf %333, %327 : vector<8x32xf32>
    %335 = arith.negf %334 : vector<8x32xf32>
    %336 = math.exp %335 : vector<8x32xf32>
    %cst_129 = arith.constant 1.000000e+00 : f32
    %337 = vector.broadcast %cst_129 : f32 to vector<8x32xf32>
    %338 = arith.addf %337, %336 : vector<8x32xf32>
    %339 = arith.divf %337, %338 : vector<8x32xf32>
    %340 = vector.extract_strided_slice %312 {offsets = [0, 0], sizes = [8, 32], strides = [1, 1]} : vector<64x32xf32> to vector<8x32xf32>
    %341 = arith.addf %340, %329 : vector<8x32xf32>
    %342 = arith.negf %341 : vector<8x32xf32>
    %343 = math.exp %342 : vector<8x32xf32>
    %cst_130 = arith.constant 1.000000e+00 : f32
    %344 = vector.broadcast %cst_130 : f32 to vector<8x32xf32>
    %345 = arith.addf %344, %343 : vector<8x32xf32>
    %346 = arith.divf %344, %345 : vector<8x32xf32>
    %347 = vector.extract_strided_slice %318 {offsets = [0, 0], sizes = [8, 32], strides = [1, 1]} : vector<64x32xf32> to vector<8x32xf32>
    %348 = arith.mulf %339, %332 : vector<8x32xf32>
    %349 = arith.addf %347, %348 : vector<8x32xf32>
    %350 = math.tanh %349 : vector<8x32xf32>
    %cst_131 = arith.constant 1.000000e+00 : f32
    %351 = vector.broadcast %cst_131 : f32 to vector<8x32xf32>
    %352 = arith.subf %351, %346 : vector<8x32xf32>
    %353 = arith.mulf %352, %350 : vector<8x32xf32>
    %354 = arith.mulf %346, %325 : vector<8x32xf32>
    %355 = arith.addf %353, %354 : vector<8x32xf32>
    %c0_132 = arith.constant 0 : index
    %c0_133 = arith.constant 0 : index
    %356 = vector.load %arg34[%c0_132, %c0_133] : memref<64x32xf32, #tpu.memory_space<vmem>>, vector<8x32xf32>
    tpu.vector_store %arg34[%c0_132, %c0_133], %355 {strides = array<i32>} : memref<64x32xf32, #tpu.memory_space<vmem>>, vector<8x32xf32>,
    %357 = arith.truncf %355 : vector<8x32xf32> to vector<8x32xbf16>
    %cst_134 = arith.constant dense<0.000000e+00> : vector<8x32xf32>
    %358 = tpu.matmul %357, %319, %cst_134 {dimension_numbers = #tpu.dot_dimension_numbers<[1], [0], [0], [1], [0, 0, 1, 1], [], []>} : vector<8x32xbf16>, vector<32x32xbf16>, vector<8x32xf32> -> vector<8x32xf32>
    %359 = arith.truncf %355 : vector<8x32xf32> to vector<8x32xbf16>
    %cst_135 = arith.constant dense<0.000000e+00> : vector<8x32xf32>
    %360 = tpu.matmul %359, %320, %cst_135 {dimension_numbers = #tpu.dot_dimension_numbers<[1], [0], [0], [1], [0, 0, 1, 1], [], []>} : vector<8x32xbf16>, vector<32x32xbf16>, vector<8x32xf32> -> vector<8x32xf32>
    %361 = arith.truncf %355 : vector<8x32xf32> to vector<8x32xbf16>
    %cst_136 = arith.constant dense<0.000000e+00> : vector<8x32xf32>
    %362 = tpu.matmul %361, %321, %cst_136 {dimension_numbers = #tpu.dot_dimension_numbers<[1], [0], [0], [1], [0, 0, 1, 1], [], []>} : vector<8x32xbf16>, vector<32x32xbf16>, vector<8x32xf32> -> vector<8x32xf32>
    %363 = arith.addf %362, %324 : vector<8x32xf32>
    %364 = vector.extract_strided_slice %304 {offsets = [8, 0], sizes = [8, 32], strides = [1, 1]} : vector<64x32xf32> to vector<8x32xf32>
    %365 = arith.addf %364, %358 : vector<8x32xf32>
    %366 = arith.negf %365 : vector<8x32xf32>
    %367 = math.exp %366 : vector<8x32xf32>
    %cst_137 = arith.constant 1.000000e+00 : f32
    %368 = vector.broadcast %cst_137 : f32 to vector<8x32xf32>
    %369 = arith.addf %368, %367 : vector<8x32xf32>
    %370 = arith.divf %368, %369 : vector<8x32xf32>
    %371 = vector.extract_strided_slice %312 {offsets = [8, 0], sizes = [8, 32], strides = [1, 1]} : vector<64x32xf32> to vector<8x32xf32>
    %372 = arith.addf %371, %360 : vector<8x32xf32>
    %373 = arith.negf %372 : vector<8x32xf32>
    %374 = math.exp %373 : vector<8x32xf32>
    %cst_138 = arith.constant 1.000000e+00 : f32
    %375 = vector.broadcast %cst_138 : f32 to vector<8x32xf32>
    %376 = arith.addf %375, %374 : vector<8x32xf32>
    %377 = arith.divf %375, %376 : vector<8x32xf32>
    %378 = vector.extract_strided_slice %318 {offsets = [8, 0], sizes = [8, 32], strides = [1, 1]} : vector<64x32xf32> to vector<8x32xf32>
    %379 = arith.mulf %370, %363 : vector<8x32xf32>
    %380 = arith.addf %378, %379 : vector<8x32xf32>
    %381 = math.tanh %380 : vector<8x32xf32>
    %cst_139 = arith.constant 1.000000e+00 : f32
    %382 = vector.broadcast %cst_139 : f32 to vector<8x32xf32>
    %383 = arith.subf %382, %377 : vector<8x32xf32>
    %384 = arith.mulf %383, %381 : vector<8x32xf32>
    %385 = arith.mulf %377, %355 : vector<8x32xf32>
    %386 = arith.addf %384, %385 : vector<8x32xf32>
    %c8_140 = arith.constant 8 : index
    %c0_141 = arith.constant 0 : index
    %387 = vector.load %arg34[%c8_140, %c0_141] : memref<64x32xf32, #tpu.memory_space<vmem>>, vector<8x32xf32>
    tpu.vector_store %arg34[%c8_140, %c0_141], %386 {strides = array<i32>} : memref<64x32xf32, #tpu.memory_space<vmem>>, vector<8x32xf32>,
    %388 = arith.truncf %386 : vector<8x32xf32> to vector<8x32xbf16>
    %cst_142 = arith.constant dense<0.000000e+00> : vector<8x32xf32>
    %389 = tpu.matmul %388, %319, %cst_142 {dimension_numbers = #tpu.dot_dimension_numbers<[1], [0], [0], [1], [0, 0, 1, 1], [], []>} : vector<8x32xbf16>, vector<32x32xbf16>, vector<8x32xf32> -> vector<8x32xf32>
    %390 = arith.truncf %386 : vector<8x32xf32> to vector<8x32xbf16>
    %cst_143 = arith.constant dense<0.000000e+00> : vector<8x32xf32>
    %391 = tpu.matmul %390, %320, %cst_143 {dimension_numbers = #tpu.dot_dimension_numbers<[1], [0], [0], [1], [0, 0, 1, 1], [], []>} : vector<8x32xbf16>, vector<32x32xbf16>, vector<8x32xf32> -> vector<8x32xf32>
    %392 = arith.truncf %386 : vector<8x32xf32> to vector<8x32xbf16>
    %cst_144 = arith.constant dense<0.000000e+00> : vector<8x32xf32>
    %393 = tpu.matmul %392, %321, %cst_144 {dimension_numbers = #tpu.dot_dimension_numbers<[1], [0], [0], [1], [0, 0, 1, 1], [], []>} : vector<8x32xbf16>, vector<32x32xbf16>, vector<8x32xf32> -> vector<8x32xf32>
    %394 = arith.addf %393, %324 : vector<8x32xf32>
    %395 = vector.extract_strided_slice %304 {offsets = [16, 0], sizes = [8, 32], strides = [1, 1]} : vector<64x32xf32> to vector<8x32xf32>
    %396 = arith.addf %395, %389 : vector<8x32xf32>
    %397 = arith.negf %396 : vector<8x32xf32>
    %398 = math.exp %397 : vector<8x32xf32>
    %cst_145 = arith.constant 1.000000e+00 : f32
    %399 = vector.broadcast %cst_145 : f32 to vector<8x32xf32>
    %400 = arith.addf %399, %398 : vector<8x32xf32>
    %401 = arith.divf %399, %400 : vector<8x32xf32>
    %402 = vector.extract_strided_slice %312 {offsets = [16, 0], sizes = [8, 32], strides = [1, 1]} : vector<64x32xf32> to vector<8x32xf32>
    %403 = arith.addf %402, %391 : vector<8x32xf32>
    %404 = arith.negf %403 : vector<8x32xf32>
    %405 = math.exp %404 : vector<8x32xf32>
    %cst_146 = arith.constant 1.000000e+00 : f32
    %406 = vector.broadcast %cst_146 : f32 to vector<8x32xf32>
    %407 = arith.addf %406, %405 : vector<8x32xf32>
    %408 = arith.divf %406, %407 : vector<8x32xf32>
    %409 = vector.extract_strided_slice %318 {offsets = [16, 0], sizes = [8, 32], strides = [1, 1]} : vector<64x32xf32> to vector<8x32xf32>
    %410 = arith.mulf %401, %394 : vector<8x32xf32>
    %411 = arith.addf %409, %410 : vector<8x32xf32>
    %412 = math.tanh %411 : vector<8x32xf32>
    %cst_147 = arith.constant 1.000000e+00 : f32
    %413 = vector.broadcast %cst_147 : f32 to vector<8x32xf32>
    %414 = arith.subf %413, %408 : vector<8x32xf32>
    %415 = arith.mulf %414, %412 : vector<8x32xf32>
    %416 = arith.mulf %408, %386 : vector<8x32xf32>
    %417 = arith.addf %415, %416 : vector<8x32xf32>
    %c16_148 = arith.constant 16 : index
    %c0_149 = arith.constant 0 : index
    %418 = vector.load %arg34[%c16_148, %c0_149] : memref<64x32xf32, #tpu.memory_space<vmem>>, vector<8x32xf32>
    tpu.vector_store %arg34[%c16_148, %c0_149], %417 {strides = array<i32>} : memref<64x32xf32, #tpu.memory_space<vmem>>, vector<8x32xf32>,
    %419 = arith.truncf %417 : vector<8x32xf32> to vector<8x32xbf16>
    %cst_150 = arith.constant dense<0.000000e+00> : vector<8x32xf32>
    %420 = tpu.matmul %419, %319, %cst_150 {dimension_numbers = #tpu.dot_dimension_numbers<[1], [0], [0], [1], [0, 0, 1, 1], [], []>} : vector<8x32xbf16>, vector<32x32xbf16>, vector<8x32xf32> -> vector<8x32xf32>
    %421 = arith.truncf %417 : vector<8x32xf32> to vector<8x32xbf16>
    %cst_151 = arith.constant dense<0.000000e+00> : vector<8x32xf32>
    %422 = tpu.matmul %421, %320, %cst_151 {dimension_numbers = #tpu.dot_dimension_numbers<[1], [0], [0], [1], [0, 0, 1, 1], [], []>} : vector<8x32xbf16>, vector<32x32xbf16>, vector<8x32xf32> -> vector<8x32xf32>
    %423 = arith.truncf %417 : vector<8x32xf32> to vector<8x32xbf16>
    %cst_152 = arith.constant dense<0.000000e+00> : vector<8x32xf32>
    %424 = tpu.matmul %423, %321, %cst_152 {dimension_numbers = #tpu.dot_dimension_numbers<[1], [0], [0], [1], [0, 0, 1, 1], [], []>} : vector<8x32xbf16>, vector<32x32xbf16>, vector<8x32xf32> -> vector<8x32xf32>
    %425 = arith.addf %424, %324 : vector<8x32xf32>
    %426 = vector.extract_strided_slice %304 {offsets = [24, 0], sizes = [8, 32], strides = [1, 1]} : vector<64x32xf32> to vector<8x32xf32>
    %427 = arith.addf %426, %420 : vector<8x32xf32>
    %428 = arith.negf %427 : vector<8x32xf32>
    %429 = math.exp %428 : vector<8x32xf32>
    %cst_153 = arith.constant 1.000000e+00 : f32
    %430 = vector.broadcast %cst_153 : f32 to vector<8x32xf32>
    %431 = arith.addf %430, %429 : vector<8x32xf32>
    %432 = arith.divf %430, %431 : vector<8x32xf32>
    %433 = vector.extract_strided_slice %312 {offsets = [24, 0], sizes = [8, 32], strides = [1, 1]} : vector<64x32xf32> to vector<8x32xf32>
    %434 = arith.addf %433, %422 : vector<8x32xf32>
    %435 = arith.negf %434 : vector<8x32xf32>
    %436 = math.exp %435 : vector<8x32xf32>
    %cst_154 = arith.constant 1.000000e+00 : f32
    %437 = vector.broadcast %cst_154 : f32 to vector<8x32xf32>
    %438 = arith.addf %437, %436 : vector<8x32xf32>
    %439 = arith.divf %437, %438 : vector<8x32xf32>
    %440 = vector.extract_strided_slice %318 {offsets = [24, 0], sizes = [8, 32], strides = [1, 1]} : vector<64x32xf32> to vector<8x32xf32>
    %441 = arith.mulf %432, %425 : vector<8x32xf32>
    %442 = arith.addf %440, %441 : vector<8x32xf32>
    %443 = math.tanh %442 : vector<8x32xf32>
    %cst_155 = arith.constant 1.000000e+00 : f32
    %444 = vector.broadcast %cst_155 : f32 to vector<8x32xf32>
    %445 = arith.subf %444, %439 : vector<8x32xf32>
    %446 = arith.mulf %445, %443 : vector<8x32xf32>
    %447 = arith.mulf %439, %417 : vector<8x32xf32>
    %448 = arith.addf %446, %447 : vector<8x32xf32>
    %c24_156 = arith.constant 24 : index
    %c0_157 = arith.constant 0 : index
    %449 = vector.load %arg34[%c24_156, %c0_157] : memref<64x32xf32, #tpu.memory_space<vmem>>, vector<8x32xf32>
    tpu.vector_store %arg34[%c24_156, %c0_157], %448 {strides = array<i32>} : memref<64x32xf32, #tpu.memory_space<vmem>>, vector<8x32xf32>,
    %450 = arith.truncf %448 : vector<8x32xf32> to vector<8x32xbf16>
    %cst_158 = arith.constant dense<0.000000e+00> : vector<8x32xf32>
    %451 = tpu.matmul %450, %319, %cst_158 {dimension_numbers = #tpu.dot_dimension_numbers<[1], [0], [0], [1], [0, 0, 1, 1], [], []>} : vector<8x32xbf16>, vector<32x32xbf16>, vector<8x32xf32> -> vector<8x32xf32>
    %452 = arith.truncf %448 : vector<8x32xf32> to vector<8x32xbf16>
    %cst_159 = arith.constant dense<0.000000e+00> : vector<8x32xf32>
    %453 = tpu.matmul %452, %320, %cst_159 {dimension_numbers = #tpu.dot_dimension_numbers<[1], [0], [0], [1], [0, 0, 1, 1], [], []>} : vector<8x32xbf16>, vector<32x32xbf16>, vector<8x32xf32> -> vector<8x32xf32>
    %454 = arith.truncf %448 : vector<8x32xf32> to vector<8x32xbf16>
    %cst_160 = arith.constant dense<0.000000e+00> : vector<8x32xf32>
    %455 = tpu.matmul %454, %321, %cst_160 {dimension_numbers = #tpu.dot_dimension_numbers<[1], [0], [0], [1], [0, 0, 1, 1], [], []>} : vector<8x32xbf16>, vector<32x32xbf16>, vector<8x32xf32> -> vector<8x32xf32>
    %456 = arith.addf %455, %324 : vector<8x32xf32>
    %457 = vector.extract_strided_slice %304 {offsets = [32, 0], sizes = [8, 32], strides = [1, 1]} : vector<64x32xf32> to vector<8x32xf32>
    %458 = arith.addf %457, %451 : vector<8x32xf32>
    %459 = arith.negf %458 : vector<8x32xf32>
    %460 = math.exp %459 : vector<8x32xf32>
    %cst_161 = arith.constant 1.000000e+00 : f32
    %461 = vector.broadcast %cst_161 : f32 to vector<8x32xf32>
    %462 = arith.addf %461, %460 : vector<8x32xf32>
    %463 = arith.divf %461, %462 : vector<8x32xf32>
    %464 = vector.extract_strided_slice %312 {offsets = [32, 0], sizes = [8, 32], strides = [1, 1]} : vector<64x32xf32> to vector<8x32xf32>
    %465 = arith.addf %464, %453 : vector<8x32xf32>
    %466 = arith.negf %465 : vector<8x32xf32>
    %467 = math.exp %466 : vector<8x32xf32>
    %cst_162 = arith.constant 1.000000e+00 : f32
    %468 = vector.broadcast %cst_162 : f32 to vector<8x32xf32>
    %469 = arith.addf %468, %467 : vector<8x32xf32>
    %470 = arith.divf %468, %469 : vector<8x32xf32>
    %471 = vector.extract_strided_slice %318 {offsets = [32, 0], sizes = [8, 32], strides = [1, 1]} : vector<64x32xf32> to vector<8x32xf32>
    %472 = arith.mulf %463, %456 : vector<8x32xf32>
    %473 = arith.addf %471, %472 : vector<8x32xf32>
    %474 = math.tanh %473 : vector<8x32xf32>
    %cst_163 = arith.constant 1.000000e+00 : f32
    %475 = vector.broadcast %cst_163 : f32 to vector<8x32xf32>
    %476 = arith.subf %475, %470 : vector<8x32xf32>
    %477 = arith.mulf %476, %474 : vector<8x32xf32>
    %478 = arith.mulf %470, %448 : vector<8x32xf32>
    %479 = arith.addf %477, %478 : vector<8x32xf32>
    %c32_164 = arith.constant 32 : index
    %c0_165 = arith.constant 0 : index
    %480 = vector.load %arg34[%c32_164, %c0_165] : memref<64x32xf32, #tpu.memory_space<vmem>>, vector<8x32xf32>
    tpu.vector_store %arg34[%c32_164, %c0_165], %479 {strides = array<i32>} : memref<64x32xf32, #tpu.memory_space<vmem>>, vector<8x32xf32>,
    %481 = arith.truncf %479 : vector<8x32xf32> to vector<8x32xbf16>
    %cst_166 = arith.constant dense<0.000000e+00> : vector<8x32xf32>
    %482 = tpu.matmul %481, %319, %cst_166 {dimension_numbers = #tpu.dot_dimension_numbers<[1], [0], [0], [1], [0, 0, 1, 1], [], []>} : vector<8x32xbf16>, vector<32x32xbf16>, vector<8x32xf32> -> vector<8x32xf32>
    %483 = arith.truncf %479 : vector<8x32xf32> to vector<8x32xbf16>
    %cst_167 = arith.constant dense<0.000000e+00> : vector<8x32xf32>
    %484 = tpu.matmul %483, %320, %cst_167 {dimension_numbers = #tpu.dot_dimension_numbers<[1], [0], [0], [1], [0, 0, 1, 1], [], []>} : vector<8x32xbf16>, vector<32x32xbf16>, vector<8x32xf32> -> vector<8x32xf32>
    %485 = arith.truncf %479 : vector<8x32xf32> to vector<8x32xbf16>
    %cst_168 = arith.constant dense<0.000000e+00> : vector<8x32xf32>
    %486 = tpu.matmul %485, %321, %cst_168 {dimension_numbers = #tpu.dot_dimension_numbers<[1], [0], [0], [1], [0, 0, 1, 1], [], []>} : vector<8x32xbf16>, vector<32x32xbf16>, vector<8x32xf32> -> vector<8x32xf32>
    %487 = arith.addf %486, %324 : vector<8x32xf32>
    %488 = vector.extract_strided_slice %304 {offsets = [40, 0], sizes = [8, 32], strides = [1, 1]} : vector<64x32xf32> to vector<8x32xf32>
    %489 = arith.addf %488, %482 : vector<8x32xf32>
    %490 = arith.negf %489 : vector<8x32xf32>
    %491 = math.exp %490 : vector<8x32xf32>
    %cst_169 = arith.constant 1.000000e+00 : f32
    %492 = vector.broadcast %cst_169 : f32 to vector<8x32xf32>
    %493 = arith.addf %492, %491 : vector<8x32xf32>
    %494 = arith.divf %492, %493 : vector<8x32xf32>
    %495 = vector.extract_strided_slice %312 {offsets = [40, 0], sizes = [8, 32], strides = [1, 1]} : vector<64x32xf32> to vector<8x32xf32>
    %496 = arith.addf %495, %484 : vector<8x32xf32>
    %497 = arith.negf %496 : vector<8x32xf32>
    %498 = math.exp %497 : vector<8x32xf32>
    %cst_170 = arith.constant 1.000000e+00 : f32
    %499 = vector.broadcast %cst_170 : f32 to vector<8x32xf32>
    %500 = arith.addf %499, %498 : vector<8x32xf32>
    %501 = arith.divf %499, %500 : vector<8x32xf32>
    %502 = vector.extract_strided_slice %318 {offsets = [40, 0], sizes = [8, 32], strides = [1, 1]} : vector<64x32xf32> to vector<8x32xf32>
    %503 = arith.mulf %494, %487 : vector<8x32xf32>
    %504 = arith.addf %502, %503 : vector<8x32xf32>
    %505 = math.tanh %504 : vector<8x32xf32>
    %cst_171 = arith.constant 1.000000e+00 : f32
    %506 = vector.broadcast %cst_171 : f32 to vector<8x32xf32>
    %507 = arith.subf %506, %501 : vector<8x32xf32>
    %508 = arith.mulf %507, %505 : vector<8x32xf32>
    %509 = arith.mulf %501, %479 : vector<8x32xf32>
    %510 = arith.addf %508, %509 : vector<8x32xf32>
    %c40_172 = arith.constant 40 : index
    %c0_173 = arith.constant 0 : index
    %511 = vector.load %arg34[%c40_172, %c0_173] : memref<64x32xf32, #tpu.memory_space<vmem>>, vector<8x32xf32>
    tpu.vector_store %arg34[%c40_172, %c0_173], %510 {strides = array<i32>} : memref<64x32xf32, #tpu.memory_space<vmem>>, vector<8x32xf32>,
    %512 = arith.truncf %510 : vector<8x32xf32> to vector<8x32xbf16>
    %cst_174 = arith.constant dense<0.000000e+00> : vector<8x32xf32>
    %513 = tpu.matmul %512, %319, %cst_174 {dimension_numbers = #tpu.dot_dimension_numbers<[1], [0], [0], [1], [0, 0, 1, 1], [], []>} : vector<8x32xbf16>, vector<32x32xbf16>, vector<8x32xf32> -> vector<8x32xf32>
    %514 = arith.truncf %510 : vector<8x32xf32> to vector<8x32xbf16>
    %cst_175 = arith.constant dense<0.000000e+00> : vector<8x32xf32>
    %515 = tpu.matmul %514, %320, %cst_175 {dimension_numbers = #tpu.dot_dimension_numbers<[1], [0], [0], [1], [0, 0, 1, 1], [], []>} : vector<8x32xbf16>, vector<32x32xbf16>, vector<8x32xf32> -> vector<8x32xf32>
    %516 = arith.truncf %510 : vector<8x32xf32> to vector<8x32xbf16>
    %cst_176 = arith.constant dense<0.000000e+00> : vector<8x32xf32>
    %517 = tpu.matmul %516, %321, %cst_176 {dimension_numbers = #tpu.dot_dimension_numbers<[1], [0], [0], [1], [0, 0, 1, 1], [], []>} : vector<8x32xbf16>, vector<32x32xbf16>, vector<8x32xf32> -> vector<8x32xf32>
    %518 = arith.addf %517, %324 : vector<8x32xf32>
    %519 = vector.extract_strided_slice %304 {offsets = [48, 0], sizes = [8, 32], strides = [1, 1]} : vector<64x32xf32> to vector<8x32xf32>
    %520 = arith.addf %519, %513 : vector<8x32xf32>
    %521 = arith.negf %520 : vector<8x32xf32>
    %522 = math.exp %521 : vector<8x32xf32>
    %cst_177 = arith.constant 1.000000e+00 : f32
    %523 = vector.broadcast %cst_177 : f32 to vector<8x32xf32>
    %524 = arith.addf %523, %522 : vector<8x32xf32>
    %525 = arith.divf %523, %524 : vector<8x32xf32>
    %526 = vector.extract_strided_slice %312 {offsets = [48, 0], sizes = [8, 32], strides = [1, 1]} : vector<64x32xf32> to vector<8x32xf32>
    %527 = arith.addf %526, %515 : vector<8x32xf32>
    %528 = arith.negf %527 : vector<8x32xf32>
    %529 = math.exp %528 : vector<8x32xf32>
    %cst_178 = arith.constant 1.000000e+00 : f32
    %530 = vector.broadcast %cst_178 : f32 to vector<8x32xf32>
    %531 = arith.addf %530, %529 : vector<8x32xf32>
    %532 = arith.divf %530, %531 : vector<8x32xf32>
    %533 = vector.extract_strided_slice %318 {offsets = [48, 0], sizes = [8, 32], strides = [1, 1]} : vector<64x32xf32> to vector<8x32xf32>
    %534 = arith.mulf %525, %518 : vector<8x32xf32>
    %535 = arith.addf %533, %534 : vector<8x32xf32>
    %536 = math.tanh %535 : vector<8x32xf32>
    %cst_179 = arith.constant 1.000000e+00 : f32
    %537 = vector.broadcast %cst_179 : f32 to vector<8x32xf32>
    %538 = arith.subf %537, %532 : vector<8x32xf32>
    %539 = arith.mulf %538, %536 : vector<8x32xf32>
    %540 = arith.mulf %532, %510 : vector<8x32xf32>
    %541 = arith.addf %539, %540 : vector<8x32xf32>
    %c48_180 = arith.constant 48 : index
    %c0_181 = arith.constant 0 : index
    %542 = vector.load %arg34[%c48_180, %c0_181] : memref<64x32xf32, #tpu.memory_space<vmem>>, vector<8x32xf32>
    tpu.vector_store %arg34[%c48_180, %c0_181], %541 {strides = array<i32>} : memref<64x32xf32, #tpu.memory_space<vmem>>, vector<8x32xf32>,
    %543 = arith.truncf %541 : vector<8x32xf32> to vector<8x32xbf16>
    %cst_182 = arith.constant dense<0.000000e+00> : vector<8x32xf32>
    %544 = tpu.matmul %543, %319, %cst_182 {dimension_numbers = #tpu.dot_dimension_numbers<[1], [0], [0], [1], [0, 0, 1, 1], [], []>} : vector<8x32xbf16>, vector<32x32xbf16>, vector<8x32xf32> -> vector<8x32xf32>
    %545 = arith.truncf %541 : vector<8x32xf32> to vector<8x32xbf16>
    %cst_183 = arith.constant dense<0.000000e+00> : vector<8x32xf32>
    %546 = tpu.matmul %545, %320, %cst_183 {dimension_numbers = #tpu.dot_dimension_numbers<[1], [0], [0], [1], [0, 0, 1, 1], [], []>} : vector<8x32xbf16>, vector<32x32xbf16>, vector<8x32xf32> -> vector<8x32xf32>
    %547 = arith.truncf %541 : vector<8x32xf32> to vector<8x32xbf16>
    %cst_184 = arith.constant dense<0.000000e+00> : vector<8x32xf32>
    %548 = tpu.matmul %547, %321, %cst_184 {dimension_numbers = #tpu.dot_dimension_numbers<[1], [0], [0], [1], [0, 0, 1, 1], [], []>} : vector<8x32xbf16>, vector<32x32xbf16>, vector<8x32xf32> -> vector<8x32xf32>
    %549 = arith.addf %548, %324 : vector<8x32xf32>
    %550 = vector.extract_strided_slice %304 {offsets = [56, 0], sizes = [8, 32], strides = [1, 1]} : vector<64x32xf32> to vector<8x32xf32>
    %551 = arith.addf %550, %544 : vector<8x32xf32>
    %552 = arith.negf %551 : vector<8x32xf32>
    %553 = math.exp %552 : vector<8x32xf32>
    %cst_185 = arith.constant 1.000000e+00 : f32
    %554 = vector.broadcast %cst_185 : f32 to vector<8x32xf32>
    %555 = arith.addf %554, %553 : vector<8x32xf32>
    %556 = arith.divf %554, %555 : vector<8x32xf32>
    %557 = vector.extract_strided_slice %312 {offsets = [56, 0], sizes = [8, 32], strides = [1, 1]} : vector<64x32xf32> to vector<8x32xf32>
    %558 = arith.addf %557, %546 : vector<8x32xf32>
    %559 = arith.negf %558 : vector<8x32xf32>
    %560 = math.exp %559 : vector<8x32xf32>
    %cst_186 = arith.constant 1.000000e+00 : f32
    %561 = vector.broadcast %cst_186 : f32 to vector<8x32xf32>
    %562 = arith.addf %561, %560 : vector<8x32xf32>
    %563 = arith.divf %561, %562 : vector<8x32xf32>
    %564 = vector.extract_strided_slice %318 {offsets = [56, 0], sizes = [8, 32], strides = [1, 1]} : vector<64x32xf32> to vector<8x32xf32>
    %565 = arith.mulf %556, %549 : vector<8x32xf32>
    %566 = arith.addf %564, %565 : vector<8x32xf32>
    %567 = math.tanh %566 : vector<8x32xf32>
    %cst_187 = arith.constant 1.000000e+00 : f32
    %568 = vector.broadcast %cst_187 : f32 to vector<8x32xf32>
    %569 = arith.subf %568, %563 : vector<8x32xf32>
    %570 = arith.mulf %569, %567 : vector<8x32xf32>
    %571 = arith.mulf %563, %541 : vector<8x32xf32>
    %572 = arith.addf %570, %571 : vector<8x32xf32>
    %c56_188 = arith.constant 56 : index
    %c0_189 = arith.constant 0 : index
    %573 = vector.load %arg34[%c56_188, %c0_189] : memref<64x32xf32, #tpu.memory_space<vmem>>, vector<8x32xf32>
    tpu.vector_store %arg34[%c56_188, %c0_189], %572 {strides = array<i32>} : memref<64x32xf32, #tpu.memory_space<vmem>>, vector<8x32xf32>,
    %c0_190 = arith.constant 0 : index
    %c0_191 = arith.constant 0 : index
    %574 = vector.load %arg34[%c0_190, %c0_191] : memref<64x32xf32, #tpu.memory_space<vmem>>, vector<64x32xf32>
    %c0_192 = arith.constant 0 : index
    %c0_193 = arith.constant 0 : index
    %575 = vector.load %arg29[%c0_192, %c0_193] : memref<32x32xbf16, #tpu.memory_space<vmem>>, vector<32x32xbf16>
    %576 = arith.truncf %574 : vector<64x32xf32> to vector<64x32xbf16>
    %cst_194 = arith.constant dense<0.000000e+00> : vector<64x32xf32>
    %577 = tpu.matmul %576, %575, %cst_194 {dimension_numbers = #tpu.dot_dimension_numbers<[1], [0], [0], [1], [0, 0, 1, 1], [], []>} : vector<64x32xbf16>, vector<32x32xbf16>, vector<64x32xf32> -> vector<64x32xf32>
    %c0_195 = arith.constant 0 : index
    %c0_196 = arith.constant 0 : index
    %578 = vector.load %arg30[%c0_195, %c0_196] : memref<1x32xf32, #tpu.memory_space<vmem>>, vector<1x32xf32>
    %579 = vector.broadcast %578 : vector<1x32xf32> to vector<64x32xf32>
    %580 = arith.addf %577, %579 : vector<64x32xf32>
    %581 = arith.negf %580 : vector<64x32xf32>
    %582 = math.exp %581 : vector<64x32xf32>
    %cst_197 = arith.constant 1.000000e+00 : f32
    %583 = vector.broadcast %cst_197 : f32 to vector<64x32xf32>
    %584 = arith.addf %583, %582 : vector<64x32xf32>
    %585 = arith.divf %583, %584 : vector<64x32xf32>
    %586 = arith.mulf %585, %296 : vector<64x32xf32>
    %c0_198 = arith.constant 0 : index
    %c0_199 = arith.constant 0 : index
    %587 = vector.load %arg31[%c0_198, %c0_199] : memref<32x128xbf16, #tpu.memory_space<vmem>>, vector<32x128xbf16>
    %588 = arith.truncf %586 : vector<64x32xf32> to vector<64x32xbf16>
    %cst_200 = arith.constant dense<0.000000e+00> : vector<64x128xf32>
    %589 = tpu.matmul %588, %587, %cst_200 {dimension_numbers = #tpu.dot_dimension_numbers<[1], [0], [0], [1], [0, 0, 1, 1], [], []>} : vector<64x32xbf16>, vector<32x128xbf16>, vector<64x128xf32> -> vector<64x128xf32>
    %c0_201 = arith.constant 0 : index
    %c0_202 = arith.constant 0 : index
    %590 = vector.load %arg32[%c0_201, %c0_202] : memref<1x128xf32, #tpu.memory_space<vmem>>, vector<1x128xf32>
    %591 = vector.broadcast %590 : vector<1x128xf32> to vector<64x128xf32>
    %592 = arith.addf %589, %591 : vector<64x128xf32>
    %c0_203 = arith.constant 0 : index
    %c0_204 = arith.constant 0 : index
    %593 = vector.load %arg33[%c0_203, %c0_204] : memref<64x128xf32, #tpu.memory_space<vmem>>, vector<64x128xf32>
    tpu.vector_store %arg33[%c0_203, %c0_204], %592 {strides = array<i32>} : memref<64x128xf32, #tpu.memory_space<vmem>>, vector<64x128xf32>,
    return
  }
}

</mosaic_0001>

<bundles_post_ra>
// kernel: masking_model_forward.1
= control target key start
LH: loop header
LB: loop body
LE: loop exit
PB: predicated region body
PF: predicated region fallthrough
CT: control target
= control target key end

     0   :  { %s4904_s3 = smov 1   ;;  %s4905_s10 = smov 4   ;;  %vm166_vm0 = vcmask 130048   ;;  %v4909_v18 = vmov 0.0   ;;  %vm273_vm1 = vcmask 261120   ;;  %vm4913_vm2 = vmmov 0   ;;  %s5795_s0 = inlined_call_operand.smem [shape: u32[34], index: -1, kind: input, shape index: {}] }
   0x1   :  { %s3706_s6 = sld [smem:[%s5795_s0 + %s4904_s3]]   ;;  %s4906_s14 = smov 3   ;;  %v4914_v45 = vmov 0   ;;  %v256_v48 = vlaneseq }
   0x2   :  { %s1_s9 = sld [smem:[%s5795_s0]]   ;;  %s4907_s18 = smov 5  }
   0x3   :  { %s3709_s13 = sld [smem:[%s5795_s0 + %s4905_s10]]   ;;  %s4908_s22 = smov 6   ;;  %v257_v50 = vshrl.u32 %v256_v48, 7 }
   0x4   :  { %s3708_s17 = sld [smem:[%s5795_s0 + %s4906_s14]]   ;;  %s4910_s26 = smov 7  }
   0x5   :  { %s3710_s21 = sld [smem:[%s5795_s0 + %s4907_s18]]   ;;  %s4911_s30 = smov 8   ;;  %v5083_v55 = vsub.s32 0, %v257_v50 }
   0x6   :  { %s4967_s25 = sld [smem:[%s5795_s0 + %s4908_s22]]   ;;  %s4912_s4 = smov 2  }
   0x7   :  { %v4649_v0 = vld [vmem:[%s3706_s6] sm:$0xff]   ;;  %s4973_s29 = sld [smem:[%s5795_s0 + %s4910_s26]]   ;;  %s4915_s8 = smov 9  }
   0x8   :  { %v139_v1 = vld [vmem:[%s1_s9] sm:$0xff]  ;;  %v140_v2 = vld [vmem:[%s1_s9 + $0x8] sm:$0xff]  ;;  %v141_v3 = vld [vmem:[%s1_s9 + $0x10] sm:$0xff]  ;;  %4111 = vmatprep.subr.bf16.mxu0 %v4649_v0  ;;  %s4978_s3 = sld [smem:[%s5795_s0 + %s4911_s30]]   ;;  %s4916_s12 = smov 12  }
   0x9   :  { %v149_v4 = vpack.c.bf16 %v140_v2, %v139_v1  ;;  %v142_v5 = vld [vmem:[%s1_s9 + $0x18] sm:$0xff]  ;;  %v143_v6 = vld [vmem:[%s1_s9 + $0x20] sm:$0xff]  ;;  %v144_v7 = vld [vmem:[%s1_s9 + $0x28] sm:$0xff]  ;;  %4112 = vmatpush3.bf16.msra.mxu0 %v4649_v0  ;;  %s3707_s7 = sld [smem:[%s5795_s0 + %s4912_s4]]   ;;  %s4917_s16 = smov 10  }
   0xa   :  { %v150_v8 = vpack.c.bf16 %v142_v5, %v141_v3  ;;  %v151_v9 = vpack.c.bf16 %v144_v7, %v143_v6  ;;  %v4650_v10 = vld [vmem:[%s3709_s13] sm:$0xff]   ;;  %v145_v11 = vld [vmem:[%s1_s9 + $0x30] sm:$0xff]  ;;  %v146_v12 = vld [vmem:[%s1_s9 + $0x38] sm:$0xff]  ;;  %s3714_s11 = sld [smem:[%s5795_s0 + %s4915_s8]]   ;;  %s4918_s20 = smov 13  }
   0xb   :  { %4113 = vmatprep.mubr.msk.bf16.mxu0 %vm166_vm0, %v149_v4  ;;  %4133 = vmatprep.subr.bf16.mxu0 %v4650_v10  ;;  %v152_v13 = vpack.c.bf16 %v146_v12, %v145_v11  ;;  %v4651_v14 = vld [vmem:[%s3708_s17] sm:$0xff]   ;;  %v4652_v15 = vld [vmem:[%s3709_s13 + $0x8] sm:$0xff]   ;;  %s3717_s15 = sld [smem:[%s5795_s0 + %s4916_s12]]   ;;  %s4919_s24 = smov 11  }
   0xc   :  { %4114 = vmatmul.mubr.msk.bf16.vlgmr.msra.gmra.mrb[0].mxu0 %vm166_vm0, %v150_v8  ;;  %4121 = vmatprep.subr.bf16.mxu1 %v4651_v14  ;;  %v4653_v16 = vld [vmem:[%s3708_s17 + $0x8] sm:$0xff]   ;;  %v4654_v17 = vld [vmem:[%s3710_s21] sm:$0xff]   ;;  %s3715_s19 = sld [smem:[%s5795_s0 + %s4917_s16]]   ;;  %s4920_s28 = smov 14  }
   0xd   :  { %4117 = vmatprep.mubr.msk.bf16.mxu0 %vm166_vm0, %v151_v9  ;;  %4134 = vmatpush3.bf16.msra.mxu0 %v4650_v10  ;;  %v4994_v29 = vld [vmem:[%s4967_s25] sm:$0xff]   ;;  %v4656_v31 = vld [vmem:[%s3710_s21 + $0x8] sm:$0xff]   ;;  %s3718_s23 = sld [smem:[%s5795_s0 + %s4918_s20]]   ;;  %s4921_s2 = smov 15  }
   0xe   :  { %4122 = vmatpush3.bf16.msra.mxu1 %v4651_v14  ;;  %4135 = vmatprep.subr.bf16.mxu0 %v4652_v15  ;;  %v5004_v35 = vld [vmem:[%s4967_s25 + $0x8] sm:$0xff]   ;;  %v5030_v43 = vld [vmem:[%s4973_s29] sm:$0xff]   ;;  %s3716_s27 = sld [smem:[%s5795_s0 + %s4919_s24]]   ;;  %s4922_s6 = smov 17  }
   0xf   :  { %4123 = vmatprep.subr.bf16.mxu1 %v4653_v16  ;;  %v3739_v20 = vld [vmem:[%s3707_s7] ss:$0 sm:$0xff]  ;;  %v5040_v46 = vld [vmem:[%s4973_s29 + $0x8] sm:$0xff]   ;;  %s3719_s1 = sld [smem:[%s5795_s0 + %s4920_s28]]   ;;  %s4923_s10 = smov 18  }
  0x10   :  { %v5033_v44 = vld [vmem:[%s4978_s3] sm:$0xff]   ;;  %v5045_v47 = vld [vmem:[%s4978_s3 + $0x8] sm:$0xff]   ;;  %s5302_s5 = sld [smem:[%s5795_s0 + %s4921_s2]]   ;;  %s4924_s14 = smov 16  }
  0x11   :  { %4136 = vmatpush3.bf16.msra.mxu0 %v4652_v15  ;;  %v252_v49 = vld [vmem:[%s3714_s11] sm:$0x1]  ;;  %s3722_s9 = sld [smem:[%s5795_s0 + %s4922_s6]]   ;;  %s4925_s18 = smov 19  }
  0x12   :  { %4124 = vmatpush3.bf16.msra.mxu1 %v4653_v16  ;;  %4157 = vmatprep.subr.bf16.mxu0 %v4909_v18  ;;  %v253_v51 = vld [vmem:[%s3717_s15] sm:$0x1]  ;;  %s3723_s13 = sld [smem:[%s5795_s0 + %s4923_s10]]   ;;  %s4926_s22 = smov 20  }
  0x13   :  { %4145 = vmatprep.subr.bf16.mxu1 %v4654_v17  ;;  %v355_v52 = vld [vmem:[%s3715_s19] sm:$0x1]  ;;  %v254_v54 = vadd.f32 %v253_v51, %v252_v49  ;;  %s3721_s17 = sld [smem:[%s5795_s0 + %s4924_s14]]   ;;  %s4927_s26 = smov 21  }
  0x14   :  { %4118 = vmatmul.mubr.msk.bf16.gmra.mrb[4].mxu0 %vm166_vm0, %v152_v13  ;;  %v356_v53 = vld [vmem:[%s3718_s23] sm:$0x1]  ;;  %s3724_s21 = sld [smem:[%s5795_s0 + %s4925_s18]]   ;;  %s4928_s30 = smov 22  }
  0x15   :  { %v357_v56 = vadd.f32 %v356_v53, %v355_v52  ;;  %v259_v57 = vrot.slane %v254_v54, %v5083_v55  ;;  %s3725_s25 = sld [smem:[%s5795_s0 + %s4926_s22]]   ;;  %s4929_s4 = smov 23  }
  0x16   :  { %s5396_s29 = sld [smem:[%s5795_s0 + %s4927_s26]]   ;;  %s4930_s8 = smov 26  }
  0x17   :  { %v5087_v58 = vrot.slane %v357_v56, %v5083_v55  ;;  %s5401_s3 = sld [smem:[%s5795_s0 + %s4928_s30]]   ;;  %s4931_s12 = smov 25  }
  0x18   :  { %s3728_s7 = sld [smem:[%s5795_s0 + %s4929_s4]]   ;;  %s4932_s16 = smov 24  }
  0x19   :  { %s3731_s11 = sld [smem:[%s5795_s0 + %s4930_s8]]   ;;  %s4933_s20 = smov 27  }
  0x1a   :  { %s3730_s15 = sld [smem:[%s5795_s0 + %s4931_s12]]   ;;  %s4934_s24 = smov 28  }
  0x1b   :  { %s3729_s19 = sld [smem:[%s5795_s0 + %s4932_s16]]   ;;  %s4935_s28 = smov 29  }
  0x1c   :  { %s3732_s23 = sld [smem:[%s5795_s0 + %s4933_s20]]   ;;  %s4936_s2 = smov 31  }
  0x1d   :  { %s4937_s6 = smov 30   ;;  %s4938_s10 = smov 32  }
  0x1e   :  { %s4939_s14 = smov 33  }
  0xdf   :  { %v4115_v19 = vpop.f32.mrb[0].mxu0 }
  0xe0   :  { %v213_v21 = vpop.f32.mrb[1].mxu0  ;;  %v4989_v27 = vadd.f32 %v4115_v19, %v3739_v20 }
  0xe1   :  { %v4116_v22 = vpop.f32.mrb[2].mxu0  ;;  %v4985_v25 = vadd.f32 %v3739_v20, %v213_v21 }
  0xe2   :  { %v4983_v23 = vadd.f32 %v4116_v22, %v3739_v20  ;;  %v216_v24 = vpop.f32.mrb[3].mxu0 }
  0xe3   :  { %v4987_v26 = vadd.f32 %v3739_v20, %v216_v24 }
  0xe4   :  { %v249_v30 = vpack.c.bf16 %v4983_v23, %v4989_v27 }
  0xe5   :  { %v248_v28 = vpack.c.bf16 %v4987_v26, %v4985_v25 }
  0xe7   :  { %v4119_v32 = vpop.f32.mrb[4].mxu0  ;;  %4125 = vmatprep.mubr.msk.bf16.mxu1 %vm273_vm1, %v248_v28  ;;  %4137 = vmatprep.mubr.msk.bf16.mxu0 %vm273_vm1, %v248_v28 }
  0xe8   :  { %v229_v33 = vpop.f32.mrb[5].mxu0  ;;  %4126 = vmatmul.mubr.msk.bf16.vlgmr.msra.gmra.mrb[0].mxu1 %vm273_vm1, %v249_v30  ;;  %4138 = vmatmul.mubr.msk.bf16.vlgmr.msra.gmra.mrb[8].mxu0 %vm273_vm1, %v249_v30  ;;  %v5013_v40 = vadd.f32 %v4119_v32, %v3739_v20 }
  0xe9   :  { %4146 = vmatpush3.bf16.msra.mxu1 %v4654_v17  ;;  %v4120_v34 = vpop.f32.mrb[6].mxu0  ;;  %4158 = vmatpush3.bf16.msra.mxu0 %v4994_v29  ;;  %v5009_v38 = vadd.f32 %v3739_v20, %v229_v33 }
  0xea   :  { %v5006_v36 = vadd.f32 %v4120_v34, %v3739_v20  ;;  %v232_v37 = vpop.f32.mrb[7].mxu0  ;;  %4147 = vmatprep.subr.bf16.mxu1 %v4656_v31  ;;  %4159 = vmatprep.subr.bf16.mxu0 %v4909_v18 }
  0xeb   :  { %v5011_v39 = vadd.f32 %v3739_v20, %v232_v37 }
  0xec   :  { %v251_v42 = vpack.c.bf16 %v5006_v36, %v5013_v40 }
  0xed   :  { %v250_v41 = vpack.c.bf16 %v5011_v39, %v5009_v38  ;;  %4148 = vmatpush3.bf16.msra.mxu1 %v4656_v31  ;;  %4160 = vmatpush3.bf16.msra.mxu0 %v5004_v35  ;;  %v3757_v31 = vld [vmem:[%s3716_s27] ss:$0 sm:$0xff]  ;;  %s3733_s27 = sld [smem:[%s5795_s0 + %s4934_s24]]  }
  0xee   :  { %4165 = vmatprep.subr.bf16.mxu1 %v4909_v18  ;;  %4173 = vmatprep.subr.bf16.mxu0 %v4909_v18 }
  0xef   :  { %4129 = vmatprep.mubr.msk.bf16.mxu1 %vm273_vm1, %v250_v41  ;;  %4141 = vmatprep.mubr.msk.bf16.mxu0 %vm273_vm1, %v250_v41 }
  0xf0   :  { %4130 = vmatmul.mubr.msk.bf16.gmra.mrb[4].mxu1 %vm273_vm1, %v251_v42  ;;  %4142 = vmatmul.mubr.msk.bf16.gmra.mrb[12].mxu0 %vm273_vm1, %v251_v42 }
  0xf1   :  { %4149 = vmatprep.mubr.msk.bf16.mxu1 %vm273_vm1, %v248_v28  ;;  %4161 = vmatprep.mubr.msk.bf16.mxu0 %vm4913_vm2, %v4909_v18 }
  0xf8   :  { %4150 = vmatmul.mubr.msk.bf16.vlgmr.msra.gmra.mrb[8].mxu1 %vm273_vm1, %v249_v30  ;;  %4162 = vmatmul.mubr.bf16.vlgmr.msra.gmra.mrb[16].mxu0 %v4914_v45 }
  0xf9   :  { %4166 = vmatpush3.bf16.msra.mxu1 %v5030_v43  ;;  %4153 = vmatprep.mubr.msk.bf16.mxu1 %vm273_vm1, %v250_v41 }
  0xfa   :  { %4167 = vmatprep.subr.bf16.mxu1 %v4909_v18  ;;  %4174 = vmatpush3.bf16.msra.mxu0 %v5033_v44 }
  0xfb   :  { %4175 = vmatprep.subr.bf16.mxu0 %v4909_v18  ;;  %4177 = vmatprep.mubr.msk.bf16.mxu0 %vm4913_vm2, %v4909_v18 }
  0xfd   :  { %4168 = vmatpush3.bf16.msra.mxu1 %v5040_v46 }
  0xfe   :  { %4176 = vmatpush3.bf16.msra.mxu0 %v5045_v47  ;;  %4181 = vmatprep.subr.bf16.mxu1 %v4909_v18 }
  0xff   :  { %4189 = vmatprep.subr.bf16.mxu0 %v4909_v18 }
 0x100   :  { %4154 = vmatmul.mubr.msk.bf16.gmra.mrb[12].mxu1 %vm273_vm1, %v251_v42 }
 0x101   :  { %4169 = vmatprep.mubr.msk.bf16.mxu1 %vm4913_vm2, %v4909_v18  ;;  %4178 = vmatmul.mubr.bf16.vlgmr.msra.gmra.mrb[20].mxu0 %v4914_v45 }
 0x102   :  { %4190 = vmatpush3.bf16.msra.mxu0 %v5030_v43  ;;  %4193 = vmatprep.mubr.msk.bf16.mxu0 %vm4913_vm2, %v4909_v18 }
 0x103   :  { %4191 = vmatprep.subr.bf16.mxu0 %v4909_v18 }
 0x106   :  { %4192 = vmatpush3.bf16.msra.mxu0 %v5040_v46 }
 0x107   :  { %4205 = vmatprep.subr.bf16.mxu0 %v4909_v18 }
 0x108   :  { %4170 = vmatmul.mubr.bf16.vlgmr.msra.gmra.mrb[16].mxu1 %v4914_v45 }
 0x109   :  { %4182 = vmatpush3.bf16.msra.mxu1 %v4994_v29  ;;  %4185 = vmatprep.mubr.msk.bf16.mxu1 %vm4913_vm2, %v4909_v18 }
 0x10a   :  { %4183 = vmatprep.subr.bf16.mxu1 %v4909_v18 }
 0x10d   :  { %4184 = vmatpush3.bf16.msra.mxu1 %v5004_v35 }
 0x10e   :  { %4197 = vmatprep.subr.bf16.mxu1 %v4909_v18 }
 0x1bb   :  { %v4127_v59 = vpop.f32.mrb[0].mxu1  ;;  %v4139_v60 = vpop.f32.mrb[8].mxu0 }
 0x1bc   :  { %v5089_v61 = vadd.f32 %v4127_v59, %v259_v57  ;;  %v5092_v62 = vadd.f32 %v4139_v60, %v5087_v58  ;;  %v320_v63 = vpop.f32.mrb[1].mxu1  ;;  %v410_v0 = vpop.f32.mrb[9].mxu0 }
 0x1bd   :  { %v4128_v1 = vpop.f32.mrb[2].mxu1  ;;  %v4140_v2 = vpop.f32.mrb[10].mxu0  ;;  %v321_v32 = vadd.f32 %v320_v63, %v259_v57 }
 0x1be   :  { %v5094_v3 = vadd.f32 %v4128_v1, %v259_v57  ;;  %v5097_v4 = vadd.f32 %v4140_v2, %v5087_v58  ;;  %v323_v5 = vpop.f32.mrb[3].mxu1  ;;  %v413_v6 = vpop.f32.mrb[11].mxu0 }
 0x1bf   :  { %v5099_v7 = vadd.f32 %v323_v5, %v259_v57  ;;  %v5102_v8 = vadd.f32 %v413_v6, %v5087_v58 }
 0x1c3   :  { %v4131_v9 = vpop.f32.mrb[4].mxu1  ;;  %v4143_v10 = vpop.f32.mrb[12].mxu0 }
 0x1c4   :  { %v5107_v11 = vadd.f32 %v4131_v9, %v259_v57  ;;  %v5110_v12 = vadd.f32 %v4143_v10, %v5087_v58  ;;  %v336_v13 = vpop.f32.mrb[5].mxu1  ;;  %v426_v14 = vpop.f32.mrb[13].mxu0 }
 0x1c5   :  { %v5112_v15 = vadd.f32 %v336_v13, %v259_v57  ;;  %v5115_v16 = vadd.f32 %v426_v14, %v5087_v58  ;;  %v4132_v17 = vpop.f32.mrb[6].mxu1  ;;  %v4144_v19 = vpop.f32.mrb[14].mxu0 }
 0x1c6   :  { %v5117_v20 = vadd.f32 %v4132_v17, %v259_v57  ;;  %v5120_v21 = vadd.f32 %v4144_v19, %v5087_v58  ;;  %v339_v22 = vpop.f32.mrb[7].mxu1  ;;  %v429_v24 = vpop.f32.mrb[15].mxu0  ;;  %v411_v19 = vadd.f32 %v410_v0, %v5087_v58 }
 0x1c7   :  { %v5122_v28 = vadd.f32 %v339_v22, %v259_v57  ;;  %v5125_v30 = vadd.f32 %v429_v24, %v5087_v58 }
 0x1cb   :  { %v4151_v33 = vpop.f32.mrb[8].mxu1  ;;  %v597_v34 = vpop.f32.mrb[16].mxu0 }
 0x1cc   :  { %v5127_v37 = vadd.f32 %v4151_v33, %v3757_v31  ;;  %v707_v41 = vadd.f32 %v597_v34, %v321_v32  ;;  %v498_v42 = vpop.f32.mrb[9].mxu1  ;;  %v4163_v48 = vpop.f32.mrb[17].mxu0 }
 0x1cd   :  { %v4152_v49 = vpop.f32.mrb[10].mxu1  ;;  %v600_v50 = vpop.f32.mrb[18].mxu0 }
 0x1ce   :  { %v3771_v51 = vmul.f32 -1.442695, %v707_v41  ;;  %v5129_v52 = vadd.f32 %v4152_v49, %v3757_v31  ;;  %v501_v53 = vpop.f32.mrb[11].mxu1  ;;  %v4164_v54 = vpop.f32.mrb[19].mxu0  ;;  %v5145_v49 = vld [vmem:[%s3719_s1] ss:$0 sm:$0xff]  ;;  %s5715_s1 = sld [smem:[%s5795_s0 + %s4935_s28]]  }
 0x1cf   :  { %v5131_v56 = vadd.f32 %v3757_v31, %v501_v53  ;;  %v499_v53 = vadd.f32 %v3757_v31, %v498_v42 }
 0x1d0   :  { %4680 = vpow2.f32 %v3771_v51 }
 0x1d3   :  { %v4155_v59 = vpop.f32.mrb[12].mxu1 }
 0x1d4   :  { %v5133_v60 = vadd.f32 %v4155_v59, %v3757_v31  ;;  %v514_v57 = vpop.f32.mrb[13].mxu1  ;;  %v701_v63 = vpop.f32.mrb[20].mxu0 }
 0x1d5   :  { %v5135_v1 = vadd.f32 %v3757_v31, %v514_v57  ;;  %v4156_v2 = vpop.f32.mrb[14].mxu1  ;;  %v4179_v5 = vpop.f32.mrb[21].mxu0  ;;  %v702_v50 = vadd.f32 %v5145_v49, %v701_v63 }
 0x1d6   :  { %v5137_v6 = vadd.f32 %v4156_v2, %v3757_v31  ;;  %v517_v9 = vpop.f32.mrb[15].mxu1  ;;  %v704_v10 = vpop.f32.mrb[22].mxu0 }
 0x1d7   :  { %v5139_v13 = vadd.f32 %v3757_v31, %v517_v9  ;;  %v4180_v14 = vpop.f32.mrb[23].mxu0 }
 0x1da   :  { %v4681_v17 = vpop.eup %4680 }
 0x1db   :  { %v711_v22 = vadd.f32 1.0, %v4681_v17  ;;  %v649_v24 = vpop.f32.mrb[16].mxu1 }
 0x1dc   :  { %v714_v32 = vadd.f32 %v649_v24, %v411_v19  ;;  %v4171_v33 = vpop.f32.mrb[17].mxu1 }
 0x1dd   :  { %4682 = vrcp.f32 %v711_v22  ;;  %v652_v34 = vpop.f32.mrb[18].mxu1 }
 0x1de   :  { %v3772_v41 = vmul.f32 -1.442695, %v714_v32  ;;  %v4172_v48 = vpop.f32.mrb[19].mxu1 }
 0x1e0   :  { %4684 = vpow2.f32 %v3772_v41 }
 0x1e7   :  { %v4683_v51 = vpop.eup %4682 }
 0x1e8   :  { %v721_v54 = vmul.f32 %v4683_v51, %v702_v50 }
 0x1ea   :  { %v4685_v59 = vpop.eup %4684  ;;  %v722_v57 = vadd.f32 %v721_v54, %v499_v53 }
 0x1eb   :  { %v718_v2 = vadd.f32 1.0, %v4685_v59 }
 0x1ed   :  { %4686 = vrcp.f32 %v718_v2 }
 0x1ee   :  { %4688 = vtanh.f32 %v722_v57 }
 0x1f7   :  { %v4687_v58 = vpop.eup %4686 }
 0x1f8   :  { %v724_v0 = vsub.f32 1.0, %v4687_v58  ;;  %v4689_v5 = vpop.eup %4688  ;;  %v726_v9 = vmul.f32 0.0, %v4687_v58 }
 0x1fa   :  { %v725_v10 = vmul.f32 %v4689_v5, %v724_v0 }
 0x1fc   :  { %v727_v14 = vadd.f32 %v726_v9, %v725_v10 }
 0x1fe   :  { %728 = vst.msk [vmem:[#allocation2] sm:$0xff] %vm273_vm1, %v727_v14  ;;  %v729_v17 = vpack.c.bf16 %v727_v14, %v727_v14 }
 0x200   :  { %4186 = vmatmul.mubr.msk.bf16.vlgmr.msra.gmra.mrb[20].mxu1 %vm273_vm1, %v729_v17  ;;  %4194 = vmatmul.mubr.msk.bf16.vlgmr.msra.gmra.mrb[24].mxu0 %vm273_vm1, %v729_v17 }
 0x201   :  { %4198 = vmatpush3.bf16.msra.mxu1 %v5033_v44  ;;  %4201 = vmatprep.mubr.msk.bf16.mxu1 %vm4913_vm2, %v4909_v18 }
 0x202   :  { %4199 = vmatprep.subr.bf16.mxu1 %v4909_v18  ;;  %4206 = vmatpush3.bf16.msra.mxu0 %v4994_v29 }
 0x203   :  { %4207 = vmatprep.subr.bf16.mxu0 %v4909_v18  ;;  %4209 = vmatprep.mubr.msk.bf16.mxu0 %vm4913_vm2, %v4909_v18 }
 0x205   :  { %4200 = vmatpush3.bf16.msra.mxu1 %v5045_v47 }
 0x206   :  { %4213 = vmatprep.subr.bf16.mxu1 %v4909_v18  ;;  %4208 = vmatpush3.bf16.msra.mxu0 %v5004_v35 }
 0x207   :  { %4221 = vmatprep.subr.bf16.mxu0 %v4909_v18 }
 0x208   :  { %4202 = vmatmul.mubr.msk.bf16.vlgmr.msra.gmra.mrb[24].mxu1 %vm273_vm1, %v729_v17 }
 0x209   :  { %4214 = vmatpush3.bf16.msra.mxu1 %v5030_v43  ;;  %4217 = vmatprep.mubr.msk.bf16.mxu1 %vm4913_vm2, %v4909_v18 }
 0x20a   :  { %4215 = vmatprep.subr.bf16.mxu1 %v4909_v18 }
 0x20d   :  { %4216 = vmatpush3.bf16.msra.mxu1 %v5040_v46 }
 0x20e   :  { %4229 = vmatprep.subr.bf16.mxu1 %v4909_v18 }
 0x2d3   :  { %v767_v31 = vpop.f32.mrb[20].mxu1  ;;  %v807_v42 = vpop.f32.mrb[24].mxu0 }
 0x2d4   :  { %v853_v63 = vadd.f32 %v767_v31, %v5099_v7  ;;  %v860_v19 = vadd.f32 %v807_v42, %v5102_v8  ;;  %v4187_v22 = vpop.f32.mrb[21].mxu1  ;;  %v4195_v24 = vpop.f32.mrb[25].mxu0 }
 0x2d5   :  { %v770_v32 = vpop.f32.mrb[22].mxu1  ;;  %v810_v33 = vpop.f32.mrb[26].mxu0 }
 0x2d6   :  { %v3776_v34 = vmul.f32 -1.442695, %v853_v63  ;;  %v4188_v41 = vpop.f32.mrb[23].mxu1  ;;  %v4196_v48 = vpop.f32.mrb[27].mxu0  ;;  %v3777_v50 = vmul.f32 -1.442695, %v860_v19 }
 0x2d8   :  { %4690 = vpow2.f32 %v3776_v34 }
 0x2d9   :  { %4692 = vpow2.f32 %v3777_v50 }
 0x2db   :  { %v847_v51 = vpop.f32.mrb[24].mxu1 }
 0x2dc   :  { %v4203_v53 = vpop.f32.mrb[25].mxu1  ;;  %v848_v8 = vadd.f32 %v5145_v49, %v847_v51 }
 0x2dd   :  { %v850_v54 = vpop.f32.mrb[26].mxu1 }
 0x2de   :  { %v4204_v59 = vpop.f32.mrb[27].mxu1 }
 0x2e2   :  { %v4691_v57 = vpop.eup %4690 }
 0x2e3   :  { %v857_v2 = vadd.f32 1.0, %v4691_v57  ;;  %v4693_v7 = vpop.eup %4692 }
 0x2e4   :  { %v864_v58 = vadd.f32 1.0, %v4693_v7 }
 0x2e5   :  { %4694 = vrcp.f32 %v857_v2 }
 0x2e6   :  { %4696 = vrcp.f32 %v864_v58 }
 0x2ef   :  { %v4695_v0 = vpop.eup %4694 }
 0x2f0   :  { %v867_v5 = vmul.f32 %v4695_v0, %v848_v8  ;;  %v4697_v10 = vpop.eup %4696 }
 0x2f1   :  { %v870_v17 = vsub.f32 1.0, %v4697_v10  ;;  %v872_v42 = vmul.f32 %v4697_v10, %v727_v14 }
 0x2f2   :  { %v868_v9 = vadd.f32 %v867_v5, %v5131_v56 }
 0x2f4   :  { %4698 = vtanh.f32 %v868_v9 }
 0x2fe   :  { %v4699_v31 = vpop.eup %4698 }
 0x2ff   :  { %v871_v63 = vmul.f32 %v4699_v31, %v870_v17 }
 0x301   :  { %v873_v19 = vadd.f32 %v872_v42, %v871_v63 }
 0x303   :  { %874 = vst.msk [vmem:[#allocation2 + $0x8] sm:$0xff] %vm273_vm1, %v873_v19  ;;  %v875_v22 = vpack.c.bf16 %v873_v19, %v873_v19 }
 0x305   :  { %4210 = vmatmul.mubr.msk.bf16.vlgmr.msra.gmra.mrb[28].mxu0 %vm273_vm1, %v875_v22  ;;  %4218 = vmatmul.mubr.msk.bf16.vlgmr.msra.gmra.mrb[28].mxu1 %vm273_vm1, %v875_v22 }
 0x306   :  { %4222 = vmatpush3.bf16.msra.mxu0 %v5033_v44  ;;  %4225 = vmatprep.mubr.msk.bf16.mxu0 %vm4913_vm2, %v4909_v18 }
 0x307   :  { %4223 = vmatprep.subr.bf16.mxu0 %v4909_v18  ;;  %4230 = vmatpush3.bf16.msra.mxu1 %v4994_v29 }
 0x308   :  { %4231 = vmatprep.subr.bf16.mxu1 %v4909_v18  ;;  %4233 = vmatprep.mubr.msk.bf16.mxu1 %vm4913_vm2, %v4909_v18 }
 0x30a   :  { %4224 = vmatpush3.bf16.msra.mxu0 %v5045_v47 }
 0x30b   :  { %4237 = vmatprep.subr.bf16.mxu0 %v4909_v18  ;;  %4232 = vmatpush3.bf16.msra.mxu1 %v5004_v35 }
 0x30c   :  { %4245 = vmatprep.subr.bf16.mxu1 %v4909_v18 }
 0x30d   :  { %4226 = vmatmul.mubr.msk.bf16.vlgmr.msra.gmra.mrb[32].mxu0 %vm273_vm1, %v875_v22 }
 0x30e   :  { %4238 = vmatpush3.bf16.msra.mxu0 %v5030_v43  ;;  %4241 = vmatprep.mubr.msk.bf16.mxu0 %vm4913_vm2, %v4909_v18 }
 0x30f   :  { %4239 = vmatprep.subr.bf16.mxu0 %v4909_v18 }
 0x312   :  { %4240 = vmatpush3.bf16.msra.mxu0 %v5040_v46 }
 0x313   :  { %4253 = vmatprep.subr.bf16.mxu0 %v4909_v18 }
 0x3d8   :  { %v913_v56 = vpop.f32.mrb[28].mxu0  ;;  %v953_v14 = vpop.f32.mrb[28].mxu1 }
 0x3d9   :  { %v999_v24 = vadd.f32 %v913_v56, %v5089_v61  ;;  %v1006_v32 = vadd.f32 %v953_v14, %v5092_v62  ;;  %v4211_v33 = vpop.f32.mrb[29].mxu0  ;;  %v4219_v34 = vpop.f32.mrb[29].mxu1 }
 0x3da   :  { %v916_v41 = vpop.f32.mrb[30].mxu0  ;;  %v956_v48 = vpop.f32.mrb[30].mxu1 }
 0x3db   :  { %v3781_v50 = vmul.f32 -1.442695, %v999_v24  ;;  %v4212_v51 = vpop.f32.mrb[31].mxu0  ;;  %v4220_v53 = vpop.f32.mrb[31].mxu1  ;;  %v3782_v54 = vmul.f32 -1.442695, %v1006_v32 }
 0x3dd   :  { %4700 = vpow2.f32 %v3781_v50 }
 0x3de   :  { %4702 = vpow2.f32 %v3782_v54 }
 0x3e0   :  { %v993_v59 = vpop.f32.mrb[32].mxu0 }
 0x3e1   :  { %v4227_v57 = vpop.f32.mrb[33].mxu0  ;;  %v994_v62 = vadd.f32 %v5145_v49, %v993_v59 }
 0x3e2   :  { %v996_v2 = vpop.f32.mrb[34].mxu0 }
 0x3e3   :  { %v4228_v7 = vpop.f32.mrb[35].mxu0 }
 0x3e7   :  { %v4701_v58 = vpop.eup %4700 }
 0x3e8   :  { %v1003_v8 = vadd.f32 1.0, %v4701_v58  ;;  %v4703_v61 = vpop.eup %4702 }
 0x3e9   :  { %v1010_v0 = vadd.f32 1.0, %v4703_v61 }
 0x3ea   :  { %4704 = vrcp.f32 %v1003_v8 }
 0x3eb   :  { %4706 = vrcp.f32 %v1010_v0 }
 0x3f4   :  { %v4705_v5 = vpop.eup %4704 }
 0x3f5   :  { %v1013_v9 = vmul.f32 %v4705_v5, %v994_v62  ;;  %v4707_v17 = vpop.eup %4706 }
 0x3f6   :  { %v1016_v31 = vsub.f32 1.0, %v4707_v17  ;;  %v1018_v63 = vmul.f32 %v4707_v17, %v873_v19 }
 0x3f7   :  { %v1014_v10 = vadd.f32 %v1013_v9, %v5127_v37 }
 0x3f9   :  { %4708 = vtanh.f32 %v1014_v10 }
 0x403   :  { %v4709_v42 = vpop.eup %4708 }
 0x404   :  { %v1017_v22 = vmul.f32 %v4709_v42, %v1016_v31 }
 0x406   :  { %v1019_v56 = vadd.f32 %v1018_v63, %v1017_v22 }
 0x408   :  { %1020 = vst.msk [vmem:[#allocation2 + $0x10] sm:$0xff] %vm273_vm1, %v1019_v56  ;;  %v1021_v14 = vpack.c.bf16 %v1019_v56, %v1019_v56 }
 0x40a   :  { %4234 = vmatmul.mubr.msk.bf16.vlgmr.msra.gmra.mrb[32].mxu1 %vm273_vm1, %v1021_v14  ;;  %4242 = vmatmul.mubr.msk.bf16.vlgmr.msra.gmra.mrb[36].mxu0 %vm273_vm1, %v1021_v14 }
 0x40b   :  { %4246 = vmatpush3.bf16.msra.mxu1 %v5033_v44  ;;  %4249 = vmatprep.mubr.msk.bf16.mxu1 %vm4913_vm2, %v4909_v18 }
 0x40c   :  { %4247 = vmatprep.subr.bf16.mxu1 %v4909_v18  ;;  %4254 = vmatpush3.bf16.msra.mxu0 %v4994_v29 }
 0x40d   :  { %4255 = vmatprep.subr.bf16.mxu0 %v4909_v18  ;;  %4257 = vmatprep.mubr.msk.bf16.mxu0 %vm4913_vm2, %v4909_v18 }
 0x40f   :  { %4248 = vmatpush3.bf16.msra.mxu1 %v5045_v47 }
 0x410   :  { %4261 = vmatprep.subr.bf16.mxu1 %v4909_v18  ;;  %4256 = vmatpush3.bf16.msra.mxu0 %v5004_v35 }
 0x411   :  { %4269 = vmatprep.subr.bf16.mxu0 %v4909_v18 }
 0x412   :  { %4250 = vmatmul.mubr.msk.bf16.vlgmr.msra.gmra.mrb[36].mxu1 %vm273_vm1, %v1021_v14 }
 0x413   :  { %4262 = vmatpush3.bf16.msra.mxu1 %v5030_v43  ;;  %4265 = vmatprep.mubr.msk.bf16.mxu1 %vm4913_vm2, %v4909_v18 }
 0x414   :  { %4263 = vmatprep.subr.bf16.mxu1 %v4909_v18 }
 0x417   :  { %4264 = vmatpush3.bf16.msra.mxu1 %v5040_v46 }
 0x418   :  { %4277 = vmatprep.subr.bf16.mxu1 %v4909_v18 }
 0x4dd   :  { %v1059_v37 = vpop.f32.mrb[32].mxu1  ;;  %v1099_v19 = vpop.f32.mrb[36].mxu0 }
 0x4de   :  { %v1145_v24 = vadd.f32 %v1059_v37, %v5094_v3  ;;  %v1152_v32 = vadd.f32 %v1099_v19, %v5097_v4  ;;  %v4235_v33 = vpop.f32.mrb[33].mxu1  ;;  %v4243_v34 = vpop.f32.mrb[37].mxu0 }
 0x4df   :  { %v1062_v41 = vpop.f32.mrb[34].mxu1  ;;  %v1102_v48 = vpop.f32.mrb[38].mxu0 }
 0x4e0   :  { %v3786_v50 = vmul.f32 -1.442695, %v1145_v24  ;;  %v4236_v51 = vpop.f32.mrb[35].mxu1  ;;  %v4244_v53 = vpop.f32.mrb[39].mxu0  ;;  %v3787_v54 = vmul.f32 -1.442695, %v1152_v32 }
 0x4e2   :  { %4710 = vpow2.f32 %v3786_v50 }
 0x4e3   :  { %4712 = vpow2.f32 %v3787_v54 }
 0x4e5   :  { %v1139_v59 = vpop.f32.mrb[36].mxu1 }
 0x4e6   :  { %v4251_v57 = vpop.f32.mrb[37].mxu1  ;;  %v1140_v4 = vadd.f32 %v5145_v49, %v1139_v59 }
 0x4e7   :  { %v1142_v2 = vpop.f32.mrb[38].mxu1 }
 0x4e8   :  { %v4252_v7 = vpop.f32.mrb[39].mxu1 }
 0x4ec   :  { %v4711_v58 = vpop.eup %4710 }
 0x4ed   :  { %v1149_v8 = vadd.f32 1.0, %v4711_v58  ;;  %v4713_v3 = vpop.eup %4712 }
 0x4ee   :  { %v1156_v61 = vadd.f32 1.0, %v4713_v3 }
 0x4ef   :  { %4714 = vrcp.f32 %v1149_v8 }
 0x4f0   :  { %4716 = vrcp.f32 %v1156_v61 }
 0x4f9   :  { %v4715_v0 = vpop.eup %4714 }
 0x4fa   :  { %v1159_v62 = vmul.f32 %v4715_v0, %v1140_v4  ;;  %v4717_v9 = vpop.eup %4716 }
 0x4fb   :  { %v1162_v10 = vsub.f32 1.0, %v4717_v9  ;;  %v1164_v31 = vmul.f32 %v4717_v9, %v1019_v56 }
 0x4fc   :  { %v1160_v5 = vadd.f32 %v1159_v62, %v5129_v52 }
 0x4fe   :  { %4718 = vtanh.f32 %v1160_v5 }
 0x508   :  { %v4719_v17 = vpop.eup %4718 }
 0x509   :  { %v1163_v42 = vmul.f32 %v4719_v17, %v1162_v10 }
 0x50b   :  { %v1165_v63 = vadd.f32 %v1164_v31, %v1163_v42 }
 0x50d   :  { %1166 = vst.msk [vmem:[#allocation2 + $0x18] sm:$0xff] %vm273_vm1, %v1165_v63  ;;  %v1167_v22 = vpack.c.bf16 %v1165_v63, %v1165_v63 }
 0x50f   :  { %4258 = vmatmul.mubr.msk.bf16.vlgmr.msra.gmra.mrb[40].mxu0 %vm273_vm1, %v1167_v22  ;;  %4266 = vmatmul.mubr.msk.bf16.vlgmr.msra.gmra.mrb[40].mxu1 %vm273_vm1, %v1167_v22 }
 0x510   :  { %4270 = vmatpush3.bf16.msra.mxu0 %v5033_v44  ;;  %4273 = vmatprep.mubr.msk.bf16.mxu0 %vm4913_vm2, %v4909_v18 }
 0x511   :  { %4271 = vmatprep.subr.bf16.mxu0 %v4909_v18  ;;  %4278 = vmatpush3.bf16.msra.mxu1 %v4994_v29 }
 0x512   :  { %4279 = vmatprep.subr.bf16.mxu1 %v4909_v18  ;;  %4281 = vmatprep.mubr.msk.bf16.mxu1 %vm4913_vm2, %v4909_v18 }
 0x514   :  { %4272 = vmatpush3.bf16.msra.mxu0 %v5045_v47 }
 0x515   :  { %4285 = vmatprep.subr.bf16.mxu0 %v4909_v18  ;;  %4280 = vmatpush3.bf16.msra.mxu1 %v5004_v35 }
 0x516   :  { %4293 = vmatprep.subr.bf16.mxu1 %v4909_v18 }
 0x517   :  { %4274 = vmatmul.mubr.msk.bf16.vlgmr.msra.gmra.mrb[44].mxu0 %vm273_vm1, %v1167_v22 }
 0x518   :  { %4286 = vmatpush3.bf16.msra.mxu0 %v5030_v43  ;;  %4289 = vmatprep.mubr.msk.bf16.mxu0 %vm4913_vm2, %v4909_v18 }
 0x519   :  { %4287 = vmatprep.subr.bf16.mxu0 %v4909_v18 }
 0x51c   :  { %4288 = vmatpush3.bf16.msra.mxu0 %v5040_v46 }
 0x51d   :  { %4301 = vmatprep.subr.bf16.mxu0 %v4909_v18 }
 0x5e2   :  { %v1205_v52 = vpop.f32.mrb[40].mxu0  ;;  %v1245_v56 = vpop.f32.mrb[40].mxu1 }
 0x5e3   :  { %v1291_v14 = vadd.f32 %v1205_v52, %v5112_v15  ;;  %v1298_v37 = vadd.f32 %v1245_v56, %v5115_v16  ;;  %v4259_v19 = vpop.f32.mrb[41].mxu0  ;;  %v4267_v24 = vpop.f32.mrb[41].mxu1 }
 0x5e4   :  { %v1208_v32 = vpop.f32.mrb[42].mxu0  ;;  %v1248_v33 = vpop.f32.mrb[42].mxu1 }
 0x5e5   :  { %v3791_v34 = vmul.f32 -1.442695, %v1291_v14  ;;  %v4260_v41 = vpop.f32.mrb[43].mxu0  ;;  %v4268_v48 = vpop.f32.mrb[43].mxu1  ;;  %v3792_v50 = vmul.f32 -1.442695, %v1298_v37 }
 0x5e7   :  { %4720 = vpow2.f32 %v3791_v34 }
 0x5e8   :  { %4722 = vpow2.f32 %v3792_v50 }
 0x5ea   :  { %v1285_v51 = vpop.f32.mrb[44].mxu0 }
 0x5eb   :  { %v4275_v53 = vpop.f32.mrb[45].mxu0  ;;  %v1286_v16 = vadd.f32 %v5145_v49, %v1285_v51 }
 0x5ec   :  { %v1288_v54 = vpop.f32.mrb[46].mxu0 }
 0x5ed   :  { %v4276_v59 = vpop.f32.mrb[47].mxu0 }
 0x5f1   :  { %v4721_v57 = vpop.eup %4720 }
 0x5f2   :  { %v1295_v2 = vadd.f32 1.0, %v4721_v57  ;;  %v4723_v15 = vpop.eup %4722 }
 0x5f3   :  { %v1302_v7 = vadd.f32 1.0, %v4723_v15 }
 0x5f4   :  { %4724 = vrcp.f32 %v1295_v2 }
 0x5f5   :  { %4726 = vrcp.f32 %v1302_v7 }
 0x5fe   :  { %v4725_v58 = vpop.eup %4724 }
 0x5ff   :  { %v1305_v8 = vmul.f32 %v4725_v58, %v1286_v16  ;;  %v4727_v61 = vpop.eup %4726 }
 0x600   :  { %v1308_v4 = vsub.f32 1.0, %v4727_v61  ;;  %v1310_v62 = vmul.f32 %v4727_v61, %v1165_v63 }
 0x601   :  { %v1306_v3 = vadd.f32 %v1305_v8, %v5135_v1 }
 0x603   :  { %4728 = vtanh.f32 %v1306_v3 }
 0x60d   :  { %v4729_v0 = vpop.eup %4728 }
 0x60e   :  { %v1309_v5 = vmul.f32 %v4729_v0, %v1308_v4 }
 0x610   :  { %v1311_v9 = vadd.f32 %v1310_v62, %v1309_v5 }
 0x612   :  { %1312 = vst.msk [vmem:[#allocation2 + $0x20] sm:$0xff] %vm273_vm1, %v1311_v9  ;;  %v1313_v10 = vpack.c.bf16 %v1311_v9, %v1311_v9 }
 0x614   :  { %4282 = vmatmul.mubr.msk.bf16.vlgmr.msra.gmra.mrb[44].mxu1 %vm273_vm1, %v1313_v10  ;;  %4290 = vmatmul.mubr.msk.bf16.vlgmr.msra.gmra.mrb[48].mxu0 %vm273_vm1, %v1313_v10 }
 0x615   :  { %4294 = vmatpush3.bf16.msra.mxu1 %v5033_v44  ;;  %4297 = vmatprep.mubr.msk.bf16.mxu1 %vm4913_vm2, %v4909_v18 }
 0x616   :  { %4295 = vmatprep.subr.bf16.mxu1 %v4909_v18  ;;  %4302 = vmatpush3.bf16.msra.mxu0 %v4994_v29 }
 0x617   :  { %4303 = vmatprep.subr.bf16.mxu0 %v4909_v18  ;;  %4305 = vmatprep.mubr.msk.bf16.mxu0 %vm4913_vm2, %v4909_v18 }
 0x619   :  { %4296 = vmatpush3.bf16.msra.mxu1 %v5045_v47 }
 0x61a   :  { %4309 = vmatprep.subr.bf16.mxu1 %v4909_v18  ;;  %4304 = vmatpush3.bf16.msra.mxu0 %v5004_v35 }
 0x61b   :  { %4317 = vmatprep.subr.bf16.mxu0 %v4909_v18 }
 0x61c   :  { %4298 = vmatmul.mubr.msk.bf16.vlgmr.msra.gmra.mrb[48].mxu1 %vm273_vm1, %v1313_v10 }
 0x61d   :  { %4310 = vmatpush3.bf16.msra.mxu1 %v5030_v43  ;;  %4313 = vmatprep.mubr.msk.bf16.mxu1 %vm4913_vm2, %v4909_v18 }
 0x61e   :  { %4311 = vmatprep.subr.bf16.mxu1 %v4909_v18 }
 0x621   :  { %4312 = vmatpush3.bf16.msra.mxu1 %v5040_v46 }
 0x622   :  { %4325 = vmatprep.subr.bf16.mxu1 %v4909_v18 }
 0x6e7   :  { %v1351_v1 = vpop.f32.mrb[44].mxu1  ;;  %v1391_v17 = vpop.f32.mrb[48].mxu0 }
 0x6e8   :  { %v1437_v31 = vadd.f32 %v1351_v1, %v5122_v28  ;;  %v1444_v42 = vadd.f32 %v1391_v17, %v5125_v30  ;;  %v4283_v63 = vpop.f32.mrb[45].mxu1  ;;  %v4291_v22 = vpop.f32.mrb[49].mxu0 }
 0x6e9   :  { %v1354_v52 = vpop.f32.mrb[46].mxu1  ;;  %v1394_v56 = vpop.f32.mrb[50].mxu0 }
 0x6ea   :  { %v3796_v14 = vmul.f32 -1.442695, %v1437_v31  ;;  %v4284_v37 = vpop.f32.mrb[47].mxu1  ;;  %v4292_v19 = vpop.f32.mrb[51].mxu0  ;;  %v3797_v24 = vmul.f32 -1.442695, %v1444_v42 }
 0x6ec   :  { %4730 = vpow2.f32 %v3796_v14 }
 0x6ed   :  { %4732 = vpow2.f32 %v3797_v24 }
 0x6ef   :  { %v1431_v32 = vpop.f32.mrb[48].mxu1 }
 0x6f0   :  { %v4299_v33 = vpop.f32.mrb[49].mxu1  ;;  %v1432_v30 = vadd.f32 %v5145_v49, %v1431_v32 }
 0x6f1   :  { %v1434_v34 = vpop.f32.mrb[50].mxu1 }
 0x6f2   :  { %v4300_v41 = vpop.f32.mrb[51].mxu1 }
 0x6f6   :  { %v4731_v48 = vpop.eup %4730 }
 0x6f7   :  { %v1441_v50 = vadd.f32 1.0, %v4731_v48  ;;  %v4733_v28 = vpop.eup %4732  ;;  %v1752_v48 = vld [vmem:[#allocation2 + $0x8] sm:$0xff] }
 0x6f8   :  { %v1448_v51 = vadd.f32 1.0, %v4733_v28  ;;  %v1751_v28 = vld [vmem:[#allocation2] sm:$0xff] }
 0x6f9   :  { %4734 = vrcp.f32 %v1441_v50 }
 0x6fa   :  { %4736 = vrcp.f32 %v1448_v51  ;;  %v4663_v51 = vld [vmem:[%s5302_s5 + $0x8] sm:$0xff]  }
 0x703   :  { %v4735_v53 = vpop.eup %4734 }
 0x704   :  { %v1451_v54 = vmul.f32 %v4735_v53, %v1432_v30  ;;  %v4737_v57 = vpop.eup %4736  ;;  %v1754_v30 = vld [vmem:[#allocation2 + $0x18] sm:$0xff] }
 0x705   :  { %v1454_v2 = vsub.f32 1.0, %v4737_v57  ;;  %v1456_v7 = vmul.f32 %v4737_v57, %v1311_v9  ;;  %v1755_v57 = vld [vmem:[#allocation2 + $0x20] sm:$0xff] }
 0x706   :  { %v1452_v59 = vadd.f32 %v1451_v54, %v5139_v13  ;;  %v1753_v54 = vld [vmem:[#allocation2 + $0x10] sm:$0xff] }
 0x708   :  { %4738 = vtanh.f32 %v1452_v59  ;;  %v1764_v59 = vpack.c.bf16 %v1754_v30, %v1753_v54 }
 0x712   :  { %v4739_v15 = vpop.eup %4738 }
 0x713   :  { %v1455_v16 = vmul.f32 %v4739_v15, %v1454_v2  ;;  %v4666_v15 = vld [vmem:[%s3723_s13] sm:$0xff]  }
 0x715   :  { %v1457_v58 = vadd.f32 %v1456_v7, %v1455_v16  ;;  %v4667_v7 = vld [vmem:[%s3723_s13 + $0x8] sm:$0xff]   ;;  %s3737_s13 = sld [smem:[%s5795_s0 + %s4938_s10]]  }
 0x717   :  { %1458 = vst.msk [vmem:[#allocation2 + $0x28] sm:$0xff] %vm273_vm1, %v1457_v58  ;;  %v1459_v8 = vpack.c.bf16 %v1457_v58, %v1457_v58 }
 0x719   :  { %4306 = vmatmul.mubr.msk.bf16.vlgmr.msra.gmra.mrb[52].mxu0 %vm273_vm1, %v1459_v8  ;;  %4314 = vmatmul.mubr.msk.bf16.vlgmr.msra.gmra.mrb[52].mxu1 %vm273_vm1, %v1459_v8 }
 0x71a   :  { %4318 = vmatpush3.bf16.msra.mxu0 %v5033_v44  ;;  %4321 = vmatprep.mubr.msk.bf16.mxu0 %vm4913_vm2, %v4909_v18 }
 0x71b   :  { %4319 = vmatprep.subr.bf16.mxu0 %v4909_v18  ;;  %4326 = vmatpush3.bf16.msra.mxu1 %v4994_v29  ;;  %v4662_v29 = vld [vmem:[%s5302_s5] sm:$0xff]   ;;  %s3736_s5 = sld [smem:[%s5795_s0 + %s4936_s2]]  }
 0x71c   :  { %4327 = vmatprep.subr.bf16.mxu1 %v4909_v18  ;;  %4329 = vmatprep.mubr.msk.bf16.mxu1 %vm4913_vm2, %v4909_v18 }
 0x71e   :  { %4320 = vmatpush3.bf16.msra.mxu0 %v5045_v47  ;;  %v1756_v53 = vld [vmem:[#allocation2 + $0x28] sm:$0xff] }
 0x71f   :  { %4333 = vmatprep.subr.bf16.mxu0 %v4909_v18  ;;  %4328 = vmatpush3.bf16.msra.mxu1 %v5004_v35  ;;  %v1765_v2 = vpack.c.bf16 %v1756_v53, %v1755_v57 }
 0x720   :  { %4341 = vmatprep.subr.bf16.mxu1 %v4909_v18 }
 0x721   :  { %4322 = vmatmul.mubr.msk.bf16.vlgmr.msra.gmra.mrb[56].mxu0 %vm273_vm1, %v1459_v8 }
 0x722   :  { %4334 = vmatpush3.bf16.msra.mxu0 %v5030_v43  ;;  %4337 = vmatprep.mubr.msk.bf16.mxu0 %vm4913_vm2, %v4909_v18 }
 0x723   :  { %4335 = vmatprep.subr.bf16.mxu0 %v4909_v18 }
 0x726   :  { %4336 = vmatpush3.bf16.msra.mxu0 %v5040_v46 }
 0x727   :  { %4349 = vmatprep.subr.bf16.mxu0 %v4662_v29 }
 0x7ec   :  { %v1497_v35 = vpop.f32.mrb[52].mxu0  ;;  %v1537_v13 = vpop.f32.mrb[52].mxu1 }
 0x7ed   :  { %v1583_v43 = vadd.f32 %v1497_v35, %v5107_v11  ;;  %v1590_v3 = vadd.f32 %v1537_v13, %v5110_v12  ;;  %v4307_v61 = vpop.f32.mrb[53].mxu0  ;;  %v4315_v4 = vpop.f32.mrb[53].mxu1 }
 0x7ee   :  { %v1500_v0 = vpop.f32.mrb[54].mxu0  ;;  %v1540_v62 = vpop.f32.mrb[54].mxu1 }
 0x7ef   :  { %v3801_v46 = vmul.f32 -1.442695, %v1583_v43  ;;  %v4308_v5 = vpop.f32.mrb[55].mxu0  ;;  %v4316_v9 = vpop.f32.mrb[55].mxu1  ;;  %v3802_v10 = vmul.f32 -1.442695, %v1590_v3 }
 0x7f1   :  { %4740 = vpow2.f32 %v3801_v46  ;;  %v5339_v46 = vld [vmem:[%s3721_s17] ss:$0 sm:$0xff]  ;;  %s5775_s17 = sld [smem:[%s5795_s0 + %s4939_s14]]  }
 0x7f2   :  { %4742 = vpow2.f32 %v3802_v10 }
 0x7f4   :  { %v1577_v1 = vpop.f32.mrb[56].mxu0 }
 0x7f5   :  { %v4323_v17 = vpop.f32.mrb[57].mxu0  ;;  %v1578_v12 = vadd.f32 %v5145_v49, %v1577_v1 }
 0x7f6   :  { %v1580_v31 = vpop.f32.mrb[58].mxu0 }
 0x7f7   :  { %v4324_v42 = vpop.f32.mrb[59].mxu0 }
 0x7fb   :  { %v4741_v63 = vpop.eup %4740 }
 0x7fc   :  { %v1587_v22 = vadd.f32 1.0, %v4741_v63  ;;  %v4743_v11 = vpop.eup %4742 }
 0x7fd   :  { %v1594_v52 = vadd.f32 1.0, %v4743_v11 }
 0x7fe   :  { %4744 = vrcp.f32 %v1587_v22 }
 0x7ff   :  { %4746 = vrcp.f32 %v1594_v52 }
 0x808   :  { %v4745_v56 = vpop.eup %4744 }
 0x809   :  { %v1597_v14 = vmul.f32 %v4745_v56, %v1578_v12  ;;  %v4747_v19 = vpop.eup %4746 }
 0x80a   :  { %v1600_v24 = vsub.f32 1.0, %v4747_v19  ;;  %v1602_v33 = vmul.f32 %v4747_v19, %v1457_v58 }
 0x80b   :  { %v1598_v37 = vadd.f32 %v1597_v14, %v5133_v60  ;;  %v1763_v60 = vpack.c.bf16 %v1752_v48, %v1751_v28 }
 0x80d   :  { %4748 = vtanh.f32 %v1598_v37 }
 0x817   :  { %v4749_v32 = vpop.eup %4748 }
 0x818   :  { %v1601_v34 = vmul.f32 %v4749_v32, %v1600_v24 }
 0x81a   :  { %v5309_v41 = vadd.f32 %v1602_v33, %v1601_v34 }
 0x81c   :  { %1604 = vst.msk [vmem:[#allocation2 + $0x30] sm:$0xff] %vm273_vm1, %v5309_v41  ;;  %v1605_v50 = vpack.c.bf16 %v5309_v41, %v5309_v41 }
 0x81e   :  { %4330 = vmatmul.mubr.msk.bf16.vlgmr.msra.gmra.mrb[56].mxu1 %vm273_vm1, %v1605_v50  ;;  %4338 = vmatmul.mubr.msk.bf16.vlgmr.msra.gmra.mrb[60].mxu0 %vm273_vm1, %v1605_v50 }
 0x81f   :  { %4342 = vmatpush3.bf16.msra.mxu1 %v5033_v44  ;;  %4350 = vmatpush3.bf16.msra.mxu0 %v4662_v29  ;;  %v4664_v44 = vld [vmem:[%s3722_s9] sm:$0xff]  }
 0x820   :  { %4353 = vmatprep.mubr.msk.bf16.mxu0 %vm273_vm1, %v1763_v60  ;;  %4343 = vmatprep.subr.bf16.mxu1 %v4909_v18 }
 0x821   :  { %4351 = vmatprep.subr.bf16.mxu0 %v4663_v51  ;;  %4345 = vmatprep.mubr.msk.bf16.mxu1 %vm4913_vm2, %v4909_v18 }
 0x823   :  { %4344 = vmatpush3.bf16.msra.mxu1 %v5045_v47  ;;  %4352 = vmatpush3.bf16.msra.mxu0 %v4663_v51  ;;  %v4665_v47 = vld [vmem:[%s3722_s9 + $0x8] sm:$0xff]   ;;  %s3735_s9 = sld [smem:[%s5795_s0 + %s4937_s6]]  }
 0x824   :  { %4361 = vmatprep.subr.bf16.mxu1 %v4664_v44  ;;  %4373 = vmatprep.subr.bf16.mxu0 %v4666_v15 }
 0x826   :  { %4346 = vmatmul.mubr.msk.bf16.vlgmr.msra.gmra.mrb[60].mxu1 %vm273_vm1, %v1605_v50  ;;  %4354 = vmatmul.mubr.msk.bf16.vlgmr.msra.gmra.mrb[64].mxu0 %vm273_vm1, %v1764_v59 }
 0x827   :  { %4357 = vmatprep.mubr.msk.bf16.mxu0 %vm273_vm1, %v1765_v2  ;;  %4362 = vmatpush3.bf16.msra.mxu1 %v4664_v44 }
 0x828   :  { %4363 = vmatprep.subr.bf16.mxu1 %v4665_v47  ;;  %4374 = vmatpush3.bf16.msra.mxu0 %v4666_v15 }
 0x829   :  { %4375 = vmatprep.subr.bf16.mxu0 %v4667_v7 }
 0x82b   :  { %4364 = vmatpush3.bf16.msra.mxu1 %v4665_v47 }
 0x82c   :  { %4376 = vmatpush3.bf16.msra.mxu0 %v4667_v7 }
 0x82d   :  { %4397 = vmatprep.subr.bf16.mxu0 %v4909_v18 }
 0x8f1   :  { %v1643_v16 = vpop.f32.mrb[56].mxu1  ;;  %v1683_v58 = vpop.f32.mrb[60].mxu0 }
 0x8f2   :  { %v1729_v8 = vadd.f32 %v1643_v16, %v5117_v20  ;;  %v1736_v29 = vadd.f32 %v1683_v58, %v5120_v21  ;;  %v4331_v35 = vpop.f32.mrb[57].mxu1  ;;  %v4339_v13 = vpop.f32.mrb[61].mxu0 }
 0x8f3   :  { %v1646_v43 = vpop.f32.mrb[58].mxu1  ;;  %v1686_v3 = vpop.f32.mrb[62].mxu0 }
 0x8f4   :  { %v3806_v61 = vmul.f32 -1.442695, %v1729_v8  ;;  %v4332_v4 = vpop.f32.mrb[59].mxu1  ;;  %v4340_v0 = vpop.f32.mrb[63].mxu0  ;;  %v3807_v62 = vmul.f32 -1.442695, %v1736_v29 }
 0x8f5   :  { %v4670_v4 = vld [vmem:[%s3724_s21 + $0x8] sm:$0xff]  }
 0x8f6   :  { %4750 = vpow2.f32 %v3806_v61  ;;  %v5384_v61 = vld [vmem:[%s3725_s25] sm:$0xff]   ;;  %v5388_v0 = vld [vmem:[%s3725_s25 + $0x8] sm:$0xff]  }
 0x8f7   :  { %4752 = vpow2.f32 %v3807_v62 }
 0x8f9   :  { %v1723_v5 = vpop.f32.mrb[60].mxu1  ;;  %v4355_v9 = vpop.f32.mrb[64].mxu0 }
 0x8fa   :  { %v1841_v10 = vadd.f32 %v4355_v9, %v5339_v46  ;;  %v4347_v1 = vpop.f32.mrb[61].mxu1  ;;  %v1832_v20 = vpop.f32.mrb[65].mxu0  ;;  %v1724_v30 = vadd.f32 %v5145_v49, %v1723_v5 }
 0x8fb   :  { %v1833_v21 = vadd.f32 %v5339_v46, %v1832_v20  ;;  %v1726_v17 = vpop.f32.mrb[62].mxu1  ;;  %v4356_v31 = vpop.f32.mrb[66].mxu0 }
 0x8fc   :  { %v3817_v42 = vmul.f32 -1.442695, %v1841_v10  ;;  %v1844_v63 = vadd.f32 %v4356_v31, %v5339_v46  ;;  %v4348_v22 = vpop.f32.mrb[63].mxu1  ;;  %v1835_v11 = vpop.f32.mrb[67].mxu0 }
 0x8fd   :  { %v3815_v52 = vmul.f32 -1.442695, %v1833_v21  ;;  %v1836_v12 = vadd.f32 %v5339_v46, %v1835_v11 }
 0x8fe   :  { %4754 = vpow2.f32 %v3817_v42  ;;  %v3818_v56 = vmul.f32 -1.442695, %v1844_v63 }
 0x8ff   :  { %4756 = vpow2.f32 %v3815_v52  ;;  %v3816_v14 = vmul.f32 -1.442695, %v1836_v12 }
 0x900   :  { %v4751_v37 = vpop.eup %4750  ;;  %4758 = vpow2.f32 %v3818_v56 }
 0x901   :  { %v1733_v19 = vadd.f32 1.0, %v4751_v37  ;;  %4760 = vpow2.f32 %v3816_v14  ;;  %v4753_v24 = vpop.eup %4752 }
 0x902   :  { %v1740_v32 = vadd.f32 1.0, %v4753_v24 }
 0x903   :  { %4762 = vrcp.f32 %v1733_v19 }
 0x904   :  { %4764 = vrcp.f32 %v1740_v32 }
 0x908   :  { %v4755_v33 = vpop.eup %4754 }
 0x909   :  { %v4757_v34 = vpop.eup %4756  ;;  %v1889_v48 = vadd.f32 1.0, %v4755_v33 }
 0x90a   :  { %v4759_v50 = vpop.eup %4758  ;;  %v1887_v28 = vadd.f32 1.0, %v4757_v34 }
 0x90b   :  { %v4761_v51 = vpop.eup %4760  ;;  %4766 = vrcp.f32 %v1889_v48  ;;  %v1890_v60 = vadd.f32 1.0, %v4759_v50 }
 0x90c   :  { %4768 = vrcp.f32 %v1887_v28  ;;  %v1888_v53 = vadd.f32 1.0, %v4761_v51 }
 0x90d   :  { %v4763_v54 = vpop.eup %4762  ;;  %4770 = vrcp.f32 %v1890_v60 }
 0x90e   :  { %v1743_v59 = vmul.f32 %v4763_v54, %v1724_v30  ;;  %4772 = vrcp.f32 %v1888_v53  ;;  %v4765_v2 = vpop.eup %4764 }
 0x90f   :  { %v1746_v29 = vsub.f32 1.0, %v4765_v2 }
 0x910   :  { %v1744_v57 = vadd.f32 %v1743_v59, %v5137_v6 }
 0x912   :  { %4774 = vtanh.f32 %v1744_v57 }
 0x915   :  { %v4767_v44 = vpop.eup %4766 }
 0x916   :  { %v4769_v47 = vpop.eup %4768  ;;  %v5357_v8 = vmul.f32 %v4767_v44, %v4989_v27  ;;  %v1757_v27 = vld [vmem:[#allocation2 + $0x30] sm:$0xff] }
 0x917   :  { %v4771_v15 = vpop.eup %4770  ;;  %v5351_v58 = vmul.f32 %v4769_v47, %v4985_v25 }
 0x918   :  { %v4773_v7 = vpop.eup %4772  ;;  %v5348_v16 = vmul.f32 %v4771_v15, %v4983_v23  ;;  %v1748_v23 = vmul.f32 %v4765_v2, %v5309_v41  ;;  %v4668_v41 = vld [vmem:[%s3724_s21] sm:$0xff]  }
 0x919   :  { %v5354_v49 = vmul.f32 %v4773_v7, %v4987_v26  ;;  %4385 = vmatprep.subr.bf16.mxu1 %v4668_v41  ;;  %v1928_v7 = vld [vmem:[%s3731_s11] sm:$0x1] }
 0x91a   :  { %v5365_v13 = vpack.c.bf16 %v5348_v16, %v5357_v8 }
 0x91b   :  { %v5361_v6 = vpack.c.bf16 %v5354_v49, %v5351_v58 }
 0x91c   :  { %v4775_v35 = vpop.eup %4774 }
 0x91d   :  { %v1747_v25 = vmul.f32 %v4775_v35, %v1746_v29  ;;  %4365 = vmatprep.mubr.msk.bf16.mxu1 %vm273_vm1, %v5361_v6 }
 0x91e   :  { %4366 = vmatmul.mubr.msk.bf16.vlgmr.msra.gmra.mrb[64].mxu1 %vm273_vm1, %v5365_v13 }
 0x91f   :  { %v1749_v26 = vadd.f32 %v1748_v23, %v1747_v25  ;;  %4386 = vmatpush3.bf16.msra.mxu1 %v4668_v41  ;;  %v3835_v41 = vld [vmem:[%s3730_s15] ss:$0 sm:$0xff] }
 0x920   :  { %4387 = vmatprep.subr.bf16.mxu1 %v4670_v4 }
 0x921   :  { %1750 = vst.msk [vmem:[#allocation2 + $0x38] sm:$0xff] %vm273_vm1, %v1749_v26 }
 0x923   :  { %4388 = vmatpush3.bf16.msra.mxu1 %v4670_v4 }
 0x924   :  { %4405 = vmatprep.subr.bf16.mxu1 %v4909_v18 }
 0x928   :  { %v1758_v43 = vld [vmem:[#allocation2 + $0x38] sm:$0xff] }
 0x929   :  { %v1766_v3 = vpack.c.bf16 %v1758_v43, %v1757_v27 }
 0x92b   :  { %4358 = vmatmul.mubr.msk.bf16.gmra.mrb[68].mxu0 %vm273_vm1, %v1766_v3 }
 0x92c   :  { %4377 = vmatprep.mubr.msk.bf16.mxu0 %vm273_vm1, %v5361_v6 }
 0x933   :  { %4378 = vmatmul.mubr.msk.bf16.vlgmr.msra.gmra.mrb[72].mxu0 %vm273_vm1, %v5365_v13 }
 0x934   :  { %4398 = vmatpush3.bf16.msra.mxu0 %v5384_v61 }
 0x935   :  { %4399 = vmatprep.subr.bf16.mxu0 %v4909_v18 }
 0x938   :  { %4400 = vmatpush3.bf16.msra.mxu0 %v5388_v0 }
 0x939   :  { %4413 = vmatprep.subr.bf16.mxu0 %v4909_v18 }
 0x9f1   :  { %v5403_v62 = vpop.f32.mrb[64].mxu1 }
 0x9f2   :  { %v5405_v5 = vpop.f32.mrb[65].mxu1 }
 0x9f3   :  { %v5407_v9 = vpop.f32.mrb[66].mxu1 }
 0x9f4   :  { %v5409_v10 = vpop.f32.mrb[67].mxu1 }
 0x9fe   :  { %v4359_v1 = vpop.f32.mrb[68].mxu0 }
 0x9ff   :  { %v1857_v20 = vadd.f32 %v4359_v1, %v5339_v46  ;;  %v1848_v21 = vpop.f32.mrb[69].mxu0 }
 0xa00   :  { %v1849_v17 = vadd.f32 %v5339_v46, %v1848_v21  ;;  %v4360_v31 = vpop.f32.mrb[70].mxu0 }
 0xa01   :  { %v3821_v42 = vmul.f32 -1.442695, %v1857_v20  ;;  %v1860_v63 = vadd.f32 %v4360_v31, %v5339_v46  ;;  %v1851_v22 = vpop.f32.mrb[71].mxu0 }
 0xa02   :  { %v3819_v11 = vmul.f32 -1.442695, %v1849_v17  ;;  %v1852_v52 = vadd.f32 %v5339_v46, %v1851_v22 }
 0xa03   :  { %4776 = vpow2.f32 %v3821_v42  ;;  %v3822_v12 = vmul.f32 -1.442695, %v1860_v63 }
 0xa04   :  { %4778 = vpow2.f32 %v3819_v11  ;;  %v3820_v56 = vmul.f32 -1.442695, %v1852_v52 }
 0xa05   :  { %4780 = vpow2.f32 %v3822_v12 }
 0xa06   :  { %4782 = vpow2.f32 %v3820_v56  ;;  %v5415_v14 = vpop.f32.mrb[72].mxu0 }
 0xa07   :  { %v5417_v37 = vpop.f32.mrb[73].mxu0 }
 0xa08   :  { %v5419_v19 = vpop.f32.mrb[74].mxu0 }
 0xa09   :  { %v5421_v24 = vpop.f32.mrb[75].mxu0 }
 0xa0d   :  { %v4777_v32 = vpop.eup %4776 }
 0xa0e   :  { %v4779_v33 = vpop.eup %4778  ;;  %v1893_v34 = vadd.f32 1.0, %v4777_v32  ;;  %v2029_v32 = vld [vmem:[%s3729_s19] sm:$0x1] }
 0xa0f   :  { %v4781_v48 = vpop.eup %4780  ;;  %v1891_v50 = vadd.f32 1.0, %v4779_v33  ;;  %v2030_v33 = vld [vmem:[%s3732_s23] sm:$0x1] }
 0xa10   :  { %v4783_v46 = vpop.eup %4782  ;;  %4784 = vrcp.f32 %v1893_v34  ;;  %v1894_v28 = vadd.f32 1.0, %v4781_v48 }
 0xa11   :  { %4786 = vrcp.f32 %v1891_v50  ;;  %v1892_v51 = vadd.f32 1.0, %v4783_v46 }
 0xa12   :  { %4788 = vrcp.f32 %v1894_v28 }
 0xa13   :  { %4790 = vrcp.f32 %v1892_v51 }
 0xa1a   :  { %v4785_v60 = vpop.eup %4784 }
 0xa1b   :  { %v4787_v30 = vpop.eup %4786  ;;  %v5433_v44 = vmul.f32 %v4785_v60, %v5013_v40  ;;  %v5464_v40 = vld [vmem:[%s5401_s3 + $0x8] sm:$0xff]  }
 0xa1c   :  { %v4789_v53 = vpop.eup %4788  ;;  %v5427_v57 = vmul.f32 %v4787_v30, %v5009_v38  ;;  %v5451_v38 = vld [vmem:[%s5401_s3] sm:$0xff]  }
 0xa1d   :  { %v4791_v54 = vpop.eup %4790  ;;  %v5424_v59 = vmul.f32 %v4789_v53, %v5006_v36  ;;  %v5448_v36 = vld [vmem:[%s5396_s29] sm:$0xff]  }
 0xa1e   :  { %v5430_v2 = vmul.f32 %v4791_v54, %v5011_v39  ;;  %v5459_v39 = vld [vmem:[%s5396_s29 + $0x8] sm:$0xff]  }
 0xa1f   :  { %v1926_v15 = vpack.c.bf16 %v5424_v59, %v5433_v44 }
 0xa20   :  { %v1925_v47 = vpack.c.bf16 %v5430_v2, %v5427_v57 }
 0xa22   :  { %4369 = vmatprep.mubr.msk.bf16.mxu1 %vm273_vm1, %v1925_v47  ;;  %4381 = vmatprep.mubr.msk.bf16.mxu0 %vm273_vm1, %v1925_v47 }
 0xa23   :  { %4370 = vmatmul.mubr.msk.bf16.gmra.mrb[68].mxu1 %vm273_vm1, %v1926_v15  ;;  %4382 = vmatmul.mubr.msk.bf16.gmra.mrb[76].mxu0 %vm273_vm1, %v1926_v15 }
 0xa24   :  { %4389 = vmatprep.mubr.msk.bf16.mxu1 %vm273_vm1, %v5361_v6  ;;  %4401 = vmatprep.mubr.msk.bf16.mxu0 %vm4913_vm2, %v4909_v18 }
 0xa2b   :  { %4390 = vmatmul.mubr.msk.bf16.vlgmr.msra.gmra.mrb[72].mxu1 %vm273_vm1, %v5365_v13  ;;  %4402 = vmatmul.mubr.bf16.vlgmr.msra.gmra.mrb[80].mxu0 %v4914_v45 }
 0xa2c   :  { %4406 = vmatpush3.bf16.msra.mxu1 %v5448_v36  ;;  %4393 = vmatprep.mubr.msk.bf16.mxu1 %vm273_vm1, %v1925_v47 }
 0xa2d   :  { %4407 = vmatprep.subr.bf16.mxu1 %v4909_v18  ;;  %4414 = vmatpush3.bf16.msra.mxu0 %v5451_v38 }
 0xa2e   :  { %4415 = vmatprep.subr.bf16.mxu0 %v4909_v18  ;;  %4417 = vmatprep.mubr.msk.bf16.mxu0 %vm4913_vm2, %v4909_v18 }
 0xa30   :  { %4408 = vmatpush3.bf16.msra.mxu1 %v5459_v39 }
 0xa31   :  { %4416 = vmatpush3.bf16.msra.mxu0 %v5464_v40  ;;  %4421 = vmatprep.subr.bf16.mxu1 %v4909_v18 }
 0xa32   :  { %4429 = vmatprep.subr.bf16.mxu0 %v4909_v18 }
 0xa33   :  { %4394 = vmatmul.mubr.msk.bf16.gmra.mrb[76].mxu1 %vm273_vm1, %v1926_v15 }
 0xa34   :  { %4409 = vmatprep.mubr.msk.bf16.mxu1 %vm4913_vm2, %v4909_v18  ;;  %4418 = vmatmul.mubr.bf16.vlgmr.msra.gmra.mrb[84].mxu0 %v4914_v45 }
 0xa35   :  { %4430 = vmatpush3.bf16.msra.mxu0 %v5448_v36  ;;  %4433 = vmatprep.mubr.msk.bf16.mxu0 %vm4913_vm2, %v4909_v18 }
 0xa36   :  { %4431 = vmatprep.subr.bf16.mxu0 %v4909_v18 }
 0xa39   :  { %4432 = vmatpush3.bf16.msra.mxu0 %v5459_v39 }
 0xa3a   :  { %4445 = vmatprep.subr.bf16.mxu0 %v4909_v18 }
 0xa3b   :  { %4410 = vmatmul.mubr.bf16.vlgmr.msra.gmra.mrb[80].mxu1 %v4914_v45  ;;  %v1927_v45 = vld [vmem:[%s3728_s7] sm:$0x1] }
 0xa3c   :  { %4422 = vmatpush3.bf16.msra.mxu1 %v5384_v61  ;;  %4425 = vmatprep.mubr.msk.bf16.mxu1 %vm4913_vm2, %v4909_v18  ;;  %v1929_v29 = vadd.f32 %v1928_v7, %v1927_v45 }
 0xa3d   :  { %4423 = vmatprep.subr.bf16.mxu1 %v4909_v18 }
 0xa3e   :  { %v5512_v27 = vrot.slane %v1929_v29, %v5083_v55 }
 0xa40   :  { %4424 = vmatpush3.bf16.msra.mxu1 %v5388_v0  ;;  %v1995_v4 = vadd.f32 %v5405_v5, %v5512_v27  ;;  %v2031_v5 = vadd.f32 %v2030_v33, %v2029_v32 }
 0xa41   :  { %4437 = vmatprep.subr.bf16.mxu1 %v4909_v18 }
 0xa42   :  { %v5537_v53 = vrot.slane %v2031_v5, %v5083_v55 }
 0xaf6   :  { %v5499_v6 = vpop.f32.mrb[68].mxu1  ;;  %v5501_v35 = vpop.f32.mrb[76].mxu0 }
 0xaf7   :  { %v5503_v13 = vpop.f32.mrb[69].mxu1  ;;  %v5505_v23 = vpop.f32.mrb[77].mxu0 }
 0xaf8   :  { %v5507_v25 = vpop.f32.mrb[70].mxu1  ;;  %v5509_v26 = vpop.f32.mrb[78].mxu0 }
 0xaf9   :  { %v5514_v43 = vpop.f32.mrb[71].mxu1  ;;  %v5516_v3 = vpop.f32.mrb[79].mxu0 }
 0xafe   :  { %v4391_v1 = vpop.f32.mrb[72].mxu1  ;;  %v2268_v20 = vpop.f32.mrb[80].mxu0 }
 0xaff   :  { %v5526_v21 = vadd.f32 %v4391_v1, %v3835_v41  ;;  %v2378_v17 = vadd.f32 %v2268_v20, %v1995_v4  ;;  %v2172_v31 = vpop.f32.mrb[73].mxu1  ;;  %v4403_v42 = vpop.f32.mrb[81].mxu0  ;;  %v2085_v4 = vadd.f32 %v5417_v37, %v5537_v53 }
 0xb00   :  { %v4392_v63 = vpop.f32.mrb[74].mxu1  ;;  %v2271_v22 = vpop.f32.mrb[82].mxu0  ;;  %v2173_v32 = vadd.f32 %v3835_v41, %v2172_v31  ;;  %v2088_v31 = vadd.f32 %v5421_v24, %v5537_v53 }
 0xb01   :  { %v3849_v11 = vmul.f32 -1.442695, %v2378_v17  ;;  %v5528_v52 = vadd.f32 %v4392_v63, %v3835_v41  ;;  %v2175_v12 = vpop.f32.mrb[75].mxu1  ;;  %v4404_v56 = vpop.f32.mrb[83].mxu0 }
 0xb02   :  { %v5530_v34 = vadd.f32 %v3835_v41, %v2175_v12 }
 0xb03   :  { %4792 = vpow2.f32 %v3849_v11  ;;  %v5548_v11 = vld [vmem:[%s3733_s27] ss:$0 sm:$0xff] }
 0xb06   :  { %v4395_v48 = vpop.f32.mrb[76].mxu1 }
 0xb07   :  { %v5532_v50 = vadd.f32 %v4395_v48, %v3835_v41  ;;  %v2188_v46 = vpop.f32.mrb[77].mxu1  ;;  %v2372_v28 = vpop.f32.mrb[84].mxu0 }
 0xb08   :  { %v5534_v51 = vadd.f32 %v3835_v41, %v2188_v46  ;;  %v4396_v60 = vpop.f32.mrb[78].mxu1  ;;  %v4419_v30 = vpop.f32.mrb[85].mxu0  ;;  %v2373_v12 = vadd.f32 %v5548_v11, %v2372_v28 }
 0xb09   :  { %v5539_v54 = vadd.f32 %v4396_v60, %v3835_v41  ;;  %v2191_v47 = vpop.f32.mrb[79].mxu1  ;;  %v2375_v15 = vpop.f32.mrb[86].mxu0 }
 0xb0a   :  { %v5541_v45 = vadd.f32 %v3835_v41, %v2191_v47  ;;  %v4420_v7 = vpop.f32.mrb[87].mxu0  ;;  %v1998_v41 = vadd.f32 %v5409_v10, %v5512_v27 }
 0xb0d   :  { %v4793_v29 = vpop.eup %4792 }
 0xb0e   :  { %v2382_v1 = vadd.f32 1.0, %v4793_v29  ;;  %v2320_v20 = vpop.f32.mrb[80].mxu1 }
 0xb0f   :  { %v2385_v55 = vadd.f32 %v2320_v20, %v2085_v4  ;;  %v4411_v17 = vpop.f32.mrb[81].mxu1 }
 0xb10   :  { %4794 = vrcp.f32 %v2382_v1  ;;  %v2323_v42 = vpop.f32.mrb[82].mxu1 }
 0xb11   :  { %v3850_v63 = vmul.f32 -1.442695, %v2385_v55  ;;  %v4412_v22 = vpop.f32.mrb[83].mxu1 }
 0xb13   :  { %4796 = vpow2.f32 %v3850_v63 }
 0xb1a   :  { %v4795_v56 = vpop.eup %4794 }
 0xb1b   :  { %v2392_v33 = vmul.f32 %v4795_v56, %v2373_v12 }
 0xb1d   :  { %v4797_v5 = vpop.eup %4796  ;;  %v2393_v48 = vadd.f32 %v2392_v33, %v2173_v32 }
 0xb1e   :  { %v2389_v46 = vadd.f32 1.0, %v4797_v5 }
 0xb20   :  { %4798 = vrcp.f32 %v2389_v46 }
 0xb21   :  { %4800 = vtanh.f32 %v2393_v48 }
 0xb2a   :  { %v4799_v37 = vpop.eup %4798 }
 0xb2b   :  { %v2395_v60 = vsub.f32 1.0, %v4799_v37  ;;  %v4801_v30 = vpop.eup %4800  ;;  %v2397_v47 = vmul.f32 0.0, %v4799_v37 }
 0xb2d   :  { %v2396_v15 = vmul.f32 %v4801_v30, %v2395_v60 }
 0xb2f   :  { %v2398_v7 = vadd.f32 %v2397_v47, %v2396_v15 }
 0xb31   :  { %2399 = vst.msk [vmem:[#allocation2] sm:$0xff] %vm273_vm1, %v2398_v7  ;;  %v2400_v29 = vpack.c.bf16 %v2398_v7, %v2398_v7 }
 0xb33   :  { %4426 = vmatmul.mubr.msk.bf16.vlgmr.msra.gmra.mrb[84].mxu1 %vm273_vm1, %v2400_v29  ;;  %4434 = vmatmul.mubr.msk.bf16.vlgmr.msra.gmra.mrb[88].mxu0 %vm273_vm1, %v2400_v29 }
 0xb34   :  { %4438 = vmatpush3.bf16.msra.mxu1 %v5451_v38  ;;  %4441 = vmatprep.mubr.msk.bf16.mxu1 %vm4913_vm2, %v4909_v18 }
 0xb35   :  { %4439 = vmatprep.subr.bf16.mxu1 %v4909_v18  ;;  %4446 = vmatpush3.bf16.msra.mxu0 %v5384_v61 }
 0xb36   :  { %4447 = vmatprep.subr.bf16.mxu0 %v4909_v18  ;;  %4449 = vmatprep.mubr.msk.bf16.mxu0 %vm4913_vm2, %v4909_v18 }
 0xb38   :  { %4440 = vmatpush3.bf16.msra.mxu1 %v5464_v40 }
 0xb39   :  { %4453 = vmatprep.subr.bf16.mxu1 %v4909_v18  ;;  %4448 = vmatpush3.bf16.msra.mxu0 %v5388_v0 }
 0xb3a   :  { %4461 = vmatprep.subr.bf16.mxu0 %v4909_v18 }
 0xb3b   :  { %4442 = vmatmul.mubr.msk.bf16.vlgmr.msra.gmra.mrb[88].mxu1 %vm273_vm1, %v2400_v29 }
 0xb3c   :  { %4454 = vmatpush3.bf16.msra.mxu1 %v5448_v36  ;;  %4457 = vmatprep.mubr.msk.bf16.mxu1 %vm4913_vm2, %v4909_v18 }
 0xb3d   :  { %4455 = vmatprep.subr.bf16.mxu1 %v4909_v18 }
 0xb40   :  { %4456 = vmatpush3.bf16.msra.mxu1 %v5459_v39 }
 0xb41   :  { %4469 = vmatprep.subr.bf16.mxu1 %v4909_v18 }
 0xc06   :  { %v2438_v28 = vpop.f32.mrb[84].mxu1  ;;  %v2478_v4 = vpop.f32.mrb[88].mxu0 }
 0xc07   :  { %v2524_v1 = vadd.f32 %v2438_v28, %v1998_v41  ;;  %v2531_v20 = vadd.f32 %v2478_v4, %v2088_v31  ;;  %v4427_v55 = vpop.f32.mrb[85].mxu1  ;;  %v4435_v17 = vpop.f32.mrb[89].mxu0 }
 0xc08   :  { %v2441_v42 = vpop.f32.mrb[86].mxu1  ;;  %v2481_v63 = vpop.f32.mrb[90].mxu0 }
 0xc09   :  { %v3854_v22 = vmul.f32 -1.442695, %v2524_v1  ;;  %v4428_v12 = vpop.f32.mrb[87].mxu1  ;;  %v4436_v56 = vpop.f32.mrb[91].mxu0  ;;  %v3855_v32 = vmul.f32 -1.442695, %v2531_v20 }
 0xc0b   :  { %4802 = vpow2.f32 %v3854_v22 }
 0xc0c   :  { %4804 = vpow2.f32 %v3855_v32 }
 0xc0e   :  { %v2518_v33 = vpop.f32.mrb[88].mxu1 }
 0xc0f   :  { %v4443_v5 = vpop.f32.mrb[89].mxu1  ;;  %v2519_v30 = vadd.f32 %v5548_v11, %v2518_v33 }
 0xc10   :  { %v2521_v48 = vpop.f32.mrb[90].mxu1 }
 0xc11   :  { %v4444_v10 = vpop.f32.mrb[91].mxu1 }
 0xc15   :  { %v4803_v46 = vpop.eup %4802 }
 0xc16   :  { %v2528_v24 = vadd.f32 1.0, %v4803_v46  ;;  %v4805_v37 = vpop.eup %4804 }
 0xc17   :  { %v2535_v60 = vadd.f32 1.0, %v4805_v37 }
 0xc18   :  { %4806 = vrcp.f32 %v2528_v24 }
 0xc19   :  { %4808 = vrcp.f32 %v2535_v60 }
 0xc22   :  { %v4807_v47 = vpop.eup %4806 }
 0xc23   :  { %v2538_v15 = vmul.f32 %v4807_v47, %v2519_v30  ;;  %v4809_v41 = vpop.eup %4808 }
 0xc24   :  { %v2541_v31 = vsub.f32 1.0, %v4809_v41  ;;  %v2543_v4 = vmul.f32 %v4809_v41, %v2398_v7  ;;  %v2093_v7 = vadd.f32 %v5415_v14, %v5537_v53 }
 0xc25   :  { %v2539_v29 = vadd.f32 %v2538_v15, %v5530_v34  ;;  %v2003_v34 = vadd.f32 %v5403_v62, %v5512_v27 }
 0xc27   :  { %4810 = vtanh.f32 %v2539_v29 }
 0xc31   :  { %v4811_v28 = vpop.eup %4810 }
 0xc32   :  { %v2542_v1 = vmul.f32 %v4811_v28, %v2541_v31 }
 0xc34   :  { %v2544_v20 = vadd.f32 %v2543_v4, %v2542_v1 }
 0xc36   :  { %2545 = vst.msk [vmem:[#allocation2 + $0x8] sm:$0xff] %vm273_vm1, %v2544_v20  ;;  %v2546_v55 = vpack.c.bf16 %v2544_v20, %v2544_v20 }
 0xc38   :  { %4450 = vmatmul.mubr.msk.bf16.vlgmr.msra.gmra.mrb[92].mxu0 %vm273_vm1, %v2546_v55  ;;  %4458 = vmatmul.mubr.msk.bf16.vlgmr.msra.gmra.mrb[92].mxu1 %vm273_vm1, %v2546_v55 }
 0xc39   :  { %4462 = vmatpush3.bf16.msra.mxu0 %v5451_v38  ;;  %4465 = vmatprep.mubr.msk.bf16.mxu0 %vm4913_vm2, %v4909_v18 }
 0xc3a   :  { %4463 = vmatprep.subr.bf16.mxu0 %v4909_v18  ;;  %4470 = vmatpush3.bf16.msra.mxu1 %v5384_v61 }
 0xc3b   :  { %4471 = vmatprep.subr.bf16.mxu1 %v4909_v18  ;;  %4473 = vmatprep.mubr.msk.bf16.mxu1 %vm4913_vm2, %v4909_v18 }
 0xc3d   :  { %4464 = vmatpush3.bf16.msra.mxu0 %v5464_v40 }
 0xc3e   :  { %4477 = vmatprep.subr.bf16.mxu0 %v4909_v18  ;;  %4472 = vmatpush3.bf16.msra.mxu1 %v5388_v0 }
 0xc3f   :  { %4485 = vmatprep.subr.bf16.mxu1 %v4909_v18 }
 0xc40   :  { %4466 = vmatmul.mubr.msk.bf16.vlgmr.msra.gmra.mrb[96].mxu0 %vm273_vm1, %v2546_v55 }
 0xc41   :  { %4478 = vmatpush3.bf16.msra.mxu0 %v5448_v36  ;;  %4481 = vmatprep.mubr.msk.bf16.mxu0 %vm4913_vm2, %v4909_v18 }
 0xc42   :  { %4479 = vmatprep.subr.bf16.mxu0 %v4909_v18 }
 0xc45   :  { %4480 = vmatpush3.bf16.msra.mxu0 %v5459_v39 }
 0xc46   :  { %4493 = vmatprep.subr.bf16.mxu0 %v4909_v18 }
 0xd0b   :  { %v2584_v17 = vpop.f32.mrb[92].mxu0  ;;  %v2624_v42 = vpop.f32.mrb[92].mxu1 }
 0xd0c   :  { %v2670_v63 = vadd.f32 %v2584_v17, %v2003_v34  ;;  %v2677_v22 = vadd.f32 %v2624_v42, %v2093_v7  ;;  %v4451_v12 = vpop.f32.mrb[93].mxu0  ;;  %v4459_v56 = vpop.f32.mrb[93].mxu1 }
 0xd0d   :  { %v2587_v32 = vpop.f32.mrb[94].mxu0  ;;  %v2627_v33 = vpop.f32.mrb[94].mxu1 }
 0xd0e   :  { %v3859_v5 = vmul.f32 -1.442695, %v2670_v63  ;;  %v4452_v48 = vpop.f32.mrb[95].mxu0  ;;  %v4460_v10 = vpop.f32.mrb[95].mxu1  ;;  %v3860_v46 = vmul.f32 -1.442695, %v2677_v22 }
 0xd10   :  { %4812 = vpow2.f32 %v3859_v5 }
 0xd11   :  { %4814 = vpow2.f32 %v3860_v46 }
 0xd13   :  { %v2664_v24 = vpop.f32.mrb[96].mxu0 }
 0xd14   :  { %v4467_v37 = vpop.f32.mrb[97].mxu0  ;;  %v2665_v29 = vadd.f32 %v5548_v11, %v2664_v24 }
 0xd15   :  { %v2667_v60 = vpop.f32.mrb[98].mxu0 }
 0xd16   :  { %v4468_v62 = vpop.f32.mrb[99].mxu0 }
 0xd1a   :  { %v4813_v30 = vpop.eup %4812 }
 0xd1b   :  { %v2674_v14 = vadd.f32 1.0, %v4813_v30  ;;  %v4815_v47 = vpop.eup %4814 }
 0xd1c   :  { %v2681_v15 = vadd.f32 1.0, %v4815_v47 }
 0xd1d   :  { %4816 = vrcp.f32 %v2674_v14 }
 0xd1e   :  { %4818 = vrcp.f32 %v2681_v15 }
 0xd27   :  { %v4817_v41 = vpop.eup %4816 }
 0xd28   :  { %v2684_v31 = vmul.f32 %v4817_v41, %v2665_v29  ;;  %v4819_v4 = vpop.eup %4818 }
 0xd29   :  { %v2687_v1 = vsub.f32 1.0, %v4819_v4  ;;  %v2689_v34 = vmul.f32 %v4819_v4, %v2544_v20  ;;  %v2096_v20 = vadd.f32 %v5419_v19, %v5537_v53 }
 0xd2a   :  { %v2685_v28 = vadd.f32 %v2684_v31, %v5526_v21  ;;  %v2006_v21 = vadd.f32 %v5407_v9, %v5512_v27 }
 0xd2c   :  { %4820 = vtanh.f32 %v2685_v28 }
 0xd36   :  { %v4821_v55 = vpop.eup %4820 }
 0xd37   :  { %v2688_v7 = vmul.f32 %v4821_v55, %v2687_v1 }
 0xd39   :  { %v2690_v17 = vadd.f32 %v2689_v34, %v2688_v7 }
 0xd3b   :  { %2691 = vst.msk [vmem:[#allocation2 + $0x10] sm:$0xff] %vm273_vm1, %v2690_v17  ;;  %v2692_v42 = vpack.c.bf16 %v2690_v17, %v2690_v17 }
 0xd3d   :  { %4474 = vmatmul.mubr.msk.bf16.vlgmr.msra.gmra.mrb[96].mxu1 %vm273_vm1, %v2692_v42  ;;  %4482 = vmatmul.mubr.msk.bf16.vlgmr.msra.gmra.mrb[100].mxu0 %vm273_vm1, %v2692_v42 }
 0xd3e   :  { %4486 = vmatpush3.bf16.msra.mxu1 %v5451_v38  ;;  %4489 = vmatprep.mubr.msk.bf16.mxu1 %vm4913_vm2, %v4909_v18 }
 0xd3f   :  { %4487 = vmatprep.subr.bf16.mxu1 %v4909_v18  ;;  %4494 = vmatpush3.bf16.msra.mxu0 %v5384_v61 }
 0xd40   :  { %4495 = vmatprep.subr.bf16.mxu0 %v4909_v18  ;;  %4497 = vmatprep.mubr.msk.bf16.mxu0 %vm4913_vm2, %v4909_v18 }
 0xd42   :  { %4488 = vmatpush3.bf16.msra.mxu1 %v5464_v40 }
 0xd43   :  { %4501 = vmatprep.subr.bf16.mxu1 %v4909_v18  ;;  %4496 = vmatpush3.bf16.msra.mxu0 %v5388_v0 }
 0xd44   :  { %4509 = vmatprep.subr.bf16.mxu0 %v4909_v18 }
 0xd45   :  { %4490 = vmatmul.mubr.msk.bf16.vlgmr.msra.gmra.mrb[100].mxu1 %vm273_vm1, %v2692_v42 }
 0xd46   :  { %4502 = vmatpush3.bf16.msra.mxu1 %v5448_v36  ;;  %4505 = vmatprep.mubr.msk.bf16.mxu1 %vm4913_vm2, %v4909_v18 }
 0xd47   :  { %4503 = vmatprep.subr.bf16.mxu1 %v4909_v18 }
 0xd4a   :  { %4504 = vmatpush3.bf16.msra.mxu1 %v5459_v39 }
 0xd4b   :  { %4517 = vmatprep.subr.bf16.mxu1 %v4909_v18 }
 0xe10   :  { %v2730_v63 = vpop.f32.mrb[96].mxu1  ;;  %v2770_v22 = vpop.f32.mrb[100].mxu0 }
 0xe11   :  { %v2816_v12 = vadd.f32 %v2730_v63, %v2006_v21  ;;  %v2823_v56 = vadd.f32 %v2770_v22, %v2096_v20  ;;  %v4475_v32 = vpop.f32.mrb[97].mxu1  ;;  %v4483_v33 = vpop.f32.mrb[101].mxu0 }
 0xe12   :  { %v2733_v5 = vpop.f32.mrb[98].mxu1  ;;  %v2773_v48 = vpop.f32.mrb[102].mxu0 }
 0xe13   :  { %v3864_v10 = vmul.f32 -1.442695, %v2816_v12  ;;  %v4476_v46 = vpop.f32.mrb[99].mxu1  ;;  %v4484_v24 = vpop.f32.mrb[103].mxu0  ;;  %v3865_v37 = vmul.f32 -1.442695, %v2823_v56 }
 0xe15   :  { %4822 = vpow2.f32 %v3864_v10 }
 0xe16   :  { %4824 = vpow2.f32 %v3865_v37 }
 0xe18   :  { %v2810_v60 = vpop.f32.mrb[100].mxu1 }
 0xe19   :  { %v4491_v62 = vpop.f32.mrb[101].mxu1  ;;  %v2811_v29 = vadd.f32 %v5548_v11, %v2810_v60 }
 0xe1a   :  { %v2813_v30 = vpop.f32.mrb[102].mxu1 }
 0xe1b   :  { %v4492_v9 = vpop.f32.mrb[103].mxu1 }
 0xe1f   :  { %v4823_v14 = vpop.eup %4822 }
 0xe20   :  { %v2820_v19 = vadd.f32 1.0, %v4823_v14  ;;  %v4825_v47 = vpop.eup %4824 }
 0xe21   :  { %v2827_v15 = vadd.f32 1.0, %v4825_v47 }
 0xe22   :  { %4826 = vrcp.f32 %v2820_v19 }
 0xe23   :  { %4828 = vrcp.f32 %v2827_v15 }
 0xe2c   :  { %v4827_v41 = vpop.eup %4826 }
 0xe2d   :  { %v2830_v31 = vmul.f32 %v4827_v41, %v2811_v29  ;;  %v4829_v4 = vpop.eup %4828 }
 0xe2e   :  { %v2833_v1 = vsub.f32 1.0, %v4829_v4  ;;  %v2835_v34 = vmul.f32 %v4829_v4, %v2690_v17  ;;  %v2101_v17 = vadd.f32 %v5505_v23, %v5537_v53 }
 0xe2f   :  { %v2831_v28 = vadd.f32 %v2830_v31, %v5528_v52  ;;  %v2011_v52 = vadd.f32 %v5503_v13, %v5512_v27 }
 0xe31   :  { %4830 = vtanh.f32 %v2831_v28 }
 0xe3b   :  { %v4831_v55 = vpop.eup %4830 }
 0xe3c   :  { %v2834_v7 = vmul.f32 %v4831_v55, %v2833_v1 }
 0xe3e   :  { %v2836_v42 = vadd.f32 %v2835_v34, %v2834_v7  ;;  %v2104_v7 = vadd.f32 %v5516_v3, %v5537_v53 }
 0xe40   :  { %2837 = vst.msk [vmem:[#allocation2 + $0x18] sm:$0xff] %vm273_vm1, %v2836_v42  ;;  %v2838_v21 = vpack.c.bf16 %v2836_v42, %v2836_v42 }
 0xe42   :  { %4498 = vmatmul.mubr.msk.bf16.vlgmr.msra.gmra.mrb[104].mxu0 %vm273_vm1, %v2838_v21  ;;  %4506 = vmatmul.mubr.msk.bf16.vlgmr.msra.gmra.mrb[104].mxu1 %vm273_vm1, %v2838_v21 }
 0xe43   :  { %4510 = vmatpush3.bf16.msra.mxu0 %v5451_v38  ;;  %4513 = vmatprep.mubr.msk.bf16.mxu0 %vm4913_vm2, %v4909_v18 }
 0xe44   :  { %4511 = vmatprep.subr.bf16.mxu0 %v4909_v18  ;;  %4518 = vmatpush3.bf16.msra.mxu1 %v5384_v61 }
 0xe45   :  { %4519 = vmatprep.subr.bf16.mxu1 %v4909_v18  ;;  %4521 = vmatprep.mubr.msk.bf16.mxu1 %vm4913_vm2, %v4909_v18 }
 0xe47   :  { %4512 = vmatpush3.bf16.msra.mxu0 %v5464_v40 }
 0xe48   :  { %4525 = vmatprep.subr.bf16.mxu0 %v4909_v18  ;;  %4520 = vmatpush3.bf16.msra.mxu1 %v5388_v0 }
 0xe49   :  { %4533 = vmatprep.subr.bf16.mxu1 %v4909_v18 }
 0xe4a   :  { %4514 = vmatmul.mubr.msk.bf16.vlgmr.msra.gmra.mrb[108].mxu0 %vm273_vm1, %v2838_v21 }
 0xe4b   :  { %4526 = vmatpush3.bf16.msra.mxu0 %v5448_v36  ;;  %4529 = vmatprep.mubr.msk.bf16.mxu0 %vm4913_vm2, %v4909_v18 }
 0xe4c   :  { %4527 = vmatprep.subr.bf16.mxu0 %v4909_v18 }
 0xe4f   :  { %4528 = vmatpush3.bf16.msra.mxu0 %v5459_v39 }
 0xe50   :  { %4541 = vmatprep.subr.bf16.mxu0 %v4909_v18 }
 0xf15   :  { %v2876_v20 = vpop.f32.mrb[104].mxu0  ;;  %v2916_v63 = vpop.f32.mrb[104].mxu1 }
 0xf16   :  { %v2962_v22 = vadd.f32 %v2876_v20, %v2011_v52  ;;  %v2969_v12 = vadd.f32 %v2916_v63, %v2101_v17  ;;  %v4499_v56 = vpop.f32.mrb[105].mxu0  ;;  %v4507_v32 = vpop.f32.mrb[105].mxu1 }
 0xf17   :  { %v2879_v33 = vpop.f32.mrb[106].mxu0  ;;  %v2919_v5 = vpop.f32.mrb[106].mxu1 }
 0xf18   :  { %v3869_v48 = vmul.f32 -1.442695, %v2962_v22  ;;  %v4500_v10 = vpop.f32.mrb[107].mxu0  ;;  %v4508_v46 = vpop.f32.mrb[107].mxu1  ;;  %v3870_v24 = vmul.f32 -1.442695, %v2969_v12 }
 0xf1a   :  { %4832 = vpow2.f32 %v3869_v48 }
 0xf1b   :  { %4834 = vpow2.f32 %v3870_v24 }
 0xf1d   :  { %v2956_v37 = vpop.f32.mrb[108].mxu0 }
 0xf1e   :  { %v4515_v60 = vpop.f32.mrb[109].mxu0  ;;  %v2957_v19 = vadd.f32 %v5548_v11, %v2956_v37 }
 0xf1f   :  { %v2959_v62 = vpop.f32.mrb[110].mxu0 }
 0xf20   :  { %v4516_v13 = vpop.f32.mrb[111].mxu0 }
 0xf24   :  { %v4833_v30 = vpop.eup %4832 }
 0xf25   :  { %v2966_v23 = vadd.f32 1.0, %v4833_v30  ;;  %v4835_v9 = vpop.eup %4834 }
 0xf26   :  { %v2973_v14 = vadd.f32 1.0, %v4835_v9 }
 0xf27   :  { %4836 = vrcp.f32 %v2966_v23 }
 0xf28   :  { %4838 = vrcp.f32 %v2973_v14 }
 0xf31   :  { %v4837_v47 = vpop.eup %4836 }
 0xf32   :  { %v2976_v15 = vmul.f32 %v4837_v47, %v2957_v19  ;;  %v4839_v41 = vpop.eup %4838 }
 0xf33   :  { %v2979_v31 = vsub.f32 1.0, %v4839_v41  ;;  %v2981_v4 = vmul.f32 %v4839_v41, %v2836_v42 }
 0xf34   :  { %v2977_v29 = vadd.f32 %v2976_v15, %v5534_v51  ;;  %v2014_v51 = vadd.f32 %v5514_v43, %v5512_v27 }
 0xf36   :  { %4840 = vtanh.f32 %v2977_v29 }
 0xf40   :  { %v4841_v28 = vpop.eup %4840 }
 0xf41   :  { %v2980_v1 = vmul.f32 %v4841_v28, %v2979_v31 }
 0xf43   :  { %v2982_v55 = vadd.f32 %v2981_v4, %v2980_v1 }
 0xf45   :  { %2983 = vst.msk [vmem:[#allocation2 + $0x20] sm:$0xff] %vm273_vm1, %v2982_v55  ;;  %v2984_v34 = vpack.c.bf16 %v2982_v55, %v2982_v55 }
 0xf47   :  { %4522 = vmatmul.mubr.msk.bf16.vlgmr.msra.gmra.mrb[108].mxu1 %vm273_vm1, %v2984_v34  ;;  %4530 = vmatmul.mubr.msk.bf16.vlgmr.msra.gmra.mrb[112].mxu0 %vm273_vm1, %v2984_v34 }
 0xf48   :  { %4534 = vmatpush3.bf16.msra.mxu1 %v5451_v38  ;;  %4537 = vmatprep.mubr.msk.bf16.mxu1 %vm4913_vm2, %v4909_v18 }
 0xf49   :  { %4535 = vmatprep.subr.bf16.mxu1 %v4909_v18  ;;  %4542 = vmatpush3.bf16.msra.mxu0 %v5384_v61 }
 0xf4a   :  { %4543 = vmatprep.subr.bf16.mxu0 %v4909_v18  ;;  %4545 = vmatprep.mubr.msk.bf16.mxu0 %vm4913_vm2, %v4909_v18 }
 0xf4c   :  { %4536 = vmatpush3.bf16.msra.mxu1 %v5464_v40 }
 0xf4d   :  { %4549 = vmatprep.subr.bf16.mxu1 %v4909_v18  ;;  %4544 = vmatpush3.bf16.msra.mxu0 %v5388_v0 }
 0xf4e   :  { %4557 = vmatprep.subr.bf16.mxu0 %v4909_v18 }
 0xf4f   :  { %4538 = vmatmul.mubr.msk.bf16.vlgmr.msra.gmra.mrb[112].mxu1 %vm273_vm1, %v2984_v34 }
 0xf50   :  { %4550 = vmatpush3.bf16.msra.mxu1 %v5448_v36  ;;  %4553 = vmatprep.mubr.msk.bf16.mxu1 %vm4913_vm2, %v4909_v18 }
 0xf51   :  { %4551 = vmatprep.subr.bf16.mxu1 %v4909_v18 }
 0xf54   :  { %4552 = vmatpush3.bf16.msra.mxu1 %v5459_v39 }
 0xf55   :  { %4565 = vmatprep.subr.bf16.mxu1 %v4909_v18 }
0x101a   :  { %v3022_v42 = vpop.f32.mrb[108].mxu1  ;;  %v3062_v21 = vpop.f32.mrb[112].mxu0 }
0x101b   :  { %v3108_v52 = vadd.f32 %v3022_v42, %v2014_v51  ;;  %v3115_v17 = vadd.f32 %v3062_v21, %v2104_v7  ;;  %v4523_v20 = vpop.f32.mrb[109].mxu1  ;;  %v4531_v63 = vpop.f32.mrb[113].mxu0 }
0x101c   :  { %v3025_v22 = vpop.f32.mrb[110].mxu1  ;;  %v3065_v12 = vpop.f32.mrb[114].mxu0 }
0x101d   :  { %v3874_v56 = vmul.f32 -1.442695, %v3108_v52  ;;  %v4524_v32 = vpop.f32.mrb[111].mxu1  ;;  %v4532_v33 = vpop.f32.mrb[115].mxu0  ;;  %v3875_v5 = vmul.f32 -1.442695, %v3115_v17 }
0x101f   :  { %4842 = vpow2.f32 %v3874_v56 }
0x1020   :  { %4844 = vpow2.f32 %v3875_v5 }
0x1022   :  { %v3102_v48 = vpop.f32.mrb[112].mxu1 }
0x1023   :  { %v4539_v10 = vpop.f32.mrb[113].mxu1  ;;  %v3103_v62 = vadd.f32 %v5548_v11, %v3102_v48 }
0x1024   :  { %v3105_v46 = vpop.f32.mrb[114].mxu1 }
0x1025   :  { %v4540_v43 = vpop.f32.mrb[115].mxu1 }
0x1029   :  { %v4843_v24 = vpop.eup %4842 }
0x102a   :  { %v3112_v3 = vadd.f32 1.0, %v4843_v24  ;;  %v4845_v37 = vpop.eup %4844 }
0x102b   :  { %v3119_v60 = vadd.f32 1.0, %v4845_v37  ;;  %v3423_v37 = vld [vmem:[#allocation2 + $0x8] sm:$0xff] }
0x102c   :  { %4846 = vrcp.f32 %v3112_v3 }
0x102d   :  { %4848 = vrcp.f32 %v3119_v60 }
0x1036   :  { %v4847_v13 = vpop.eup %4846 }
0x1037   :  { %v3122_v30 = vmul.f32 %v4847_v13, %v3103_v62  ;;  %v4849_v9 = vpop.eup %4848  ;;  %v3422_v62 = vld [vmem:[#allocation2] sm:$0xff]  ;;  %v4677_v13 = vld [vmem:[%s5715_s1 + $0x8] sm:$0xff]  }
0x1038   :  { %v3125_v14 = vsub.f32 1.0, %v4849_v9  ;;  %v3127_v47 = vmul.f32 %v4849_v9, %v2982_v55  ;;  %v3424_v9 = vld [vmem:[#allocation2 + $0x10] sm:$0xff] }
0x1039   :  { %v3123_v23 = vadd.f32 %v3122_v30, %v5541_v45  ;;  %v3425_v30 = vld [vmem:[#allocation2 + $0x18] sm:$0xff] }
0x103b   :  { %4850 = vtanh.f32 %v3123_v23 }
0x1045   :  { %v4851_v19 = vpop.eup %4850 }
0x1046   :  { %v3126_v15 = vmul.f32 %v4851_v19, %v3125_v14  ;;  %v3435_v14 = vpack.c.bf16 %v3425_v30, %v3424_v9  ;;  %v3426_v19 = vld [vmem:[#allocation2 + $0x20] sm:$0xff] }
0x1048   :  { %v3128_v29 = vadd.f32 %v3127_v47, %v3126_v15  ;;  %v2112_v15 = vadd.f32 %v5509_v26, %v5537_v53 }
0x104a   :  { %3129 = vst.msk [vmem:[#allocation2 + $0x28] sm:$0xff] %vm273_vm1, %v3128_v29  ;;  %v3130_v41 = vpack.c.bf16 %v3128_v29, %v3128_v29 }
0x104c   :  { %4546 = vmatmul.mubr.msk.bf16.vlgmr.msra.gmra.mrb[116].mxu0 %vm273_vm1, %v3130_v41  ;;  %4554 = vmatmul.mubr.msk.bf16.vlgmr.msra.gmra.mrb[116].mxu1 %vm273_vm1, %v3130_v41 }
0x104d   :  { %4558 = vmatpush3.bf16.msra.mxu0 %v5451_v38  ;;  %4561 = vmatprep.mubr.msk.bf16.mxu0 %vm4913_vm2, %v4909_v18 }
0x104e   :  { %4559 = vmatprep.subr.bf16.mxu0 %v4909_v18  ;;  %4566 = vmatpush3.bf16.msra.mxu1 %v5384_v61  ;;  %v4676_v61 = vld [vmem:[%s5715_s1] sm:$0xff]  }
0x104f   :  { %4567 = vmatprep.subr.bf16.mxu1 %v4909_v18  ;;  %4569 = vmatprep.mubr.msk.bf16.mxu1 %vm4913_vm2, %v4909_v18 }
0x1051   :  { %4560 = vmatpush3.bf16.msra.mxu0 %v5464_v40  ;;  %v3427_v23 = vld [vmem:[#allocation2 + $0x28] sm:$0xff] }
0x1052   :  { %4573 = vmatprep.subr.bf16.mxu0 %v4909_v18  ;;  %4568 = vmatpush3.bf16.msra.mxu1 %v5388_v0  ;;  %v2019_v0 = vadd.f32 %v5499_v6, %v5512_v27  ;;  %v3436_v47 = vpack.c.bf16 %v3427_v23, %v3426_v19 }
0x1053   :  { %4581 = vmatprep.subr.bf16.mxu1 %v4909_v18 }
0x1054   :  { %4562 = vmatmul.mubr.msk.bf16.vlgmr.msra.gmra.mrb[120].mxu0 %vm273_vm1, %v3130_v41 }
0x1055   :  { %4574 = vmatpush3.bf16.msra.mxu0 %v5448_v36  ;;  %4577 = vmatprep.mubr.msk.bf16.mxu0 %vm4913_vm2, %v4909_v18  ;;  %v2109_v36 = vadd.f32 %v5501_v35, %v5537_v53 }
0x1056   :  { %4575 = vmatprep.subr.bf16.mxu0 %v4909_v18 }
0x1059   :  { %4576 = vmatpush3.bf16.msra.mxu0 %v5459_v39 }
0x105a   :  { %4589 = vmatprep.subr.bf16.mxu0 %v4676_v61 }
0x111f   :  { %v3168_v45 = vpop.f32.mrb[116].mxu0  ;;  %v3208_v31 = vpop.f32.mrb[116].mxu1 }
0x1120   :  { %v3254_v28 = vadd.f32 %v3168_v45, %v2019_v0  ;;  %v3261_v4 = vadd.f32 %v3208_v31, %v2109_v36  ;;  %v4547_v39 = vpop.f32.mrb[117].mxu0  ;;  %v4555_v1 = vpop.f32.mrb[117].mxu1 }
0x1121   :  { %v3171_v55 = vpop.f32.mrb[118].mxu0  ;;  %v3211_v34 = vpop.f32.mrb[118].mxu1 }
0x1122   :  { %v3879_v51 = vmul.f32 -1.442695, %v3254_v28  ;;  %v4548_v7 = vpop.f32.mrb[119].mxu0  ;;  %v4556_v42 = vpop.f32.mrb[119].mxu1  ;;  %v3880_v21 = vmul.f32 -1.442695, %v3261_v4 }
0x1123   :  { %v5752_v34 = vld [vmem:[%s3735_s9] ss:$0 sm:$0xff] }
0x1124   :  { %4852 = vpow2.f32 %v3879_v51 }
0x1125   :  { %4854 = vpow2.f32 %v3880_v21 }
0x1127   :  { %v3248_v52 = vpop.f32.mrb[120].mxu0 }
0x1128   :  { %v4563_v17 = vpop.f32.mrb[121].mxu0  ;;  %v3249_v56 = vadd.f32 %v5548_v11, %v3248_v52 }
0x1129   :  { %v3251_v20 = vpop.f32.mrb[122].mxu0 }
0x112a   :  { %v4564_v6 = vpop.f32.mrb[123].mxu0 }
0x112e   :  { %v4853_v63 = vpop.eup %4852 }
0x112f   :  { %v3258_v35 = vadd.f32 1.0, %v4853_v63  ;;  %v4855_v22 = vpop.eup %4854 }
0x1130   :  { %v3265_v12 = vadd.f32 1.0, %v4855_v22 }
0x1131   :  { %4856 = vrcp.f32 %v3258_v35 }
0x1132   :  { %4858 = vrcp.f32 %v3265_v12 }
0x113b   :  { %v4857_v32 = vpop.eup %4856 }
0x113c   :  { %v3268_v33 = vmul.f32 %v4857_v32, %v3249_v56  ;;  %v4859_v48 = vpop.eup %4858 }
0x113d   :  { %v3271_v10 = vsub.f32 1.0, %v4859_v48  ;;  %v3273_v43 = vmul.f32 %v4859_v48, %v3128_v29 }
0x113e   :  { %v3269_v5 = vadd.f32 %v3268_v33, %v5532_v50  ;;  %v3434_v50 = vpack.c.bf16 %v3423_v37, %v3422_v62 }
0x1140   :  { %4860 = vtanh.f32 %v3269_v5 }
0x114a   :  { %v4861_v46 = vpop.eup %4860 }
0x114b   :  { %v3272_v24 = vmul.f32 %v4861_v46, %v3271_v10 }
0x114d   :  { %v5724_v3 = vadd.f32 %v3273_v43, %v3272_v24 }
0x114f   :  { %3275 = vst.msk [vmem:[#allocation2 + $0x30] sm:$0xff] %vm273_vm1, %v5724_v3  ;;  %v3276_v60 = vpack.c.bf16 %v5724_v3, %v5724_v3 }
0x1151   :  { %4570 = vmatmul.mubr.msk.bf16.vlgmr.msra.gmra.mrb[120].mxu1 %vm273_vm1, %v3276_v60  ;;  %4578 = vmatmul.mubr.msk.bf16.vlgmr.msra.gmra.mrb[124].mxu0 %vm273_vm1, %v3276_v60 }
0x1152   :  { %4582 = vmatpush3.bf16.msra.mxu1 %v5451_v38  ;;  %4590 = vmatpush3.bf16.msra.mxu0 %v4676_v61  ;;  %v4679_v38 = vld [vmem:[%s3736_s5 + $0x8] sm:$0xff]  }
0x1153   :  { %4593 = vmatprep.mubr.msk.bf16.mxu0 %vm273_vm1, %v3434_v50  ;;  %4583 = vmatprep.subr.bf16.mxu1 %v4909_v18 }
0x1154   :  { %4591 = vmatprep.subr.bf16.mxu0 %v4677_v13  ;;  %4585 = vmatprep.mubr.msk.bf16.mxu1 %vm4913_vm2, %v4909_v18  ;;  %v4678_v18 = vld [vmem:[%s3736_s5] sm:$0xff]  }
0x1156   :  { %4584 = vmatpush3.bf16.msra.mxu1 %v5464_v40  ;;  %4592 = vmatpush3.bf16.msra.mxu0 %v4677_v13  ;;  %v2022_v40 = vadd.f32 %v5507_v25, %v5512_v27 }
0x1157   :  { %4601 = vmatprep.subr.bf16.mxu1 %v4678_v18 }
0x1159   :  { %4586 = vmatmul.mubr.msk.bf16.vlgmr.msra.gmra.mrb[124].mxu1 %vm273_vm1, %v3276_v60  ;;  %4594 = vmatmul.mubr.msk.bf16.vlgmr.msra.gmra.mrb[128].mxu0 %vm273_vm1, %v3435_v14 }
0x115a   :  { %4597 = vmatprep.mubr.msk.bf16.mxu0 %vm273_vm1, %v3436_v47  ;;  %4602 = vmatpush3.bf16.msra.mxu1 %v4678_v18 }
0x115b   :  { %4603 = vmatprep.subr.bf16.mxu1 %v4679_v38 }
0x115e   :  { %4604 = vmatpush3.bf16.msra.mxu1 %v4679_v38 }
0x1224   :  { %v3314_v29 = vpop.f32.mrb[120].mxu1  ;;  %v3354_v41 = vpop.f32.mrb[124].mxu0 }
0x1225   :  { %v3400_v61 = vadd.f32 %v3314_v29, %v2022_v40  ;;  %v3407_v0 = vadd.f32 %v3354_v41, %v2112_v15  ;;  %v4571_v36 = vpop.f32.mrb[121].mxu1  ;;  %v4579_v45 = vpop.f32.mrb[125].mxu0 }
0x1226   :  { %v3317_v31 = vpop.f32.mrb[122].mxu1  ;;  %v3357_v28 = vpop.f32.mrb[126].mxu0 }
0x1227   :  { %v3884_v4 = vmul.f32 -1.442695, %v3400_v61  ;;  %v4572_v39 = vpop.f32.mrb[123].mxu1  ;;  %v4580_v1 = vpop.f32.mrb[127].mxu0  ;;  %v3885_v55 = vmul.f32 -1.442695, %v3407_v0 }
0x1229   :  { %4862 = vpow2.f32 %v3884_v4 }
0x122a   :  { %4864 = vpow2.f32 %v3885_v55 }
0x122c   :  { %v3394_v25 = vpop.f32.mrb[124].mxu1  ;;  %v4595_v27 = vpop.f32.mrb[128].mxu0 }
0x122d   :  { %v3512_v26 = vadd.f32 %v4595_v27, %v5752_v34  ;;  %v4587_v53 = vpop.f32.mrb[125].mxu1  ;;  %v3503_v51 = vpop.f32.mrb[129].mxu0  ;;  %v3395_v62 = vadd.f32 %v5548_v11, %v3394_v25 }
0x122e   :  { %v3504_v7 = vadd.f32 %v5752_v34, %v3503_v51  ;;  %v3397_v42 = vpop.f32.mrb[126].mxu1  ;;  %v4596_v21 = vpop.f32.mrb[130].mxu0 }
0x122f   :  { %v3895_v52 = vmul.f32 -1.442695, %v3512_v26  ;;  %v3515_v17 = vadd.f32 %v4596_v21, %v5752_v34  ;;  %v4588_v20 = vpop.f32.mrb[127].mxu1  ;;  %v3506_v6 = vpop.f32.mrb[131].mxu0 }
0x1230   :  { %v3893_v63 = vmul.f32 -1.442695, %v3504_v7  ;;  %v3507_v35 = vadd.f32 %v5752_v34, %v3506_v6 }
0x1231   :  { %4866 = vpow2.f32 %v3895_v52  ;;  %v3896_v22 = vmul.f32 -1.442695, %v3515_v17 }
0x1232   :  { %4868 = vpow2.f32 %v3893_v63  ;;  %v3894_v12 = vmul.f32 -1.442695, %v3507_v35 }
0x1233   :  { %v4863_v56 = vpop.eup %4862  ;;  %4870 = vpow2.f32 %v3896_v22 }
0x1234   :  { %v3404_v32 = vadd.f32 1.0, %v4863_v56  ;;  %4872 = vpow2.f32 %v3894_v12  ;;  %v4865_v33 = vpop.eup %4864 }
0x1235   :  { %v3411_v5 = vadd.f32 1.0, %v4865_v33 }
0x1236   :  { %4874 = vrcp.f32 %v3404_v32 }
0x1237   :  { %4876 = vrcp.f32 %v3411_v5 }
0x123b   :  { %v4867_v48 = vpop.eup %4866 }
0x123c   :  { %v4869_v10 = vpop.eup %4868  ;;  %v3560_v46 = vadd.f32 1.0, %v4867_v48 }
0x123d   :  { %v4871_v43 = vpop.eup %4870  ;;  %v3558_v24 = vadd.f32 1.0, %v4869_v10 }
0x123e   :  { %v4873_v37 = vpop.eup %4872  ;;  %4878 = vrcp.f32 %v3560_v46  ;;  %v3561_v60 = vadd.f32 1.0, %v4871_v43 }
0x123f   :  { %4880 = vrcp.f32 %v3558_v24  ;;  %v3559_v13 = vadd.f32 1.0, %v4873_v37 }
0x1240   :  { %v4875_v50 = vpop.eup %4874  ;;  %4882 = vrcp.f32 %v3561_v60 }
0x1241   :  { %v3414_v30 = vmul.f32 %v4875_v50, %v3395_v62  ;;  %4884 = vrcp.f32 %v3559_v13  ;;  %v4877_v9 = vpop.eup %4876 }
0x1242   :  { %v3417_v41 = vsub.f32 1.0, %v4877_v9 }
0x1243   :  { %v3415_v23 = vadd.f32 %v3414_v30, %v5539_v54  ;;  %v3419_v54 = vmul.f32 %v4877_v9, %v5724_v3 }
0x1245   :  { %4886 = vtanh.f32 %v3415_v23 }
0x1248   :  { %v4879_v14 = vpop.eup %4878 }
0x1249   :  { %v4881_v19 = vpop.eup %4880  ;;  %v3584_v38 = vmul.f32 %v4879_v14, %v5357_v8  ;;  %v3428_v8 = vld [vmem:[#allocation2 + $0x30] sm:$0xff] }
0x124a   :  { %v4883_v47 = vpop.eup %4882  ;;  %v3582_v11 = vmul.f32 %v4881_v19, %v5351_v58  ;;  %v3901_v58 = vld [vmem:[%s3737_s13] ss:$0 sm:$0xff] }
0x124b   :  { %v4885_v18 = vpop.eup %4884  ;;  %v3585_v40 = vmul.f32 %v4883_v47, %v5348_v16 }
0x124c   :  { %v3583_v15 = vmul.f32 %v4885_v18, %v5354_v49 }
0x124d   :  { %v3595_v29 = vpack.c.bf16 %v3585_v40, %v3584_v38 }
0x124e   :  { %v3594_v61 = vpack.c.bf16 %v3583_v15, %v3582_v11 }
0x124f   :  { %v4887_v0 = vpop.eup %4886 }
0x1250   :  { %v3418_v36 = vmul.f32 %v4887_v0, %v3417_v41  ;;  %4605 = vmatprep.mubr.msk.bf16.mxu1 %vm273_vm1, %v3594_v61 }
0x1251   :  { %4606 = vmatmul.mubr.msk.bf16.vlgmr.msra.gmra.mrb[128].mxu1 %vm273_vm1, %v3595_v29 }
0x1252   :  { %v3420_v45 = vadd.f32 %v3419_v54, %v3418_v36 }
0x1254   :  { %3421 = vst.msk [vmem:[#allocation2 + $0x38] sm:$0xff] %vm273_vm1, %v3420_v45 }
0x125b   :  { %v3429_v16 = vld [vmem:[#allocation2 + $0x38] sm:$0xff] }
0x125c   :  { %v3437_v31 = vpack.c.bf16 %v3429_v16, %v3428_v8 }
0x125e   :  { %4598 = vmatmul.mubr.msk.bf16.gmra.mrb[132].mxu0 %vm273_vm1, %v3437_v31 }
0x1324   :  { %v4607_v49 = vpop.f32.mrb[128].mxu1 }
0x1325   :  { %v3672_v3 = vadd.f32 %v4607_v49, %v3901_v58  ;;  %v3663_v28 = vpop.f32.mrb[129].mxu1 }
0x1326   :  { %v3664_v4 = vadd.f32 %v3901_v58, %v3663_v28  ;;  %v4608_v39 = vpop.f32.mrb[130].mxu1 }
0x1327   :  { %3696 = vst [vmem:[%s5775_s17 + $0x10] sm:$0xff] %v3672_v3  ;;  %v3675_v1 = vadd.f32 %v4608_v39, %v3901_v58  ;;  %v3666_v55 = vpop.f32.mrb[131].mxu1 }
0x1328   :  { %3694 = vst [vmem:[%s5775_s17] sm:$0xff] %v3664_v4  ;;  %v3667_v25 = vadd.f32 %v3901_v58, %v3666_v55 }
0x1329   :  { %3697 = vst [vmem:[%s5775_s17 + $0x18] sm:$0xff] %v3675_v1 }
0x132a   :  { %3695 = vst [vmem:[%s5775_s17 + $0x8] sm:$0xff] %v3667_v25 }
0x1331   :  { %v4599_v27 = vpop.f32.mrb[132].mxu0 }
0x1332   :  { %v3528_v26 = vadd.f32 %v4599_v27, %v5752_v34  ;;  %v3519_v53 = vpop.f32.mrb[133].mxu0 }
0x1333   :  { %v3520_v51 = vadd.f32 %v5752_v34, %v3519_v53  ;;  %v4600_v7 = vpop.f32.mrb[134].mxu0 }
0x1334   :  { %v3899_v42 = vmul.f32 -1.442695, %v3528_v26  ;;  %v3531_v21 = vadd.f32 %v4600_v7, %v5752_v34  ;;  %v3522_v52 = vpop.f32.mrb[135].mxu0 }
0x1335   :  { %v3897_v17 = vmul.f32 -1.442695, %v3520_v51  ;;  %v3523_v20 = vadd.f32 %v5752_v34, %v3522_v52 }
0x1336   :  { %4888 = vpow2.f32 %v3899_v42  ;;  %v3900_v6 = vmul.f32 -1.442695, %v3531_v21 }
0x1337   :  { %4890 = vpow2.f32 %v3897_v17  ;;  %v3898_v63 = vmul.f32 -1.442695, %v3523_v20 }
0x1338   :  { %4892 = vpow2.f32 %v3900_v6 }
0x1339   :  { %4894 = vpow2.f32 %v3898_v63 }
0x1340   :  { %v4889_v35 = vpop.eup %4888 }
0x1341   :  { %v4891_v22 = vpop.eup %4890  ;;  %v3564_v12 = vadd.f32 1.0, %v4889_v35 }
0x1342   :  { %v4893_v56 = vpop.eup %4892  ;;  %v3562_v32 = vadd.f32 1.0, %v4891_v22 }
0x1343   :  { %v4895_v33 = vpop.eup %4894  ;;  %4896 = vrcp.f32 %v3564_v12  ;;  %v3565_v5 = vadd.f32 1.0, %v4893_v56 }
0x1344   :  { %4898 = vrcp.f32 %v3562_v32  ;;  %v3563_v48 = vadd.f32 1.0, %v4895_v33 }
0x1345   :  { %4900 = vrcp.f32 %v3565_v5 }
0x1346   :  { %4902 = vrcp.f32 %v3563_v48 }
0x134d   :  { %v4897_v10 = vpop.eup %4896 }
0x134e   :  { %v4899_v34 = vpop.eup %4898  ;;  %v3588_v24 = vmul.f32 %v4897_v10, %v5433_v44 }
0x134f   :  { %v4901_v46 = vpop.eup %4900  ;;  %v3586_v60 = vmul.f32 %v4899_v34, %v5427_v57 }
0x1350   :  { %v4903_v43 = vpop.eup %4902  ;;  %v3589_v37 = vmul.f32 %v4901_v46, %v5424_v59 }
0x1351   :  { %v3587_v62 = vmul.f32 %v4903_v43, %v5430_v2 }
0x1352   :  { %v3597_v13 = vpack.c.bf16 %v3589_v37, %v3588_v24 }
0x1353   :  { %v3596_v50 = vpack.c.bf16 %v3587_v62, %v3586_v60 }
0x1355   :  { %4609 = vmatprep.mubr.msk.bf16.mxu1 %vm273_vm1, %v3596_v50 }
0x1356   :  { %4610 = vmatmul.mubr.msk.bf16.gmra.mrb[132].mxu1 %vm273_vm1, %v3597_v13 }
0x1429   :  { %v4611_v30 = vpop.f32.mrb[132].mxu1 }
0x142a   :  { %v3688_v23 = vadd.f32 %v4611_v30, %v3901_v58  ;;  %v3679_v9 = vpop.f32.mrb[133].mxu1 }
0x142b   :  { %v3680_v14 = vadd.f32 %v3901_v58, %v3679_v9  ;;  %v4612_v44 = vpop.f32.mrb[134].mxu1 }
0x142c   :  { %3700 = vst [vmem:[%s5775_s17 + $0x30] sm:$0xff] %v3688_v23  ;;  %v3691_v19 = vadd.f32 %v4612_v44, %v3901_v58  ;;  %v3682_v59 = vpop.f32.mrb[135].mxu1 }
0x142d   :  { %3698 = vst [vmem:[%s5775_s17 + $0x20] sm:$0xff] %v3680_v14  ;;  %v3683_v57 = vadd.f32 %v3901_v58, %v3682_v59 }
0x142e   :  { %3701 = vst [vmem:[%s5775_s17 + $0x38] sm:$0xff] %v3691_v19 }
0x142f   :  { %3699 = vst [vmem:[%s5775_s17 + $0x28] sm:$0xff] %v3683_v57 }

</bundles_post_ra>
